<compile_context>
chip_gen: v5e
topology: v5e:2x2
jax: 0.10.0
libtpu: 0.0.40
codegen_flags: <defaults>
</compile_context>

<pallas_src>
import jax
import jax.numpy as jnp
from jax import lax
from jax.experimental import pallas as pl
from jax.experimental.pallas import tpu as pltpu

EPS = 1e-5
LANE = 128
MXU_DTYPE = jnp.bfloat16            # conv matmul operand dtype (accumulation is f32)

_VMEM_LIMIT = None


def _vmem_limit_bytes():
    """~3/4 of physical VMEM, capped at 96 MiB (=> ~48 MiB on v7x, 96 MiB on v5e/v6e)."""
    global _VMEM_LIMIT
    if _VMEM_LIMIT is None:
        cap = 64 * 1024 * 1024
        try:
            info = pltpu.get_tpu_info()
            cap = int(getattr(info, "vmem_capacity_bytes", cap))
        except Exception:
            pass
        _VMEM_LIMIT = int(min(cap * 3 // 4, 96 * 1024 * 1024))
    return _VMEM_LIMIT


# ---------------------------------------------------------------------------
# small helpers
# ---------------------------------------------------------------------------
def _round_up(n, m):
    return ((n + m - 1) // m) * m


def _pick_tile(n, candidates):
    for c in candidates:
        if c <= n and n % c == 0:
            return c
    return n


def _tile_rows(m, target=512, min_blocks=2):
    """Row tile (multiple of 16) and padded row count.  min_blocks=2 keeps at least two
    row blocks so the 'parallel' M axis can be split across v7x's two TensorCores."""
    tm = min(target, _round_up(m, 16))
    while tm > 16 and _round_up(m, tm) // tm < min_blocks:
        tm = _round_up(tm // 2, 16)
    return tm, _round_up(m, tm)


def _pad_rows(x, mp):
    if x.shape[0] == mp:
        return x
    return jnp.pad(x, ((0, mp - x.shape[0]), (0, 0)))


def _pad_last(x, cp):
    if x.shape[-1] == cp:
        return x
    cfg = [(0, 0)] * x.ndim
    cfg[-1] = (0, cp - x.shape[-1])
    return jnp.pad(x, cfg)


def _pad_k_dim(k):
    """Pad the contraction dim to a multiple of 256 (full MXU depth on v6e/v7x and a
    512-divisible tk) unless that would inflate the dominant A stream by >12.5%."""
    kp = _round_up(k, 256)
    if (kp - k) * 8 > k:
        kp = _round_up(k, 128)
    return kp


# ---------------------------------------------------------------------------
# BatchNorm kernels (training-mode batch statistics) + fused ReLU apply
# ---------------------------------------------------------------------------
def _bn_stats_kernel(x_ref, sum_ref, sq_ref):
    @pl.when(pl.program_id(0) == 0)
    def _():
        sum_ref[...] = jnp.zeros_like(sum_ref)
        sq_ref[...] = jnp.zeros_like(sq_ref)

    x = x_ref[...]
    sum_ref[...] += jnp.sum(x, axis=0, keepdims=True)
    sq_ref[...] += jnp.sum(x * x, axis=0, keepdims=True)


def _bn_apply_relu_kernel(x_ref, scale_ref, shift_ref, o_ref):
    # elementwise math kept in f32 (v5e has no bf16 VPU path); store may be bf16
    x = x_ref[...].astype(jnp.float32)
    y = x * scale_ref[...] + shift_ref[...]
    o_ref[...] = jnp.maximum(y, 0.0).astype(o_ref.dtype)


def bn_batch_stats(x2d):
    """Per-channel sum / sum-of-squares over the rows of x2d: (M, C) -> 2 x (1, C) f32."""
    m, c = x2d.shape
    tm, mp = _tile_rows(m, 512, min_blocks=1)     # resident accumulation => serial anyway
    xp = _pad_rows(x2d, mp)                        # zero rows contribute nothing
    return pl.pallas_call(
        _bn_stats_kernel,
        grid=(mp // tm,),
        in_specs=[pl.BlockSpec((tm, c), lambda i: (i, 0))],
        out_specs=[pl.BlockSpec((1, c), lambda i: (0, 0)),
                   pl.BlockSpec((1, c), lambda i: (0, 0))],
        out_shape=[jax.ShapeDtypeStruct((1, c), jnp.float32),
                   jax.ShapeDtypeStruct((1, c), jnp.float32)],
        compiler_params=pltpu.CompilerParams(
            dimension_semantics=("arbitrary",),
            vmem_limit_bytes=_vmem_limit_bytes()),
    )(xp)


def bn_scale_shift(sums, sqs, m, gamma, beta):
    inv_m = 1.0 / float(m)
    mean = sums * inv_m
    var = jnp.maximum(sqs * inv_m - mean * mean, 0.0)   # clamp tiny negative drift
    scale = gamma * lax.rsqrt(var + EPS)
    shift = beta - mean * scale
    return scale, shift


def bn_apply_relu(x2d, scale, shift, out_dtype):
    m, c = x2d.shape
    tm, mp = _tile_rows(m, 512)
    xp = _pad_rows(x2d, mp)
    y = pl.pallas_call(
        _bn_apply_relu_kernel,
        grid=(mp // tm,),
        in_specs=[pl.BlockSpec((tm, c), lambda i: (i, 0)),
                  pl.BlockSpec((1, c), lambda i: (0, 0)),
                  pl.BlockSpec((1, c), lambda i: (0, 0))],
        out_specs=pl.BlockSpec((tm, c), lambda i: (i, 0)),
        out_shape=jax.ShapeDtypeStruct((mp, c), out_dtype),
        compiler_params=pltpu.CompilerParams(
            dimension_semantics=("parallel",),
            vmem_limit_bytes=_vmem_limit_bytes()),
    )(xp, scale, shift)
    return y[:m]


# ---------------------------------------------------------------------------
# Conv-as-matmul kernels: K-accumulated MXU matmul, fused bias epilogue, and
# optionally (a) fused next-BN statistics or (b) fused residual shortcut.
# ---------------------------------------------------------------------------
def _mm_bias_kernel(a_ref, w_ref, b_ref, o_ref, acc_ref):
    k = pl.program_id(2)

    @pl.when(k == 0)
    def _():
        acc_ref[...] = jnp.zeros_like(acc_ref)

    acc_ref[...] += jnp.dot(a_ref[...], w_ref[...],
                            preferred_element_type=jnp.float32)

    @pl.when(k == pl.num_programs(2) - 1)
    def _():
        o_ref[...] = (acc_ref[...] + b_ref[...]).astype(o_ref.dtype)


def _mm_bias_stats_kernel(a_ref, w_ref, b_ref, o_ref, sum_ref, sq_ref,
                          acc_ref, s_acc, q_acc):
    """conv1: matmul + bias, plus per-channel sum/sumsq of the pre-bias f32 accumulator
    (feeds BN2).  Zero-padded rows / K-columns contribute exactly zero to the stats;
    the bias shift is folded in analytically by the wrapper."""
    i = pl.program_id(0)
    k = pl.program_id(2)
    nk = pl.num_programs(2)

    @pl.when(k == 0)
    def _():
        acc_ref[...] = jnp.zeros_like(acc_ref)

    @pl.when(jnp.logical_and(i == 0, k == 0))
    def _():
        s_acc[...] = jnp.zeros_like(s_acc)
        q_acc[...] = jnp.zeros_like(q_acc)

    acc_ref[...] += jnp.dot(a_ref[...], w_ref[...],
                            preferred_element_type=jnp.float32)

    @pl.when(k == nk - 1)
    def _():
        acc = acc_ref[...]
        s_acc[...] += jnp.sum(acc, axis=0, keepdims=True)
        q_acc[...] += jnp.sum(acc * acc, axis=0, keepdims=True)
        o_ref[...] = (acc + b_ref[...]).astype(o_ref.dtype)

    @pl.when(jnp.logical_and(i == pl.num_programs(0) - 1, k == nk - 1))
    def _():
        sum_ref[...] = s_acc[...]
        sq_ref[...] = q_acc[...]


def _mm_bias_ident_kernel(a_ref, w_ref, b_ref, s_ref, o_ref, acc_ref):
    k = pl.program_id(2)

    @pl.when(k == 0)
    def _():
        acc_ref[...] = jnp.zeros_like(acc_ref)

    acc_ref[...] += jnp.dot(a_ref[...], w_ref[...],
                            preferred_element_type=jnp.float32)

    @pl.when(k == pl.num_programs(2) - 1)
    def _():
        # identity shortcut: plain f32 VPU add in the epilogue
        o_ref[...] = (acc_ref[...] + b_ref[...]
                      + s_ref[...].astype(jnp.float32)).astype(o_ref.dtype)


def _mm_bias_proj_kernel(a_ref, w_ref, b_ref, s_ref, ws_ref, bs_ref, o_ref,
                         acc_ref):
    k = pl.program_id(2)

    @pl.when(k == 0)
    def _():
        acc_ref[...] = jnp.zeros_like(acc_ref)

    acc_ref[...] += jnp.dot(a_ref[...], w_ref[...],
                            preferred_element_type=jnp.float32)

    @pl.when(k == pl.num_programs(2) - 1)
    def _():
        # projection shortcut: small bf16 dot (full-rate MXU), f32 accumulate
        sc = jnp.dot(s_ref[...], ws_ref[...],
                     preferred_element_type=jnp.float32)
        o_ref[...] = (acc_ref[...] + b_ref[...] + sc
                      + bs_ref[...]).astype(o_ref.dtype)


def conv_matmul(a, w, b, *, out_dtype=jnp.float32, shortcut=None, sc_w=None,
                sc_b=None, compute_stats=False):
    """a: (M, K) bf16 patches, w: (K, Nc) bf16 weights, b: (1, Nc) f32 bias.

    compute_stats=True  -> returns (out, sum(acc), sumsq(acc)) with acc = a@w (pre-bias)
    shortcut (M, Nc)    -> out = a@w + b + shortcut                       (identity)
    shortcut (M, Cs), sc_w, sc_b -> out = a@w + b + shortcut@sc_w + sc_b  (projection)
    """
    m, kdim = a.shape
    nc = w.shape[1]
    # tn == nc (W fully VMEM-resident per k-step) whenever it fits: the dominant,
    # 27x-inflated A stream is then read from HBM exactly once.
    tn = nc if nc <= 512 else _pick_tile(nc, (512, 256, 128))
    tk = _pick_tile(kdim, (512, 256, 128))
    tm, mp = _tile_rows(m, 512, min_blocks=1 if compute_stats else 2)
    grid = (mp // tm, nc // tn, kdim // tk)

    in_specs = [pl.BlockSpec((tm, tk), lambda i, j, k: (i, k)),
                pl.BlockSpec((tk, tn), lambda i, j, k: (k, j)),
                pl.BlockSpec((1, tn), lambda i, j, k: (0, j))]
    operands = [_pad_rows(a, mp), w, b]

    out_specs = [pl.BlockSpec((tm, tn), lambda i, j, k: (i, j))]
    out_shape = [jax.ShapeDtypeStruct((mp, nc), out_dtype)]
    scratch = [pltpu.VMEM((tm, tn), jnp.float32)]

    if compute_stats:
        assert shortcut is None and nc // tn == 1, "fused stats require a single N block"
        kernel = _mm_bias_stats_kernel
        out_specs += [pl.BlockSpec((1, tn), lambda i, j, k: (0, 0)),
                      pl.BlockSpec((1, tn), lambda i, j, k: (0, 0))]
        out_shape += [jax.ShapeDtypeStruct((1, nc), jnp.float32),
                      jax.ShapeDtypeStruct((1, nc), jnp.float32)]
        scratch += [pltpu.VMEM((1, tn), jnp.float32),
                    pltpu.VMEM((1, tn), jnp.float32)]
        # stats scratch accumulates across the M axis -> all axes sequential
        semantics = ("arbitrary", "arbitrary", "arbitrary")
    elif shortcut is None:
        kernel = _mm_bias_kernel
        semantics = ("parallel", "parallel", "arbitrary")
    elif sc_w is None:
        kernel = _mm_bias_ident_kernel
        in_specs.append(pl.BlockSpec((tm, tn), lambda i, j, k: (i, j)))
        operands.append(_pad_rows(shortcut, mp))
        semantics = ("parallel", "parallel", "arbitrary")
    else:
        kernel = _mm_bias_proj_kernel
        cs = shortcut.shape[1]
        in_specs += [pl.BlockSpec((tm, cs), lambda i, j, k: (i, 0)),
                     pl.BlockSpec((cs, tn), lambda i, j, k: (0, j)),
                     pl.BlockSpec((1, tn), lambda i, j, k: (0, j))]
        operands += [_pad_rows(shortcut, mp), sc_w, sc_b]
        semantics = ("parallel", "parallel", "arbitrary")

    multi = len(out_shape) > 1
    outs = pl.pallas_call(
        kernel,
        grid=grid,
        in_specs=in_specs,
        out_specs=out_specs if multi else out_specs[0],
        out_shape=out_shape if multi else out_shape[0],
        scratch_shapes=scratch,
        compiler_params=pltpu.CompilerParams(
            dimension_semantics=semantics,
            vmem_limit_bytes=_vmem_limit_bytes()),
    )(*operands)

    if compute_stats:
        o, sums, sqs = outs
        return o[:m], sums, sqs
    return outs[:m]


# ---------------------------------------------------------------------------
# JAX glue: im2col for the 3x3x3, pad=1 conv (still materialized by XLA; see TODO)
# ---------------------------------------------------------------------------
def im2col_3d(x_cl, stride, k_pad):
    """x_cl: (N, D, H, W, C) -> patches (N*Do*Ho*Wo, k_pad); trailing zero columns pad
    the contraction dim (appended inside the single concatenate materialization)."""
    n, d, h, w, c = x_cl.shape
    do = (d - 1) // stride + 1
    ho = (h - 1) // stride + 1
    wo = (w - 1) // stride + 1
    xp = jnp.pad(x_cl, ((0, 0), (1, 1), (1, 1), (1, 1), (0, 0)))
    cols = []
    for kd in range(3):
        for kh in range(3):
            for kw in range(3):
                cols.append(xp[:, kd:kd + (do - 1) * stride + 1:stride,
                               kh:kh + (ho - 1) * stride + 1:stride,
                               kw:kw + (wo - 1) * stride + 1:stride, :])
    if k_pad > 27 * c:
        cols.append(jnp.zeros((n, do, ho, wo, k_pad - 27 * c), x_cl.dtype))
    patches = jnp.concatenate(cols, axis=-1)
    return patches.reshape(n * do * ho * wo, k_pad), (n, do, ho, wo)


def _prep_conv_weight(w, cin, cout, cin_p, cout_p, k_pad):
    wp = jnp.pad(w, ((0, 0), (0, 0), (0, 0), (0, cin_p - cin), (0, cout_p - cout)))
    wp = wp.reshape(27 * cin_p, cout_p)
    if k_pad > 27 * cin_p:
        wp = jnp.pad(wp, ((0, k_pad - 27 * cin_p), (0, 0)))
    return wp.astype(MXU_DTYPE)


# ---------------------------------------------------------------------------
# Forward pass (PreActBasic)
# ---------------------------------------------------------------------------
def preact_basic_forward(x_ncdhw, params, stride):
    x_cl = jnp.transpose(x_ncdhw, (0, 2, 3, 4, 1)).astype(jnp.float32)  # NDHWC
    n, d, h, w, cin = x_cl.shape
    cout = params["w1"].shape[-1]
    cin_p = _round_up(cin, LANE)
    cout_p = _round_up(cout, LANE)

    x_p = _pad_last(x_cl, cin_p)                      # (N,D,H,W,Cin_p)
    m1 = n * d * h * w
    x2d = x_p.reshape(m1, cin_p)

    # ---- BN1 + ReLU (two-pass), bf16 output feeds conv1 ----
    g1 = _pad_last(params["gamma1"].reshape(1, -1), cin_p)
    be1 = _pad_last(params["beta1"].reshape(1, -1), cin_p)
    s1, q1 = bn_batch_stats(x2d)
    scale1, shift1 = bn_scale_shift(s1, q1, m1, g1, be1)
    y1 = bn_apply_relu(x2d, scale1, shift1, MXU_DTYPE).reshape(n, d, h, w, cin_p)

    # ---- Conv1 (3x3x3, stride, pad=1); BN2 batch stats fused into its epilogue ----
    k1 = _pad_k_dim(27 * cin_p)
    a1, (_, do, ho, wo) = im2col_3d(y1, stride, k1)   # (M2, k1) bf16
    w1 = _prep_conv_weight(params["w1"], cin, cout, cin_p, cout_p, k1)
    b1 = _pad_last(params["b1"].reshape(1, -1), cout_p)
    m2 = n * do * ho * wo
    r1, acc_sum, acc_sq = conv_matmul(a1, w1, b1, out_dtype=MXU_DTYPE,
                                      compute_stats=True)   # r1 is bf16
    # Stats were taken on the pre-bias f32 accumulator; fold the bias in analytically
    # (padded rows contributed exactly zero, so the true row count m2 is the divisor).
    sum2 = acc_sum + m2 * b1
    sq2 = acc_sq + 2.0 * b1 * acc_sum + m2 * (b1 * b1)

    # ---- BN2 + ReLU (apply only) ----
    g2 = _pad_last(params["gamma2"].reshape(1, -1), cout_p)
    be2 = _pad_last(params["beta2"].reshape(1, -1), cout_p)
    scale2, shift2 = bn_scale_shift(sum2, sq2, m2, g2, be2)
    y2 = bn_apply_relu(r1, scale2, shift2, MXU_DTYPE).reshape(n, do, ho, wo, cout_p)

    # ---- Conv2 (3x3x3, stride 1, pad=1) with the shortcut fused into its epilogue ----
    k2 = _pad_k_dim(27 * cout_p)
    a2, _ = im2col_3d(y2, 1, k2)                      # (M2, k2) bf16
    w2 = _prep_conv_weight(params["w2"], cout, cout, cout_p, cout_p, k2)
    b2 = _pad_last(params["b2"].reshape(1, -1), cout_p)

    if stride != 1 or cin != cout:
        # projection shortcut: 1x1x1 conv w/ stride, bf16 operands (full-rate MXU)
        xs = x_p[:, ::stride, ::stride, ::stride, :].reshape(m2, cin_p).astype(MXU_DTYPE)
        wsc = jnp.pad(params["wsc"].reshape(cin, cout),
                      ((0, cin_p - cin), (0, cout_p - cout))).astype(MXU_DTYPE)
        bsc = _pad_last(params["bsc"].reshape(1, -1), cout_p)
        out2d = conv_matmul(a2, w2, b2, shortcut=xs, sc_w=wsc, sc_b=bsc)
    else:
        # identity shortcut: plain f32 add in the conv2 epilogue
        out2d = conv_matmul(a2, w2, b2, shortcut=x2d)

    out = out2d[:, :cout].reshape(n, do, ho, wo, cout)
    return jnp.transpose(out, (0, 4, 1, 2, 3))        # back to NCDHW


# ---------------------------------------------------------------------------
# Pure-JAX reference (correctness check)
# ---------------------------------------------------------------------------
def reference_forward(x, params, stride):
    def bn_relu_ref(x, g, b):
        mean = x.mean(axis=(0, 2, 3, 4), keepdims=True)
        var = ((x - mean) ** 2).mean(axis=(0, 2, 3, 4), keepdims=True)
        y = (x - mean) / jnp.sqrt(var + EPS)
        y = y * g.reshape(1, -1, 1, 1, 1) + b.reshape(1, -1, 1, 1, 1)
        return jnp.maximum(y, 0.0)

    def conv3d_ref(x, w, b, stride, pad):
        wt = jnp.transpose(w, (4, 3, 0, 1, 2))  # (kD,kH,kW,Cin,Cout) -> OIDHW
        y = lax.conv_general_dilated(
            x, wt, window_strides=(stride,) * 3, padding=[(pad, pad)] * 3,
            dimension_numbers=("NCDHW", "OIDHW", "NCDHW"))
        return y + b.reshape(1, -1, 1, 1, 1)

    r = bn_relu_ref(x, params["gamma1"], params["beta1"])
    r = conv3d_ref(r, params["w1"], params["b1"], stride, 1)
    r = bn_relu_ref(r, params["gamma2"], params["beta2"])
    r = conv3d_ref(r, params["w2"], params["b2"], 1, 1)
    if "wsc" in params:
        sc = conv3d_ref(x, params["wsc"], params["bsc"], stride, 0)
    else:
        sc = x
    return r + sc


# ---------------------------------------------------------------------------
def init_params(key, in_channels, out_channels, stride):
    ks = jax.random.split(key, 10)
    f1 = 1.0 / jnp.sqrt(27.0 * in_channels)
    f2 = 1.0 / jnp.sqrt(27.0 * out_channels)
    p = {
        "gamma1": jnp.ones((in_channels,), jnp.float32)
        + 0.1 * jax.random.normal(ks[0], (in_channels,), jnp.float32),
        "beta1": 0.1 * jax.random.normal(ks[1], (in_channels,), jnp.float32),
        "w1": f1 * jax.random.normal(ks[2], (3, 3, 3, in_channels, out_channels),
                                     jnp.float32),
        "b1": f1 * jax.random.normal(ks[3], (out_channels,), jnp.float32),
        "gamma2": jnp.ones((out_channels,), jnp.float32)
        + 0.1 * jax.random.normal(ks[4], (out_channels,), jnp.float32),
        "beta2": 0.1 * jax.random.normal(ks[5], (out_channels,), jnp.float32),
        "w2": f2 * jax.random.normal(ks[6], (3, 3, 3, out_channels, out_channels),
                                     jnp.float32),
        "b2": f2 * jax.random.normal(ks[7], (out_channels,), jnp.float32),
    }
    if stride != 1 or in_channels != out_channels:
        fs = 1.0 / jnp.sqrt(1.0 * in_channels)
        p["wsc"] = fs * jax.random.normal(
            ks[8], (1, 1, 1, in_channels, out_channels), jnp.float32)
        p["bsc"] = fs * jax.random.normal(ks[9], (out_channels,), jnp.float32)
    return p


if __name__ == "__main__":
    key = jax.random.PRNGKey(0)
    n, d, h, w = 2, 8, 8, 8
    configs = [
        (4, 8, 2),   # projection shortcut (1x1x1 conv, stride 2)
        (8, 8, 1),   # identity shortcut
    ]

    fwd = jax.jit(preact_basic_forward, static_argnums=(2,))
    for idx, (cin, cout, stride) in enumerate(configs):
        kx, kp = jax.random.split(jax.random.fold_in(key, idx))
        x = jax.random.normal(kx, (n, cin, d, h, w), jnp.float32)
        params = init_params(kp, cin, cout, stride)

        out = jax.block_until_ready(fwd(x, params, stride))
        ref = reference_forward(x, params, stride)
        assert out.shape == ref.shape, (out.shape, ref.shape)
        err = float(jnp.max(jnp.abs(out - ref)))
        # tolerance sized for bf16 MXU operands + bf16 storage of the conv1 output
        # (f32 accumulation / BN math) vs. an all-f32 reference
        assert jnp.allclose(out, ref, rtol=4e-2, atol=4e-2), err

    print("KERNEL_OK")
</pallas_src>

<mosaic_0001>
module attributes {stable_mosaic.version = 11 : i64} {
  func.func @_bn_stats_kernel(%arg0: i32, %arg1: memref<512x128xf32, #tpu.memory_space<vmem>>, %arg2: memref<1x128xf32, #tpu.memory_space<vmem>>, %arg3: memref<1x128xf32, #tpu.memory_space<vmem>>) attributes {dimension_semantics = [#tpu.dimension_semantics<arbitrary>], iteration_bounds = array<i64: 2>, scalar_prefetch = 0 : i64, scratch_operands = 0 : i64, tpu.core_type = #tpu.core_type<tc>, window_params = [{transform_indices = @transform_0, window_bounds = array<i64: 512, 128>}, {pipeline_mode = #tpu.pipeline_mode<synchronous>, transform_indices = @transform_1, window_bounds = array<i64: 1, 128>}, {pipeline_mode = #tpu.pipeline_mode<synchronous>, transform_indices = @transform_2, window_bounds = array<i64: 1, 128>}]} {
    %c0_i32 = arith.constant 0 : i32
    %0 = arith.cmpi eq, %arg0, %c0_i32 : i32
    %1 = arith.extui %0 : i1 to i32
    %c0_i32_0 = arith.constant 0 : i32
    %2 = arith.cmpi ne, %1, %c0_i32_0 : i32
    scf.if %2 {
      %cst_11 = arith.constant 0.000000e+00 : f32
      %15 = vector.broadcast %cst_11 : f32 to vector<1x128xf32>
      %c0_12 = arith.constant 0 : index
      %c0_13 = arith.constant 0 : index
      %16 = vector.load %arg2[%c0_12, %c0_13] : memref<1x128xf32, #tpu.memory_space<vmem>>, vector<1x128xf32>
      tpu.vector_store %arg2[%c0_12, %c0_13], %15 {strides = array<i32>} : memref<1x128xf32, #tpu.memory_space<vmem>>, vector<1x128xf32>,
      %cst_14 = arith.constant 0.000000e+00 : f32
      %17 = vector.broadcast %cst_14 : f32 to vector<1x128xf32>
      %c0_15 = arith.constant 0 : index
      %c0_16 = arith.constant 0 : index
      %18 = vector.load %arg3[%c0_15, %c0_16] : memref<1x128xf32, #tpu.memory_space<vmem>>, vector<1x128xf32>
      tpu.vector_store %arg3[%c0_15, %c0_16], %17 {strides = array<i32>} : memref<1x128xf32, #tpu.memory_space<vmem>>, vector<1x128xf32>,
    } else {
    }
    %c0 = arith.constant 0 : index
    %c0_1 = arith.constant 0 : index
    %3 = vector.load %arg1[%c0, %c0_1] : memref<512x128xf32, #tpu.memory_space<vmem>>, vector<512x128xf32>
    %c0_2 = arith.constant 0 : index
    %c0_3 = arith.constant 0 : index
    %4 = vector.load %arg2[%c0_2, %c0_3] : memref<1x128xf32, #tpu.memory_space<vmem>>, vector<1x128xf32>
    %cst = arith.constant dense<0.000000e+00> : vector<128xf32>
    %5 = vector.multi_reduction <add>, %3, %cst [0] : vector<512x128xf32> to vector<128xf32>
    %6 = vector.shape_cast %5 : vector<128xf32> to vector<1x128xf32>
    %7 = arith.addf %4, %6 : vector<1x128xf32>
    %c0_4 = arith.constant 0 : index
    %c0_5 = arith.constant 0 : index
    %8 = vector.load %arg2[%c0_4, %c0_5] : memref<1x128xf32, #tpu.memory_space<vmem>>, vector<1x128xf32>
    tpu.vector_store %arg2[%c0_4, %c0_5], %7 {strides = array<i32>} : memref<1x128xf32, #tpu.memory_space<vmem>>, vector<1x128xf32>,
    %c0_6 = arith.constant 0 : index
    %c0_7 = arith.constant 0 : index
    %9 = vector.load %arg3[%c0_6, %c0_7] : memref<1x128xf32, #tpu.memory_space<vmem>>, vector<1x128xf32>
    %10 = arith.mulf %3, %3 : vector<512x128xf32>
    %cst_8 = arith.constant dense<0.000000e+00> : vector<128xf32>
    %11 = vector.multi_reduction <add>, %10, %cst_8 [0] : vector<512x128xf32> to vector<128xf32>
    %12 = vector.shape_cast %11 : vector<128xf32> to vector<1x128xf32>
    %13 = arith.addf %9, %12 : vector<1x128xf32>
    %c0_9 = arith.constant 0 : index
    %c0_10 = arith.constant 0 : index
    %14 = vector.load %arg3[%c0_9, %c0_10] : memref<1x128xf32, #tpu.memory_space<vmem>>, vector<1x128xf32>
    tpu.vector_store %arg3[%c0_9, %c0_10], %13 {strides = array<i32>} : memref<1x128xf32, #tpu.memory_space<vmem>>, vector<1x128xf32>,
    return
  }
  func.func @transform_0(%arg0: i32) -> (i32, i32) {
    %c0_i32 = arith.constant 0 : i32
    %c0_i32_0 = arith.constant 0 : i32
    return %arg0, %c0_i32 : i32, i32
  }
  func.func @transform_1(%arg0: i32) -> (i32, i32) {
    %c0_i32 = arith.constant 0 : i32
    %c0_i32_0 = arith.constant 0 : i32
    %c0_i32_1 = arith.constant 0 : i32
    return %c0_i32, %c0_i32_0 : i32, i32
  }
  func.func @transform_2(%arg0: i32) -> (i32, i32) {
    %c0_i32 = arith.constant 0 : i32
    %c0_i32_0 = arith.constant 0 : i32
    %c0_i32_1 = arith.constant 0 : i32
    return %c0_i32, %c0_i32_0 : i32, i32
  }
}

module attributes {stable_mosaic.version = 11 : i64} {
  func.func @_bn_apply_relu_kernel(%arg0: i32, %arg1: memref<512x128xf32, #tpu.memory_space<vmem>>, %arg2: memref<1x128xf32, #tpu.memory_space<vmem>>, %arg3: memref<1x128xf32, #tpu.memory_space<vmem>>, %arg4: memref<512x128xbf16, #tpu.memory_space<vmem>>) attributes {dimension_semantics = [#tpu.dimension_semantics<parallel>], iteration_bounds = array<i64: 2>, scalar_prefetch = 0 : i64, scratch_operands = 0 : i64, tpu.core_type = #tpu.core_type<tc>, window_params = [{transform_indices = @transform_0, window_bounds = array<i64: 512, 128>}, {pipeline_mode = #tpu.pipeline_mode<synchronous>, transform_indices = @transform_1, window_bounds = array<i64: 1, 128>}, {pipeline_mode = #tpu.pipeline_mode<synchronous>, transform_indices = @transform_2, window_bounds = array<i64: 1, 128>}, {transform_indices = @transform_3, window_bounds = array<i64: 512, 128>}]} {
    %c0 = arith.constant 0 : index
    %c0_0 = arith.constant 0 : index
    %0 = vector.load %arg1[%c0, %c0_0] : memref<512x128xf32, #tpu.memory_space<vmem>>, vector<512x128xf32>
    %c0_1 = arith.constant 0 : index
    %c0_2 = arith.constant 0 : index
    %1 = vector.load %arg2[%c0_1, %c0_2] : memref<1x128xf32, #tpu.memory_space<vmem>>, vector<1x128xf32>
    %2 = vector.broadcast %1 : vector<1x128xf32> to vector<512x128xf32>
    %3 = arith.mulf %0, %2 : vector<512x128xf32>
    %c0_3 = arith.constant 0 : index
    %c0_4 = arith.constant 0 : index
    %4 = vector.load %arg3[%c0_3, %c0_4] : memref<1x128xf32, #tpu.memory_space<vmem>>, vector<1x128xf32>
    %5 = vector.broadcast %4 : vector<1x128xf32> to vector<512x128xf32>
    %6 = arith.addf %3, %5 : vector<512x128xf32>
    %cst = arith.constant 0.000000e+00 : f32
    %7 = vector.broadcast %cst : f32 to vector<512x128xf32>
    %8 = arith.maximumf %6, %7 : vector<512x128xf32>
    %9 = arith.truncf %8 : vector<512x128xf32> to vector<512x128xbf16>
    %c0_5 = arith.constant 0 : index
    %c0_6 = arith.constant 0 : index
    %10 = vector.load %arg4[%c0_5, %c0_6] : memref<512x128xbf16, #tpu.memory_space<vmem>>, vector<512x128xbf16>
    tpu.vector_store %arg4[%c0_5, %c0_6], %9 {strides = array<i32>} : memref<512x128xbf16, #tpu.memory_space<vmem>>, vector<512x128xbf16>,
    return
  }
  func.func @transform_0(%arg0: i32) -> (i32, i32) {
    %c0_i32 = arith.constant 0 : i32
    %c0_i32_0 = arith.constant 0 : i32
    return %arg0, %c0_i32 : i32, i32
  }
  func.func @transform_1(%arg0: i32) -> (i32, i32) {
    %c0_i32 = arith.constant 0 : i32
    %c0_i32_0 = arith.constant 0 : i32
    %c0_i32_1 = arith.constant 0 : i32
    return %c0_i32, %c0_i32_0 : i32, i32
  }
  func.func @transform_2(%arg0: i32) -> (i32, i32) {
    %c0_i32 = arith.constant 0 : i32
    %c0_i32_0 = arith.constant 0 : i32
    %c0_i32_1 = arith.constant 0 : i32
    return %c0_i32, %c0_i32_0 : i32, i32
  }
  func.func @transform_3(%arg0: i32) -> (i32, i32) {
    %c0_i32 = arith.constant 0 : i32
    %c0_i32_0 = arith.constant 0 : i32
    return %arg0, %c0_i32 : i32, i32
  }
}

module attributes {stable_mosaic.version = 11 : i64} {
  func.func @_mm_bias_stats_kernel(%arg0: i32, %arg1: i32, %arg2: i32, %arg3: memref<128x512xbf16, #tpu.memory_space<vmem>>, %arg4: memref<512x128xbf16, #tpu.memory_space<vmem>>, %arg5: memref<1x128xf32, #tpu.memory_space<vmem>>, %arg6: memref<128x128xbf16, #tpu.memory_space<vmem>>, %arg7: memref<1x128xf32, #tpu.memory_space<vmem>>, %arg8: memref<1x128xf32, #tpu.memory_space<vmem>>, %arg9: memref<128x128xf32, #tpu.memory_space<vmem>>, %arg10: memref<1x128xf32, #tpu.memory_space<vmem>>, %arg11: memref<1x128xf32, #tpu.memory_space<vmem>>) attributes {dimension_semantics = [#tpu.dimension_semantics<arbitrary>, #tpu.dimension_semantics<arbitrary>, #tpu.dimension_semantics<arbitrary>], iteration_bounds = array<i64: 1, 1, 7>, scalar_prefetch = 0 : i64, scratch_operands = 3 : i64, tpu.core_type = #tpu.core_type<tc>, window_params = [{transform_indices = @transform_0, window_bounds = array<i64: 128, 512>}, {transform_indices = @transform_1, window_bounds = array<i64: 512, 128>}, {transform_indices = @transform_2, window_bounds = array<i64: 1, 128>}, {transform_indices = @transform_3, window_bounds = array<i64: 128, 128>}, {pipeline_mode = #tpu.pipeline_mode<synchronous>, transform_indices = @transform_4, window_bounds = array<i64: 1, 128>}, {pipeline_mode = #tpu.pipeline_mode<synchronous>, transform_indices = @transform_5, window_bounds = array<i64: 1, 128>}]} {
    %c0_i32 = arith.constant 0 : i32
    %0 = arith.cmpi eq, %arg2, %c0_i32 : i32
    %1 = arith.extui %0 : i1 to i32
    %c0_i32_0 = arith.constant 0 : i32
    %2 = arith.cmpi ne, %1, %c0_i32_0 : i32
    scf.if %2 {
      %cst_15 = arith.constant 0.000000e+00 : f32
      %22 = vector.broadcast %cst_15 : f32 to vector<128x128xf32>
      %c0_16 = arith.constant 0 : index
      %c0_17 = arith.constant 0 : index
      %23 = vector.load %arg9[%c0_16, %c0_17] : memref<128x128xf32, #tpu.memory_space<vmem>>, vector<128x128xf32>
      tpu.vector_store %arg9[%c0_16, %c0_17], %22 {strides = array<i32>} : memref<128x128xf32, #tpu.memory_space<vmem>>, vector<128x128xf32>,
    } else {
    }
    %c0_i32_1 = arith.constant 0 : i32
    %3 = arith.cmpi eq, %arg0, %c0_i32_1 : i32
    %c0_i32_2 = arith.constant 0 : i32
    %4 = arith.cmpi eq, %arg2, %c0_i32_2 : i32
    %5 = arith.andi %3, %4 : i1
    %6 = arith.extui %5 : i1 to i32
    %c0_i32_3 = arith.constant 0 : i32
    %7 = arith.cmpi ne, %6, %c0_i32_3 : i32
    scf.if %7 {
      %cst_15 = arith.constant 0.000000e+00 : f32
      %22 = vector.broadcast %cst_15 : f32 to vector<1x128xf32>
      %c0_16 = arith.constant 0 : index
      %c0_17 = arith.constant 0 : index
      %23 = vector.load %arg10[%c0_16, %c0_17] : memref<1x128xf32, #tpu.memory_space<vmem>>, vector<1x128xf32>
      tpu.vector_store %arg10[%c0_16, %c0_17], %22 {strides = array<i32>} : memref<1x128xf32, #tpu.memory_space<vmem>>, vector<1x128xf32>,
      %cst_18 = arith.constant 0.000000e+00 : f32
      %24 = vector.broadcast %cst_18 : f32 to vector<1x128xf32>
      %c0_19 = arith.constant 0 : index
      %c0_20 = arith.constant 0 : index
      %25 = vector.load %arg11[%c0_19, %c0_20] : memref<1x128xf32, #tpu.memory_space<vmem>>, vector<1x128xf32>
      tpu.vector_store %arg11[%c0_19, %c0_20], %24 {strides = array<i32>} : memref<1x128xf32, #tpu.memory_space<vmem>>, vector<1x128xf32>,
    } else {
    }
    %c0 = arith.constant 0 : index
    %c0_4 = arith.constant 0 : index
    %8 = vector.load %arg9[%c0, %c0_4] : memref<128x128xf32, #tpu.memory_space<vmem>>, vector<128x128xf32>
    %c0_5 = arith.constant 0 : index
    %c0_6 = arith.constant 0 : index
    %9 = vector.load %arg3[%c0_5, %c0_6] : memref<128x512xbf16, #tpu.memory_space<vmem>>, vector<128x512xbf16>
    %c0_7 = arith.constant 0 : index
    %c0_8 = arith.constant 0 : index
    %10 = vector.load %arg4[%c0_7, %c0_8] : memref<512x128xbf16, #tpu.memory_space<vmem>>, vector<512x128xbf16>
    %cst = arith.constant dense<0.000000e+00> : vector<128x128xf32>
    %11 = tpu.matmul %9, %10, %cst {dimension_numbers = #tpu.dot_dimension_numbers<[1], [0], [0], [1], [0, 0, 1, 1], [], []>} : vector<128x512xbf16>, vector<512x128xbf16>, vector<128x128xf32> -> vector<128x128xf32>
    %12 = arith.addf %8, %11 : vector<128x128xf32>
    %c0_9 = arith.constant 0 : index
    %c0_10 = arith.constant 0 : index
    %13 = vector.load %arg9[%c0_9, %c0_10] : memref<128x128xf32, #tpu.memory_space<vmem>>, vector<128x128xf32>
    tpu.vector_store %arg9[%c0_9, %c0_10], %12 {strides = array<i32>} : memref<128x128xf32, #tpu.memory_space<vmem>>, vector<128x128xf32>,
    %c6_i32 = arith.constant 6 : i32
    %14 = arith.cmpi eq, %arg2, %c6_i32 : i32
    %15 = arith.extui %14 : i1 to i32
    %c0_i32_11 = arith.constant 0 : i32
    %16 = arith.cmpi ne, %15, %c0_i32_11 : i32
    scf.if %16 {
      %c0_15 = arith.constant 0 : index
      %c0_16 = arith.constant 0 : index
      %22 = vector.load %arg9[%c0_15, %c0_16] : memref<128x128xf32, #tpu.memory_space<vmem>>, vector<128x128xf32>
      %c0_17 = arith.constant 0 : index
      %c0_18 = arith.constant 0 : index
      %23 = vector.load %arg10[%c0_17, %c0_18] : memref<1x128xf32, #tpu.memory_space<vmem>>, vector<1x128xf32>
      %cst_19 = arith.constant dense<0.000000e+00> : vector<128xf32>
      %24 = vector.multi_reduction <add>, %22, %cst_19 [0] : vector<128x128xf32> to vector<128xf32>
      %25 = vector.shape_cast %24 : vector<128xf32> to vector<1x128xf32>
      %26 = arith.addf %23, %25 : vector<1x128xf32>
      %c0_20 = arith.constant 0 : index
      %c0_21 = arith.constant 0 : index
      %27 = vector.load %arg10[%c0_20, %c0_21] : memref<1x128xf32, #tpu.memory_space<vmem>>, vector<1x128xf32>
      tpu.vector_store %arg10[%c0_20, %c0_21], %26 {strides = array<i32>} : memref<1x128xf32, #tpu.memory_space<vmem>>, vector<1x128xf32>,
      %c0_22 = arith.constant 0 : index
      %c0_23 = arith.constant 0 : index
      %28 = vector.load %arg11[%c0_22, %c0_23] : memref<1x128xf32, #tpu.memory_space<vmem>>, vector<1x128xf32>
      %29 = arith.mulf %22, %22 : vector<128x128xf32>
      %cst_24 = arith.constant dense<0.000000e+00> : vector<128xf32>
      %30 = vector.multi_reduction <add>, %29, %cst_24 [0] : vector<128x128xf32> to vector<128xf32>
      %31 = vector.shape_cast %30 : vector<128xf32> to vector<1x128xf32>
      %32 = arith.addf %28, %31 : vector<1x128xf32>
      %c0_25 = arith.constant 0 : index
      %c0_26 = arith.constant 0 : index
      %33 = vector.load %arg11[%c0_25, %c0_26] : memref<1x128xf32, #tpu.memory_space<vmem>>, vector<1x128xf32>
      tpu.vector_store %arg11[%c0_25, %c0_26], %32 {strides = array<i32>} : memref<1x128xf32, #tpu.memory_space<vmem>>, vector<1x128xf32>,
      %c0_27 = arith.constant 0 : index
      %c0_28 = arith.constant 0 : index
      %34 = vector.load %arg5[%c0_27, %c0_28] : memref<1x128xf32, #tpu.memory_space<vmem>>, vector<1x128xf32>
      %35 = vector.broadcast %34 : vector<1x128xf32> to vector<128x128xf32>
      %36 = arith.addf %22, %35 : vector<128x128xf32>
      %37 = arith.truncf %36 : vector<128x128xf32> to vector<128x128xbf16>
      %c0_29 = arith.constant 0 : index
      %c0_30 = arith.constant 0 : index
      %38 = vector.load %arg6[%c0_29, %c0_30] : memref<128x128xbf16, #tpu.memory_space<vmem>>, vector<128x128xbf16>
      tpu.vector_store %arg6[%c0_29, %c0_30], %37 {strides = array<i32>} : memref<128x128xbf16, #tpu.memory_space<vmem>>, vector<128x128xbf16>,
    } else {
    }
    %c0_i32_12 = arith.constant 0 : i32
    %17 = arith.cmpi eq, %arg0, %c0_i32_12 : i32
    %c6_i32_13 = arith.constant 6 : i32
    %18 = arith.cmpi eq, %arg2, %c6_i32_13 : i32
    %19 = arith.andi %17, %18 : i1
    %20 = arith.extui %19 : i1 to i32
    %c0_i32_14 = arith.constant 0 : i32
    %21 = arith.cmpi ne, %20, %c0_i32_14 : i32
    scf.if %21 {
      %c0_15 = arith.constant 0 : index
      %c0_16 = arith.constant 0 : index
      %22 = vector.load %arg10[%c0_15, %c0_16] : memref<1x128xf32, #tpu.memory_space<vmem>>, vector<1x128xf32>
      %c0_17 = arith.constant 0 : index
      %c0_18 = arith.constant 0 : index
      %23 = vector.load %arg7[%c0_17, %c0_18] : memref<1x128xf32, #tpu.memory_space<vmem>>, vector<1x128xf32>
      tpu.vector_store %arg7[%c0_17, %c0_18], %22 {strides = array<i32>} : memref<1x128xf32, #tpu.memory_space<vmem>>, vector<1x128xf32>,
      %c0_19 = arith.constant 0 : index
      %c0_20 = arith.constant 0 : index
      %24 = vector.load %arg11[%c0_19, %c0_20] : memref<1x128xf32, #tpu.memory_space<vmem>>, vector<1x128xf32>
      %c0_21 = arith.constant 0 : index
      %c0_22 = arith.constant 0 : index
      %25 = vector.load %arg8[%c0_21, %c0_22] : memref<1x128xf32, #tpu.memory_space<vmem>>, vector<1x128xf32>
      tpu.vector_store %arg8[%c0_21, %c0_22], %24 {strides = array<i32>} : memref<1x128xf32, #tpu.memory_space<vmem>>, vector<1x128xf32>,
    } else {
    }
    return
  }
  func.func @transform_0(%arg0: i32, %arg1: i32, %arg2: i32) -> (i32, i32) {
    %c0_i32 = arith.constant 0 : i32
    return %arg0, %arg2 : i32, i32
  }
  func.func @transform_1(%arg0: i32, %arg1: i32, %arg2: i32) -> (i32, i32) {
    %c0_i32 = arith.constant 0 : i32
    return %arg2, %arg1 : i32, i32
  }
  func.func @transform_2(%arg0: i32, %arg1: i32, %arg2: i32) -> (i32, i32) {
    %c0_i32 = arith.constant 0 : i32
    %c0_i32_0 = arith.constant 0 : i32
    return %c0_i32, %arg1 : i32, i32
  }
  func.func @transform_3(%arg0: i32, %arg1: i32, %arg2: i32) -> (i32, i32) {
    %c0_i32 = arith.constant 0 : i32
    return %arg0, %arg1 : i32, i32
  }
  func.func @transform_4(%arg0: i32, %arg1: i32, %arg2: i32) -> (i32, i32) {
    %c0_i32 = arith.constant 0 : i32
    %c0_i32_0 = arith.constant 0 : i32
    %c0_i32_1 = arith.constant 0 : i32
    return %c0_i32, %c0_i32_0 : i32, i32
  }
  func.func @transform_5(%arg0: i32, %arg1: i32, %arg2: i32) -> (i32, i32) {
    %c0_i32 = arith.constant 0 : i32
    %c0_i32_0 = arith.constant 0 : i32
    %c0_i32_1 = arith.constant 0 : i32
    return %c0_i32, %c0_i32_0 : i32, i32
  }
}

module attributes {stable_mosaic.version = 11 : i64} {
  func.func @_bn_apply_relu_kernel(%arg0: i32, %arg1: memref<64x128xbf16, #tpu.memory_space<vmem>>, %arg2: memref<1x128xf32, #tpu.memory_space<vmem>>, %arg3: memref<1x128xf32, #tpu.memory_space<vmem>>, %arg4: memref<64x128xbf16, #tpu.memory_space<vmem>>) attributes {dimension_semantics = [#tpu.dimension_semantics<parallel>], iteration_bounds = array<i64: 2>, scalar_prefetch = 0 : i64, scratch_operands = 0 : i64, tpu.core_type = #tpu.core_type<tc>, window_params = [{transform_indices = @transform_0, window_bounds = array<i64: 64, 128>}, {pipeline_mode = #tpu.pipeline_mode<synchronous>, transform_indices = @transform_1, window_bounds = array<i64: 1, 128>}, {pipeline_mode = #tpu.pipeline_mode<synchronous>, transform_indices = @transform_2, window_bounds = array<i64: 1, 128>}, {transform_indices = @transform_3, window_bounds = array<i64: 64, 128>}]} {
    %c0 = arith.constant 0 : index
    %c0_0 = arith.constant 0 : index
    %0 = vector.load %arg1[%c0, %c0_0] : memref<64x128xbf16, #tpu.memory_space<vmem>>, vector<64x128xbf16>
    %1 = arith.extf %0 : vector<64x128xbf16> to vector<64x128xf32>
    %c0_1 = arith.constant 0 : index
    %c0_2 = arith.constant 0 : index
    %2 = vector.load %arg2[%c0_1, %c0_2] : memref<1x128xf32, #tpu.memory_space<vmem>>, vector<1x128xf32>
    %3 = vector.broadcast %2 : vector<1x128xf32> to vector<64x128xf32>
    %4 = arith.mulf %1, %3 : vector<64x128xf32>
    %c0_3 = arith.constant 0 : index
    %c0_4 = arith.constant 0 : index
    %5 = vector.load %arg3[%c0_3, %c0_4] : memref<1x128xf32, #tpu.memory_space<vmem>>, vector<1x128xf32>
    %6 = vector.broadcast %5 : vector<1x128xf32> to vector<64x128xf32>
    %7 = arith.addf %4, %6 : vector<64x128xf32>
    %cst = arith.constant 0.000000e+00 : f32
    %8 = vector.broadcast %cst : f32 to vector<64x128xf32>
    %9 = arith.maximumf %7, %8 : vector<64x128xf32>
    %10 = arith.truncf %9 : vector<64x128xf32> to vector<64x128xbf16>
    %c0_5 = arith.constant 0 : index
    %c0_6 = arith.constant 0 : index
    %11 = vector.load %arg4[%c0_5, %c0_6] : memref<64x128xbf16, #tpu.memory_space<vmem>>, vector<64x128xbf16>
    tpu.vector_store %arg4[%c0_5, %c0_6], %10 {strides = array<i32>} : memref<64x128xbf16, #tpu.memory_space<vmem>>, vector<64x128xbf16>,
    return
  }
  func.func @transform_0(%arg0: i32) -> (i32, i32) {
    %c0_i32 = arith.constant 0 : i32
    %c0_i32_0 = arith.constant 0 : i32
    return %arg0, %c0_i32 : i32, i32
  }
  func.func @transform_1(%arg0: i32) -> (i32, i32) {
    %c0_i32 = arith.constant 0 : i32
    %c0_i32_0 = arith.constant 0 : i32
    %c0_i32_1 = arith.constant 0 : i32
    return %c0_i32, %c0_i32_0 : i32, i32
  }
  func.func @transform_2(%arg0: i32) -> (i32, i32) {
    %c0_i32 = arith.constant 0 : i32
    %c0_i32_0 = arith.constant 0 : i32
    %c0_i32_1 = arith.constant 0 : i32
    return %c0_i32, %c0_i32_0 : i32, i32
  }
  func.func @transform_3(%arg0: i32) -> (i32, i32) {
    %c0_i32 = arith.constant 0 : i32
    %c0_i32_0 = arith.constant 0 : i32
    return %arg0, %c0_i32 : i32, i32
  }
}

module attributes {stable_mosaic.version = 11 : i64} {
  func.func @_mm_bias_proj_kernel(%arg0: i32, %arg1: i32, %arg2: i32, %arg3: memref<64x512xbf16, #tpu.memory_space<vmem>>, %arg4: memref<512x128xbf16, #tpu.memory_space<vmem>>, %arg5: memref<1x128xf32, #tpu.memory_space<vmem>>, %arg6: memref<64x128xbf16, #tpu.memory_space<vmem>>, %arg7: memref<128x128xbf16, #tpu.memory_space<vmem>>, %arg8: memref<1x128xf32, #tpu.memory_space<vmem>>, %arg9: memref<64x128xf32, #tpu.memory_space<vmem>>, %arg10: memref<64x128xf32, #tpu.memory_space<vmem>>) attributes {dimension_semantics = [#tpu.dimension_semantics<parallel>, #tpu.dimension_semantics<parallel>, #tpu.dimension_semantics<arbitrary>], iteration_bounds = array<i64: 2, 1, 7>, scalar_prefetch = 0 : i64, scratch_operands = 1 : i64, tpu.core_type = #tpu.core_type<tc>, window_params = [{transform_indices = @transform_0, window_bounds = array<i64: 64, 512>}, {transform_indices = @transform_1, window_bounds = array<i64: 512, 128>}, {transform_indices = @transform_2, window_bounds = array<i64: 1, 128>}, {transform_indices = @transform_3, window_bounds = array<i64: 64, 128>}, {transform_indices = @transform_4, window_bounds = array<i64: 128, 128>}, {transform_indices = @transform_5, window_bounds = array<i64: 1, 128>}, {transform_indices = @transform_6, window_bounds = array<i64: 64, 128>}]} {
    %c0_i32 = arith.constant 0 : i32
    %0 = arith.cmpi eq, %arg2, %c0_i32 : i32
    %1 = arith.extui %0 : i1 to i32
    %c0_i32_0 = arith.constant 0 : i32
    %2 = arith.cmpi ne, %1, %c0_i32_0 : i32
    scf.if %2 {
      %cst_9 = arith.constant 0.000000e+00 : f32
      %12 = vector.broadcast %cst_9 : f32 to vector<64x128xf32>
      %c0_10 = arith.constant 0 : index
      %c0_11 = arith.constant 0 : index
      %13 = vector.load %arg10[%c0_10, %c0_11] : memref<64x128xf32, #tpu.memory_space<vmem>>, vector<64x128xf32>
      tpu.vector_store %arg10[%c0_10, %c0_11], %12 {strides = array<i32>} : memref<64x128xf32, #tpu.memory_space<vmem>>, vector<64x128xf32>,
    } else {
    }
    %c0 = arith.constant 0 : index
    %c0_1 = arith.constant 0 : index
    %3 = vector.load %arg10[%c0, %c0_1] : memref<64x128xf32, #tpu.memory_space<vmem>>, vector<64x128xf32>
    %c0_2 = arith.constant 0 : index
    %c0_3 = arith.constant 0 : index
    %4 = vector.load %arg3[%c0_2, %c0_3] : memref<64x512xbf16, #tpu.memory_space<vmem>>, vector<64x512xbf16>
    %c0_4 = arith.constant 0 : index
    %c0_5 = arith.constant 0 : index
    %5 = vector.load %arg4[%c0_4, %c0_5] : memref<512x128xbf16, #tpu.memory_space<vmem>>, vector<512x128xbf16>
    %cst = arith.constant dense<0.000000e+00> : vector<64x128xf32>
    %6 = tpu.matmul %4, %5, %cst {dimension_numbers = #tpu.dot_dimension_numbers<[1], [0], [0], [1], [0, 0, 1, 1], [], []>} : vector<64x512xbf16>, vector<512x128xbf16>, vector<64x128xf32> -> vector<64x128xf32>
    %7 = arith.addf %3, %6 : vector<64x128xf32>
    %c0_6 = arith.constant 0 : index
    %c0_7 = arith.constant 0 : index
    %8 = vector.load %arg10[%c0_6, %c0_7] : memref<64x128xf32, #tpu.memory_space<vmem>>, vector<64x128xf32>
    tpu.vector_store %arg10[%c0_6, %c0_7], %7 {strides = array<i32>} : memref<64x128xf32, #tpu.memory_space<vmem>>, vector<64x128xf32>,
    %c6_i32 = arith.constant 6 : i32
    %9 = arith.cmpi eq, %arg2, %c6_i32 : i32
    %10 = arith.extui %9 : i1 to i32
    %c0_i32_8 = arith.constant 0 : i32
    %11 = arith.cmpi ne, %10, %c0_i32_8 : i32
    scf.if %11 {
      %c0_9 = arith.constant 0 : index
      %c0_10 = arith.constant 0 : index
      %12 = vector.load %arg6[%c0_9, %c0_10] : memref<64x128xbf16, #tpu.memory_space<vmem>>, vector<64x128xbf16>
      %c0_11 = arith.constant 0 : index
      %c0_12 = arith.constant 0 : index
      %13 = vector.load %arg7[%c0_11, %c0_12] : memref<128x128xbf16, #tpu.memory_space<vmem>>, vector<128x128xbf16>
      %cst_13 = arith.constant dense<0.000000e+00> : vector<64x128xf32>
      %14 = tpu.matmul %12, %13, %cst_13 {dimension_numbers = #tpu.dot_dimension_numbers<[1], [0], [0], [1], [0, 0, 1, 1], [], []>} : vector<64x128xbf16>, vector<128x128xbf16>, vector<64x128xf32> -> vector<64x128xf32>
      %c0_14 = arith.constant 0 : index
      %c0_15 = arith.constant 0 : index
      %15 = vector.load %arg10[%c0_14, %c0_15] : memref<64x128xf32, #tpu.memory_space<vmem>>, vector<64x128xf32>
      %c0_16 = arith.constant 0 : index
      %c0_17 = arith.constant 0 : index
      %16 = vector.load %arg5[%c0_16, %c0_17] : memref<1x128xf32, #tpu.memory_space<vmem>>, vector<1x128xf32>
      %17 = vector.broadcast %16 : vector<1x128xf32> to vector<64x128xf32>
      %18 = arith.addf %15, %17 : vector<64x128xf32>
      %19 = arith.addf %18, %14 : vector<64x128xf32>
      %c0_18 = arith.constant 0 : index
      %c0_19 = arith.constant 0 : index
      %20 = vector.load %arg8[%c0_18, %c0_19] : memref<1x128xf32, #tpu.memory_space<vmem>>, vector<1x128xf32>
      %21 = vector.broadcast %20 : vector<1x128xf32> to vector<64x128xf32>
      %22 = arith.addf %19, %21 : vector<64x128xf32>
      %c0_20 = arith.constant 0 : index
      %c0_21 = arith.constant 0 : index
      %23 = vector.load %arg9[%c0_20, %c0_21] : memref<64x128xf32, #tpu.memory_space<vmem>>, vector<64x128xf32>
      tpu.vector_store %arg9[%c0_20, %c0_21], %22 {strides = array<i32>} : memref<64x128xf32, #tpu.memory_space<vmem>>, vector<64x128xf32>,
    } else {
    }
    return
  }
  func.func @transform_0(%arg0: i32, %arg1: i32, %arg2: i32) -> (i32, i32) {
    %c0_i32 = arith.constant 0 : i32
    return %arg0, %arg2 : i32, i32
  }
  func.func @transform_1(%arg0: i32, %arg1: i32, %arg2: i32) -> (i32, i32) {
    %c0_i32 = arith.constant 0 : i32
    return %arg2, %arg1 : i32, i32
  }
  func.func @transform_2(%arg0: i32, %arg1: i32, %arg2: i32) -> (i32, i32) {
    %c0_i32 = arith.constant 0 : i32
    %c0_i32_0 = arith.constant 0 : i32
    return %c0_i32, %arg1 : i32, i32
  }
  func.func @transform_3(%arg0: i32, %arg1: i32, %arg2: i32) -> (i32, i32) {
    %c0_i32 = arith.constant 0 : i32
    %c0_i32_0 = arith.constant 0 : i32
    return %arg0, %c0_i32 : i32, i32
  }
  func.func @transform_4(%arg0: i32, %arg1: i32, %arg2: i32) -> (i32, i32) {
    %c0_i32 = arith.constant 0 : i32
    %c0_i32_0 = arith.constant 0 : i32
    return %c0_i32, %arg1 : i32, i32
  }
  func.func @transform_5(%arg0: i32, %arg1: i32, %arg2: i32) -> (i32, i32) {
    %c0_i32 = arith.constant 0 : i32
    %c0_i32_0 = arith.constant 0 : i32
    return %c0_i32, %arg1 : i32, i32
  }
  func.func @transform_6(%arg0: i32, %arg1: i32, %arg2: i32) -> (i32, i32) {
    %c0_i32 = arith.constant 0 : i32
    return %arg0, %arg1 : i32, i32
  }
}

</mosaic_0001>

<bundles_post_ra>
// kernel: preact_basic_forward.5
= control target key start
LH: loop header
LB: loop body
LE: loop exit
PB: predicated region body
PF: predicated region fallthrough
CT: control target
= control target key end

     0   :  { %s483_s9 = smov 0   ;;  %s581_s0 = inlined_call_operand.vmem [shape: f32[1024,128], index: 0, kind: input, shape index: {}]   ;;  %s582_s1 = inlined_call_operand.vmem [shape: f32[1,128], index: 1, kind: output, shape index: {0}]   ;;  %s583_s2 = inlined_call_operand.vmem [shape: f32[1,128], index: 2, kind: output, shape index: {1}]  }
   0x1 LB: > { %s441_s10 = sadd.s32 4294967295, %s465_s9   ;;  %p444_p0 = scmp.ge.s32.totalorder %s465_s9, 1  ;;  %s465_s9 = sphi %s483_s9, %s13_s9  }
   0x2   : > { %p106_p1 = scmp.lt.s32.totalorder %s465_s9, 3 }
   0x4   : > { %p107_p2 = pnand %p444_p0, %p106_p1 }
   0x5   : > { %s445_s11 = sshll.u32 (!%p107_p2), %s441_s10, 6  ;;  %p447_p4 = scmp.ne.s32.totalorder (!%p107_p2), %s441_s10, 0 }
   0x6   : > { %110 = sbr.rel (%p107_p2) target bundleno = 163 (0xa3), region = 24  ;;  %p124_p3 = scmp.lt.s32.totalorder (!%p107_p2), %s445_s11, 127 }
   0xb   : > { %s585_s11 = smov (!%p124_p3, %s445_s11), 127  ;;  %132 = sbr.rel (%p447_p4) target bundleno = 19 (0x13), region = 28 }
   0xc   : > { %s446_s12 = sshll.u32 %s585_s11, 3 }
   0xd   : > { %s494_s15 = scalar_lea.vmem %s581_s0, %s446_s12 }
  0x10   : > { %v467_v0 = vmov 0.0  }
  0x11   : > { %133 = vst [vmem:[%s582_s1] sm:$0x1] %v467_v0 }
  0x12   : > { %134 = vst [vmem:[%s583_s2] sm:$0x1] %v467_v0 }
  0x13 PF: > { %v135_v1 = vld [vmem:[%s494_s15] sm:$0xff]  ;;  %v136_v2 = vld [vmem:[%s494_s15 + $0x8] sm:$0xff]  ;;  %v137_v3 = vld [vmem:[%s494_s15 + $0x10] sm:$0xff] }
  0x14   : > { %v138_v4 = vld [vmem:[%s494_s15 + $0x18] sm:$0xff]  ;;  %v200_v5 = vadd.f32 %v136_v2, %v135_v1  ;;  %v272_v6 = vmul.f32 %v135_v1, %v135_v1  ;;  %v273_v7 = vmul.f32 %v136_v2, %v136_v2  ;;  %v274_v8 = vmul.f32 %v137_v3, %v137_v3  ;;  %v139_v9 = vld [vmem:[%s494_s15 + $0x20] sm:$0xff]  ;;  %v140_v13 = vld [vmem:[%s494_s15 + $0x28] sm:$0xff] }
  0x15   : > { %v275_v11 = vmul.f32 %v138_v4, %v138_v4  ;;  %v276_v15 = vmul.f32 %v139_v9, %v139_v9  ;;  %v141_v17 = vld [vmem:[%s494_s15 + $0x30] sm:$0xff]  ;;  %v277_v19 = vmul.f32 %v140_v13, %v140_v13  ;;  %v142_v21 = vld [vmem:[%s494_s15 + $0x38] sm:$0xff]  ;;  %v143_v25 = vld [vmem:[%s494_s15 + $0x40] sm:$0xff] }
  0x16   : > { %v201_v10 = vadd.f32 %v200_v5, %v137_v3  ;;  %v336_v12 = vadd.f32 %v273_v7, %v272_v6  ;;  %v278_v23 = vmul.f32 %v141_v17, %v141_v17  ;;  %v279_v27 = vmul.f32 %v142_v21, %v142_v21  ;;  %v144_v29 = vld [vmem:[%s494_s15 + $0x48] sm:$0xff]  ;;  %v145_v33 = vld [vmem:[%s494_s15 + $0x50] sm:$0xff]  ;;  %v146_v37 = vld [vmem:[%s494_s15 + $0x58] sm:$0xff] }
  0x17   : > { %v280_v31 = vmul.f32 %v143_v25, %v143_v25  ;;  %v281_v35 = vmul.f32 %v144_v29, %v144_v29  ;;  %v282_v39 = vmul.f32 %v145_v33, %v145_v33  ;;  %v147_v41 = vld [vmem:[%s494_s15 + $0x60] sm:$0xff]  ;;  %v283_v43 = vmul.f32 %v146_v37, %v146_v37  ;;  %v148_v45 = vld [vmem:[%s494_s15 + $0x68] sm:$0xff]  ;;  %v149_v49 = vld [vmem:[%s494_s15 + $0x70] sm:$0xff] }
  0x18   : > { %v202_v14 = vadd.f32 %v201_v10, %v138_v4  ;;  %v337_v16 = vadd.f32 %v336_v12, %v274_v8  ;;  %v284_v47 = vmul.f32 %v147_v41, %v147_v41  ;;  %v285_v51 = vmul.f32 %v148_v45, %v148_v45  ;;  %v150_v53 = vld [vmem:[%s494_s15 + $0x78] sm:$0xff]  ;;  %v151_v57 = vld [vmem:[%s494_s15 + $0x80] sm:$0xff]  ;;  %v152_v61 = vld [vmem:[%s494_s15 + $0x88] sm:$0xff] }
  0x19   : > { %v286_v55 = vmul.f32 %v149_v49, %v149_v49  ;;  %v287_v59 = vmul.f32 %v150_v53, %v150_v53  ;;  %v288_v63 = vmul.f32 %v151_v57, %v151_v57  ;;  %v153_v1 = vld [vmem:[%s494_s15 + $0x90] sm:$0xff]  ;;  %v289_v3 = vmul.f32 %v152_v61, %v152_v61  ;;  %v154_v5 = vld [vmem:[%s494_s15 + $0x98] sm:$0xff] }
  0x1a   : > { %v203_v18 = vadd.f32 %v202_v14, %v139_v9  ;;  %v338_v20 = vadd.f32 %v337_v16, %v275_v11  ;;  %v290_v7 = vmul.f32 %v153_v1, %v153_v1  ;;  %v155_v9 = vld [vmem:[%s494_s15 + $0xa0] sm:$0xff]  ;;  %v291_v11 = vmul.f32 %v154_v5, %v154_v5 }
  0x1c   : > { %v204_v22 = vadd.f32 %v203_v18, %v140_v13  ;;  %v339_v24 = vadd.f32 %v338_v20, %v276_v15  ;;  %v156_v13 = vld [vmem:[%s494_s15 + $0xa8] sm:$0xff]  ;;  %v292_v15 = vmul.f32 %v155_v9, %v155_v9 }
  0x1e   : > { %v205_v26 = vadd.f32 %v204_v22, %v141_v17  ;;  %v340_v28 = vadd.f32 %v339_v24, %v277_v19  ;;  %v157_v17 = vld [vmem:[%s494_s15 + $0xb0] sm:$0xff]  ;;  %v293_v19 = vmul.f32 %v156_v13, %v156_v13 }
  0x20   : > { %v206_v30 = vadd.f32 %v205_v26, %v142_v21  ;;  %v341_v32 = vadd.f32 %v340_v28, %v278_v23  ;;  %v158_v21 = vld [vmem:[%s494_s15 + $0xb8] sm:$0xff]  ;;  %v294_v23 = vmul.f32 %v157_v17, %v157_v17 }
  0x22   : > { %v207_v34 = vadd.f32 %v206_v30, %v143_v25  ;;  %v342_v36 = vadd.f32 %v341_v32, %v279_v27  ;;  %v159_v25 = vld [vmem:[%s494_s15 + $0xc0] sm:$0xff]  ;;  %v295_v27 = vmul.f32 %v158_v21, %v158_v21 }
  0x24   : > { %v208_v38 = vadd.f32 %v207_v34, %v144_v29  ;;  %v343_v40 = vadd.f32 %v342_v36, %v280_v31  ;;  %v160_v29 = vld [vmem:[%s494_s15 + $0xc8] sm:$0xff]  ;;  %v296_v31 = vmul.f32 %v159_v25, %v159_v25 }
  0x26   : > { %v209_v42 = vadd.f32 %v208_v38, %v145_v33  ;;  %v344_v44 = vadd.f32 %v343_v40, %v281_v35  ;;  %v161_v33 = vld [vmem:[%s494_s15 + $0xd0] sm:$0xff]  ;;  %v297_v35 = vmul.f32 %v160_v29, %v160_v29 }
  0x28   : > { %v210_v46 = vadd.f32 %v209_v42, %v146_v37  ;;  %v345_v48 = vadd.f32 %v344_v44, %v282_v39  ;;  %v162_v37 = vld [vmem:[%s494_s15 + $0xd8] sm:$0xff]  ;;  %v298_v39 = vmul.f32 %v161_v33, %v161_v33 }
  0x2a   : > { %v211_v50 = vadd.f32 %v210_v46, %v147_v41  ;;  %v346_v52 = vadd.f32 %v345_v48, %v283_v43  ;;  %v163_v41 = vld [vmem:[%s494_s15 + $0xe0] sm:$0xff]  ;;  %v299_v43 = vmul.f32 %v162_v37, %v162_v37 }
  0x2c   : > { %v212_v54 = vadd.f32 %v211_v50, %v148_v45  ;;  %v347_v56 = vadd.f32 %v346_v52, %v284_v47  ;;  %v164_v45 = vld [vmem:[%s494_s15 + $0xe8] sm:$0xff]  ;;  %v300_v47 = vmul.f32 %v163_v41, %v163_v41 }
  0x2e   : > { %v213_v58 = vadd.f32 %v212_v54, %v149_v49  ;;  %v348_v60 = vadd.f32 %v347_v56, %v285_v51  ;;  %v165_v49 = vld [vmem:[%s494_s15 + $0xf0] sm:$0xff]  ;;  %v301_v51 = vmul.f32 %v164_v45, %v164_v45 }
  0x30   : > { %v214_v62 = vadd.f32 %v213_v58, %v150_v53  ;;  %v349_v0 = vadd.f32 %v348_v60, %v286_v55  ;;  %v166_v53 = vld [vmem:[%s494_s15 + $0xf8] sm:$0xff]  ;;  %v302_v55 = vmul.f32 %v165_v49, %v165_v49 }
  0x32   : > { %v215_v2 = vadd.f32 %v214_v62, %v151_v57  ;;  %v350_v4 = vadd.f32 %v349_v0, %v287_v59  ;;  %v167_v57 = vld [vmem:[%s494_s15 + $0x100] sm:$0xff]  ;;  %v303_v59 = vmul.f32 %v166_v53, %v166_v53 }
  0x34   : > { %v216_v6 = vadd.f32 %v215_v2, %v152_v61  ;;  %v351_v8 = vadd.f32 %v350_v4, %v288_v63  ;;  %v168_v61 = vld [vmem:[%s494_s15 + $0x108] sm:$0xff]  ;;  %v304_v63 = vmul.f32 %v167_v57, %v167_v57 }
  0x36   : > { %v217_v10 = vadd.f32 %v216_v6, %v153_v1  ;;  %v352_v12 = vadd.f32 %v351_v8, %v289_v3  ;;  %v169_v1 = vld [vmem:[%s494_s15 + $0x110] sm:$0xff]  ;;  %v305_v3 = vmul.f32 %v168_v61, %v168_v61 }
  0x38   : > { %v218_v14 = vadd.f32 %v217_v10, %v154_v5  ;;  %v353_v16 = vadd.f32 %v352_v12, %v290_v7  ;;  %v170_v5 = vld [vmem:[%s494_s15 + $0x118] sm:$0xff]  ;;  %v306_v7 = vmul.f32 %v169_v1, %v169_v1 }
  0x3a   : > { %v219_v18 = vadd.f32 %v218_v14, %v155_v9  ;;  %v354_v20 = vadd.f32 %v353_v16, %v291_v11  ;;  %v171_v9 = vld [vmem:[%s494_s15 + $0x120] sm:$0xff]  ;;  %v307_v11 = vmul.f32 %v170_v5, %v170_v5 }
  0x3c   : > { %v220_v22 = vadd.f32 %v219_v18, %v156_v13  ;;  %v355_v24 = vadd.f32 %v354_v20, %v292_v15  ;;  %v172_v13 = vld [vmem:[%s494_s15 + $0x128] sm:$0xff]  ;;  %v308_v15 = vmul.f32 %v171_v9, %v171_v9 }
  0x3e   : > { %v221_v26 = vadd.f32 %v220_v22, %v157_v17  ;;  %v356_v28 = vadd.f32 %v355_v24, %v293_v19  ;;  %v173_v17 = vld [vmem:[%s494_s15 + $0x130] sm:$0xff]  ;;  %v309_v19 = vmul.f32 %v172_v13, %v172_v13 }
  0x40   : > { %v222_v30 = vadd.f32 %v221_v26, %v158_v21  ;;  %v357_v32 = vadd.f32 %v356_v28, %v294_v23  ;;  %v174_v21 = vld [vmem:[%s494_s15 + $0x138] sm:$0xff]  ;;  %v310_v23 = vmul.f32 %v173_v17, %v173_v17 }
  0x42   : > { %v223_v34 = vadd.f32 %v222_v30, %v159_v25  ;;  %v358_v36 = vadd.f32 %v357_v32, %v295_v27  ;;  %v175_v25 = vld [vmem:[%s494_s15 + $0x140] sm:$0xff]  ;;  %v311_v27 = vmul.f32 %v174_v21, %v174_v21 }
  0x44   : > { %v224_v38 = vadd.f32 %v223_v34, %v160_v29  ;;  %v359_v40 = vadd.f32 %v358_v36, %v296_v31  ;;  %v176_v29 = vld [vmem:[%s494_s15 + $0x148] sm:$0xff]  ;;  %v312_v31 = vmul.f32 %v175_v25, %v175_v25 }
  0x46   : > { %v225_v42 = vadd.f32 %v224_v38, %v161_v33  ;;  %v360_v44 = vadd.f32 %v359_v40, %v297_v35  ;;  %v177_v33 = vld [vmem:[%s494_s15 + $0x150] sm:$0xff]  ;;  %v313_v35 = vmul.f32 %v176_v29, %v176_v29 }
  0x48   : > { %v226_v46 = vadd.f32 %v225_v42, %v162_v37  ;;  %v361_v48 = vadd.f32 %v360_v44, %v298_v39  ;;  %v178_v37 = vld [vmem:[%s494_s15 + $0x158] sm:$0xff]  ;;  %v314_v39 = vmul.f32 %v177_v33, %v177_v33 }
  0x4a   : > { %v227_v50 = vadd.f32 %v226_v46, %v163_v41  ;;  %v362_v52 = vadd.f32 %v361_v48, %v299_v43  ;;  %v179_v41 = vld [vmem:[%s494_s15 + $0x160] sm:$0xff]  ;;  %v315_v43 = vmul.f32 %v178_v37, %v178_v37 }
  0x4c   : > { %v228_v54 = vadd.f32 %v227_v50, %v164_v45  ;;  %v363_v56 = vadd.f32 %v362_v52, %v300_v47  ;;  %v180_v45 = vld [vmem:[%s494_s15 + $0x168] sm:$0xff]  ;;  %v316_v47 = vmul.f32 %v179_v41, %v179_v41 }
  0x4e   : > { %v229_v58 = vadd.f32 %v228_v54, %v165_v49  ;;  %v364_v60 = vadd.f32 %v363_v56, %v301_v51  ;;  %v181_v49 = vld [vmem:[%s494_s15 + $0x170] sm:$0xff]  ;;  %v317_v51 = vmul.f32 %v180_v45, %v180_v45 }
  0x50   : > { %v230_v62 = vadd.f32 %v229_v58, %v166_v53  ;;  %v365_v0 = vadd.f32 %v364_v60, %v302_v55  ;;  %v182_v53 = vld [vmem:[%s494_s15 + $0x178] sm:$0xff]  ;;  %v318_v55 = vmul.f32 %v181_v49, %v181_v49 }
  0x52   : > { %v231_v2 = vadd.f32 %v230_v62, %v167_v57  ;;  %v366_v4 = vadd.f32 %v365_v0, %v303_v59  ;;  %v183_v57 = vld [vmem:[%s494_s15 + $0x180] sm:$0xff]  ;;  %v319_v59 = vmul.f32 %v182_v53, %v182_v53 }
  0x54   : > { %v232_v6 = vadd.f32 %v231_v2, %v168_v61  ;;  %v367_v8 = vadd.f32 %v366_v4, %v304_v63  ;;  %v184_v61 = vld [vmem:[%s494_s15 + $0x188] sm:$0xff]  ;;  %v320_v63 = vmul.f32 %v183_v57, %v183_v57 }
  0x56   : > { %v233_v10 = vadd.f32 %v232_v6, %v169_v1  ;;  %v368_v12 = vadd.f32 %v367_v8, %v305_v3  ;;  %v185_v1 = vld [vmem:[%s494_s15 + $0x190] sm:$0xff]  ;;  %v321_v3 = vmul.f32 %v184_v61, %v184_v61 }
  0x58   : > { %v234_v14 = vadd.f32 %v233_v10, %v170_v5  ;;  %v369_v16 = vadd.f32 %v368_v12, %v306_v7  ;;  %v186_v5 = vld [vmem:[%s494_s15 + $0x198] sm:$0xff]  ;;  %v322_v7 = vmul.f32 %v185_v1, %v185_v1 }
  0x5a   : > { %v235_v18 = vadd.f32 %v234_v14, %v171_v9  ;;  %v370_v20 = vadd.f32 %v369_v16, %v307_v11  ;;  %v187_v9 = vld [vmem:[%s494_s15 + $0x1a0] sm:$0xff]  ;;  %v323_v11 = vmul.f32 %v186_v5, %v186_v5 }
  0x5c   : > { %v236_v22 = vadd.f32 %v235_v18, %v172_v13  ;;  %v371_v24 = vadd.f32 %v370_v20, %v308_v15  ;;  %v188_v13 = vld [vmem:[%s494_s15 + $0x1a8] sm:$0xff]  ;;  %v324_v15 = vmul.f32 %v187_v9, %v187_v9 }
  0x5e   : > { %v237_v26 = vadd.f32 %v236_v22, %v173_v17  ;;  %v372_v28 = vadd.f32 %v371_v24, %v309_v19  ;;  %v189_v17 = vld [vmem:[%s494_s15 + $0x1b0] sm:$0xff]  ;;  %v325_v19 = vmul.f32 %v188_v13, %v188_v13 }
  0x60   : > { %v238_v30 = vadd.f32 %v237_v26, %v174_v21  ;;  %v373_v32 = vadd.f32 %v372_v28, %v310_v23  ;;  %v190_v21 = vld [vmem:[%s494_s15 + $0x1b8] sm:$0xff]  ;;  %v326_v23 = vmul.f32 %v189_v17, %v189_v17 }
  0x62   : > { %v239_v34 = vadd.f32 %v238_v30, %v175_v25  ;;  %v374_v36 = vadd.f32 %v373_v32, %v311_v27  ;;  %v191_v25 = vld [vmem:[%s494_s15 + $0x1c0] sm:$0xff]  ;;  %v327_v27 = vmul.f32 %v190_v21, %v190_v21 }
  0x64   : > { %v240_v38 = vadd.f32 %v239_v34, %v176_v29  ;;  %v375_v40 = vadd.f32 %v374_v36, %v312_v31  ;;  %v192_v29 = vld [vmem:[%s494_s15 + $0x1c8] sm:$0xff]  ;;  %v328_v31 = vmul.f32 %v191_v25, %v191_v25 }
  0x66   : > { %v241_v42 = vadd.f32 %v240_v38, %v177_v33  ;;  %v376_v44 = vadd.f32 %v375_v40, %v313_v35  ;;  %v193_v33 = vld [vmem:[%s494_s15 + $0x1d0] sm:$0xff]  ;;  %v329_v35 = vmul.f32 %v192_v29, %v192_v29 }
  0x68   : > { %v242_v46 = vadd.f32 %v241_v42, %v178_v37  ;;  %v377_v48 = vadd.f32 %v376_v44, %v314_v39  ;;  %v194_v37 = vld [vmem:[%s494_s15 + $0x1d8] sm:$0xff]  ;;  %v330_v39 = vmul.f32 %v193_v33, %v193_v33 }
  0x6a   : > { %v243_v50 = vadd.f32 %v242_v46, %v179_v41  ;;  %v378_v52 = vadd.f32 %v377_v48, %v315_v43  ;;  %v195_v41 = vld [vmem:[%s494_s15 + $0x1e0] sm:$0xff]  ;;  %v331_v43 = vmul.f32 %v194_v37, %v194_v37 }
  0x6c   : > { %v244_v54 = vadd.f32 %v243_v50, %v180_v45  ;;  %v379_v56 = vadd.f32 %v378_v52, %v316_v47  ;;  %v196_v45 = vld [vmem:[%s494_s15 + $0x1e8] sm:$0xff]  ;;  %v332_v47 = vmul.f32 %v195_v41, %v195_v41 }
  0x6e   : > { %v245_v58 = vadd.f32 %v244_v54, %v181_v49  ;;  %v380_v60 = vadd.f32 %v379_v56, %v317_v51  ;;  %v197_v49 = vld [vmem:[%s494_s15 + $0x1f0] sm:$0xff]  ;;  %v333_v51 = vmul.f32 %v196_v45, %v196_v45 }
  0x70   : > { %v246_v62 = vadd.f32 %v245_v58, %v182_v53  ;;  %v381_v0 = vadd.f32 %v380_v60, %v318_v55  ;;  %v198_v53 = vld [vmem:[%s494_s15 + $0x1f8] sm:$0xff]  ;;  %v334_v55 = vmul.f32 %v197_v49, %v197_v49 }
  0x71   : > { %v335_v58 = vmul.f32 %v198_v53, %v198_v53 }
  0x72   : > { %v247_v2 = vadd.f32 %v246_v62, %v183_v57  ;;  %v382_v4 = vadd.f32 %v381_v0, %v319_v59 }
  0x74   : > { %v248_v6 = vadd.f32 %v247_v2, %v184_v61  ;;  %v383_v8 = vadd.f32 %v382_v4, %v320_v63 }
  0x76   : > { %v249_v10 = vadd.f32 %v248_v6, %v185_v1  ;;  %v384_v12 = vadd.f32 %v383_v8, %v321_v3 }
  0x78   : > { %v250_v14 = vadd.f32 %v249_v10, %v186_v5  ;;  %v385_v16 = vadd.f32 %v384_v12, %v322_v7  ;;  %v199_v7 = vld [vmem:[%s582_s1] sm:$0x1] }
  0x79   : > { %v271_v12 = vld [vmem:[%s583_s2] sm:$0x1] }
  0x7a   : > { %v251_v18 = vadd.f32 %v250_v14, %v187_v9  ;;  %v386_v20 = vadd.f32 %v385_v16, %v323_v11 }
  0x7c   : > { %v252_v22 = vadd.f32 %v251_v18, %v188_v13  ;;  %v387_v24 = vadd.f32 %v386_v20, %v324_v15 }
  0x7e   : > { %v253_v26 = vadd.f32 %v252_v22, %v189_v17  ;;  %v388_v28 = vadd.f32 %v387_v24, %v325_v19 }
  0x80   : > { %v254_v30 = vadd.f32 %v253_v26, %v190_v21  ;;  %v389_v32 = vadd.f32 %v388_v28, %v326_v23 }
  0x82   : > { %v255_v34 = vadd.f32 %v254_v30, %v191_v25  ;;  %v390_v36 = vadd.f32 %v389_v32, %v327_v27 }
  0x84   : > { %v256_v38 = vadd.f32 %v255_v34, %v192_v29  ;;  %v391_v40 = vadd.f32 %v390_v36, %v328_v31 }
  0x86   : > { %v257_v42 = vadd.f32 %v256_v38, %v193_v33  ;;  %v392_v44 = vadd.f32 %v391_v40, %v329_v35 }
  0x88   : > { %v258_v46 = vadd.f32 %v257_v42, %v194_v37  ;;  %v393_v48 = vadd.f32 %v392_v44, %v330_v39 }
  0x8a   : > { %v259_v50 = vadd.f32 %v258_v46, %v195_v41  ;;  %v394_v52 = vadd.f32 %v393_v48, %v331_v43 }
  0x8c   : > { %v260_v54 = vadd.f32 %v259_v50, %v196_v45  ;;  %v395_v56 = vadd.f32 %v394_v52, %v332_v47 }
  0x8e   : > { %v261_v57 = vadd.f32 %v260_v54, %v197_v49  ;;  %v396_v59 = vadd.f32 %v395_v56, %v333_v51 }
  0x90   : > { %v262_v60 = vadd.f32 %v261_v57, %v198_v53  ;;  %v397_v61 = vadd.f32 %v396_v59, %v334_v55 }
  0x92   : > { %v263_v62 = vrot.slane %v262_v60, 4  ;;  %v398_v63 = vadd.f32 %v397_v61, %v335_v58 }
  0x94   : > { %v264_v0 = vadd.f32 %v263_v62, %v262_v60  ;;  %v399_v1 = vrot.slane %v398_v63, 4 }
  0x96   : > { %v265_v2 = vrot.slane %v264_v0, 2  ;;  %v400_v3 = vadd.f32 %v399_v1, %v398_v63 }
  0x98   : > { %v266_v4 = vadd.f32 %v265_v2, %v264_v0  ;;  %v401_v5 = vrot.slane %v400_v3, 2 }
  0x9a   : > { %v267_v6 = vrot.slane %v266_v4, 1  ;;  %v402_v8 = vadd.f32 %v401_v5, %v400_v3 }
  0x9c   : > { %v268_v9 = vadd.f32 %v267_v6, %v266_v4  ;;  %v403_v10 = vrot.slane %v402_v8, 1 }
  0x9e   : > { %v269_v11 = vadd.f32 %v268_v9, %v199_v7  ;;  %v404_v13 = vadd.f32 %v403_v10, %v402_v8 }
  0xa0   : > { %270 = vst [vmem:[%s582_s1] sm:$0x1] %v269_v11  ;;  %v405_v14 = vadd.f32 %v404_v13, %v271_v12 }
  0xa2   : > { %406 = vst [vmem:[%s583_s2] sm:$0x1] %v405_v14 }
  0xa3 PF: > { %s13_s9 = sadd.s32 1, %s465_s9  }
  0xa4   : > { %p10_p5 = scmp.ge.s32.totalorder %s13_s9, 4  }
  0xa6   :  { %12 = sbr.rel (!%p10_p5) target bundleno = 1 (0x1), region = 62 }

// kernel: preact_basic_forward.6
= control target key start
LH: loop header
LB: loop body
LE: loop exit
PB: predicated region body
PF: predicated region fallthrough
CT: control target
= control target key end

     0   :  { %s862_s12 = smov 0   ;;  %s1121_s0 = inlined_call_operand.vmem [shape: f32[1024,128], index: 0, kind: input, shape index: {}]   ;;  %s1122_s1 = inlined_call_operand.vmem [shape: f32[1,128], index: 1, kind: input, shape index: {}]   ;;  %s1123_s2 = inlined_call_operand.vmem [shape: f32[1,128], index: 2, kind: input, shape index: {}]   ;;  %s1124_s3 = inlined_call_operand.vmem [shape: bf16[1024,128], index: 3, kind: output, shape index: {}]  }
   0x1 LB: > { %s622_s13 = sadd.s32 4294967295, %s840_s12   ;;  %p626_p0 = scmp.ge.s32.totalorder %s840_s12, 1  ;;  %s840_s12 = sphi %s862_s12, %s13_s12  }
   0x2   : > { %p138_p1 = scmp.lt.s32.totalorder %s840_s12, 3 }
   0x4   : > { %p139_p2 = pnand %p626_p0, %p138_p1 }
   0x5   : > { %s627_s14 = sshll.u32 (!%p139_p2), %s622_s13, 6 }
   0x6   : > { %142 = sbr.rel (%p139_p2) target bundleno = 77 (0x4d), region = 32  ;;  %p163_p3 = scmp.lt.s32.totalorder (!%p139_p2), %s627_s14, 127 }
   0xb   : > { %s1126_s14 = smov (!%p163_p3, %s627_s14), 127  ;;  %v875_v0 = vld [vmem:[%s1122_s1] ss:$0 sm:$0xff] }
   0xc   : > { %s628_s17 = sshll.u32 %s1126_s14, 3  ;;  %v886_v1 = vld [vmem:[%s1123_s2] ss:$0 sm:$0xff]  ;;  %s630_s23 = sshll.u32 %s1126_s14, 2 }
   0xd   : > { %s881_s20 = scalar_lea.vmem %s1121_s0, %s628_s17  ;;  %s918_s26 = scalar_lea.vmem %s1124_s3, %s630_s23 }
   0xe   : > { %v174_v2 = vld [vmem:[%s881_s20] sm:$0xff]  ;;  %v175_v3 = vld [vmem:[%s881_s20 + $0x8] sm:$0xff]  ;;  %v176_v4 = vld [vmem:[%s881_s20 + $0x10] sm:$0xff] }
   0xf   : > { %v242_v5 = vmul.f32 %v875_v0, %v174_v2  ;;  %v243_v6 = vmul.f32 %v875_v0, %v175_v3  ;;  %v177_v7 = vld [vmem:[%s881_s20 + $0x18] sm:$0xff]  ;;  %v244_v8 = vmul.f32 %v875_v0, %v176_v4  ;;  %v178_v9 = vld [vmem:[%s881_s20 + $0x20] sm:$0xff]  ;;  %v179_v10 = vld [vmem:[%s881_s20 + $0x28] sm:$0xff] }
  0x10   : > { %v245_v11 = vmul.f32 %v875_v0, %v177_v7  ;;  %v246_v12 = vmul.f32 %v875_v0, %v178_v9  ;;  %v247_v13 = vmul.f32 %v875_v0, %v179_v10  ;;  %v180_v14 = vld [vmem:[%s881_s20 + $0x30] sm:$0xff]  ;;  %v181_v15 = vld [vmem:[%s881_s20 + $0x38] sm:$0xff]  ;;  %v182_v24 = vld [vmem:[%s881_s20 + $0x40] sm:$0xff] }
  0x11   : > { %v310_v16 = vadd.f32 %v886_v1, %v242_v5  ;;  %v311_v17 = vadd.f32 %v886_v1, %v243_v6  ;;  %v312_v18 = vadd.f32 %v886_v1, %v244_v8  ;;  %v248_v19 = vmul.f32 %v875_v0, %v180_v14  ;;  %v183_v25 = vld [vmem:[%s881_s20 + $0x48] sm:$0xff]  ;;  %v184_v30 = vld [vmem:[%s881_s20 + $0x50] sm:$0xff]  ;;  %v185_v35 = vld [vmem:[%s881_s20 + $0x58] sm:$0xff] }
  0x12   : > { %v313_v20 = vadd.f32 %v886_v1, %v245_v11  ;;  %v314_v21 = vadd.f32 %v886_v1, %v246_v12  ;;  %v315_v22 = vadd.f32 %v886_v1, %v247_v13  ;;  %v249_v23 = vmul.f32 %v875_v0, %v181_v15  ;;  %v186_v36 = vld [vmem:[%s881_s20 + $0x60] sm:$0xff]  ;;  %v187_v41 = vld [vmem:[%s881_s20 + $0x68] sm:$0xff]  ;;  %v188_v42 = vld [vmem:[%s881_s20 + $0x70] sm:$0xff] }
  0x13   : > { %v374_v26 = vmax.f32 %v310_v16, 0.0  ;;  %v375_v27 = vmax.f32 %v311_v17, 0.0  ;;  %v376_v28 = vmax.f32 %v312_v18, 0.0  ;;  %v316_v29 = vadd.f32 %v886_v1, %v248_v19  ;;  %v189_v51 = vld [vmem:[%s881_s20 + $0x78] sm:$0xff]  ;;  %v190_v56 = vld [vmem:[%s881_s20 + $0x80] sm:$0xff]  ;;  %v191_v61 = vld [vmem:[%s881_s20 + $0x88] sm:$0xff] }
  0x14   : > { %v377_v31 = vmax.f32 %v313_v20, 0.0  ;;  %v378_v32 = vmax.f32 %v314_v21, 0.0  ;;  %v379_v33 = vmax.f32 %v315_v22, 0.0  ;;  %v317_v34 = vadd.f32 %v886_v1, %v249_v23  ;;  %v192_v4 = vld [vmem:[%s881_s20 + $0x90] sm:$0xff]  ;;  %v193_v5 = vld [vmem:[%s881_s20 + $0x98] sm:$0xff]  ;;  %v194_v10 = vld [vmem:[%s881_s20 + $0xa0] sm:$0xff] }
  0x15   : > { %v636_v37 = vpack.c.bf16 %v375_v27, %v374_v26  ;;  %v380_v38 = vmax.f32 %v316_v29, 0.0  ;;  %v250_v39 = vmul.f32 %v875_v0, %v182_v24  ;;  %v251_v40 = vmul.f32 %v875_v0, %v183_v25  ;;  %v195_v15 = vld [vmem:[%s881_s20 + $0xa8] sm:$0xff]  ;;  %v196_v20 = vld [vmem:[%s881_s20 + $0xb0] sm:$0xff]  ;;  %v197_v25 = vld [vmem:[%s881_s20 + $0xb8] sm:$0xff] }
  0x16   : > { %v641_v43 = vpack.c.bf16 %v377_v31, %v376_v28  ;;  %v646_v44 = vpack.c.bf16 %v379_v33, %v378_v32  ;;  %v381_v45 = vmax.f32 %v317_v34, 0.0  ;;  %v252_v46 = vmul.f32 %v875_v0, %v184_v30  ;;  %v198_v30 = vld [vmem:[%s881_s20 + $0xc0] sm:$0xff] }
  0x17   : > { %637 = vst [vmem:[%s918_s26] sm:$0xff] %v636_v37   ;;  %v318_v47 = vadd.f32 %v886_v1, %v250_v39  ;;  %v319_v48 = vadd.f32 %v886_v1, %v251_v40  ;;  %v253_v49 = vmul.f32 %v875_v0, %v185_v35  ;;  %v254_v50 = vmul.f32 %v875_v0, %v186_v36  ;;  %v199_v35 = vld [vmem:[%s881_s20 + $0xc8] sm:$0xff]  ;;  %v200_v40 = vld [vmem:[%s881_s20 + $0xd0] sm:$0xff] }
  0x18   : > { %793 = vst [vmem:[%s918_s26 + $0x8] sm:$0xff] %v641_v43   ;;  %v651_v52 = vpack.c.bf16 %v381_v45, %v380_v38  ;;  %v320_v53 = vadd.f32 %v886_v1, %v252_v46  ;;  %v255_v54 = vmul.f32 %v875_v0, %v187_v41  ;;  %v256_v55 = vmul.f32 %v875_v0, %v188_v42  ;;  %v201_v41 = vld [vmem:[%s881_s20 + $0xd8] sm:$0xff]  ;;  %v202_v46 = vld [vmem:[%s881_s20 + $0xe0] sm:$0xff] }
  0x19   : > { %794 = vst [vmem:[%s918_s26 + $0x10] sm:$0xff] %v646_v44   ;;  %v382_v57 = vmax.f32 %v318_v47, 0.0  ;;  %v383_v58 = vmax.f32 %v319_v48, 0.0  ;;  %v321_v59 = vadd.f32 %v886_v1, %v253_v49  ;;  %v322_v60 = vadd.f32 %v886_v1, %v254_v50 }
  0x1a   : > { %795 = vst [vmem:[%s918_s26 + $0x18] sm:$0xff] %v651_v52   ;;  %v384_v62 = vmax.f32 %v320_v53, 0.0  ;;  %v323_v63 = vadd.f32 %v886_v1, %v255_v54  ;;  %v257_v2 = vmul.f32 %v875_v0, %v189_v51  ;;  %v324_v3 = vadd.f32 %v886_v1, %v256_v55  ;;  %v203_v51 = vld [vmem:[%s881_s20 + $0xe8] sm:$0xff] }
  0x1b   : > { %v656_v6 = vpack.c.bf16 %v383_v58, %v382_v57  ;;  %v385_v7 = vmax.f32 %v321_v59, 0.0  ;;  %v386_v8 = vmax.f32 %v322_v60, 0.0  ;;  %v258_v9 = vmul.f32 %v875_v0, %v190_v56  ;;  %v204_v56 = vld [vmem:[%s881_s20 + $0xf0] sm:$0xff] }
  0x1c   : > { %v387_v11 = vmax.f32 %v323_v63, 0.0  ;;  %v325_v12 = vadd.f32 %v886_v1, %v257_v2  ;;  %v388_v13 = vmax.f32 %v324_v3, 0.0  ;;  %v259_v14 = vmul.f32 %v875_v0, %v191_v61  ;;  %v205_v61 = vld [vmem:[%s881_s20 + $0xf8] sm:$0xff] }
  0x1d   : > { %796 = vst [vmem:[%s918_s26 + $0x20] sm:$0xff] %v656_v6   ;;  %v661_v16 = vpack.c.bf16 %v385_v7, %v384_v62  ;;  %v326_v17 = vadd.f32 %v886_v1, %v258_v9  ;;  %v260_v18 = vmul.f32 %v875_v0, %v192_v4  ;;  %v261_v19 = vmul.f32 %v875_v0, %v193_v5  ;;  %v206_v4 = vld [vmem:[%s881_s20 + $0x100] sm:$0xff]  ;;  %v207_v9 = vld [vmem:[%s881_s20 + $0x108] sm:$0xff] }
  0x1e   : > { %v666_v21 = vpack.c.bf16 %v387_v11, %v386_v8  ;;  %v389_v22 = vmax.f32 %v325_v12, 0.0  ;;  %v327_v23 = vadd.f32 %v886_v1, %v259_v14  ;;  %v262_v24 = vmul.f32 %v875_v0, %v194_v10  ;;  %v208_v14 = vld [vmem:[%s881_s20 + $0x110] sm:$0xff] }
  0x1f   : > { %797 = vst [vmem:[%s918_s26 + $0x28] sm:$0xff] %v661_v16   ;;  %v390_v26 = vmax.f32 %v326_v17, 0.0  ;;  %v328_v27 = vadd.f32 %v886_v1, %v260_v18  ;;  %v329_v28 = vadd.f32 %v886_v1, %v261_v19  ;;  %v263_v29 = vmul.f32 %v875_v0, %v195_v15  ;;  %v209_v15 = vld [vmem:[%s881_s20 + $0x118] sm:$0xff] }
  0x20   : > { %798 = vst [vmem:[%s918_s26 + $0x30] sm:$0xff] %v666_v21   ;;  %v671_v31 = vpack.c.bf16 %v389_v22, %v388_v13  ;;  %v391_v32 = vmax.f32 %v327_v23, 0.0  ;;  %v330_v33 = vadd.f32 %v886_v1, %v262_v24  ;;  %v264_v34 = vmul.f32 %v875_v0, %v196_v20  ;;  %v210_v20 = vld [vmem:[%s881_s20 + $0x120] sm:$0xff] }
  0x21   : > { %v392_v36 = vmax.f32 %v328_v27, 0.0  ;;  %v393_v37 = vmax.f32 %v329_v28, 0.0  ;;  %v331_v38 = vadd.f32 %v886_v1, %v263_v29  ;;  %v265_v39 = vmul.f32 %v875_v0, %v197_v25  ;;  %v211_v25 = vld [vmem:[%s881_s20 + $0x128] sm:$0xff] }
  0x22   : > { %799 = vst [vmem:[%s918_s26 + $0x38] sm:$0xff] %v671_v31   ;;  %v676_v42 = vpack.c.bf16 %v391_v32, %v390_v26  ;;  %v394_v43 = vmax.f32 %v330_v33, 0.0  ;;  %v332_v44 = vadd.f32 %v886_v1, %v264_v34  ;;  %v266_v45 = vmul.f32 %v875_v0, %v198_v30  ;;  %v212_v30 = vld [vmem:[%s881_s20 + $0x130] sm:$0xff] }
  0x23   : > { %v681_v47 = vpack.c.bf16 %v393_v37, %v392_v36  ;;  %v395_v48 = vmax.f32 %v331_v38, 0.0  ;;  %v333_v49 = vadd.f32 %v886_v1, %v265_v39  ;;  %v267_v50 = vmul.f32 %v875_v0, %v199_v35  ;;  %v213_v35 = vld [vmem:[%s881_s20 + $0x138] sm:$0xff] }
  0x24   : > { %800 = vst [vmem:[%s918_s26 + $0x40] sm:$0xff] %v676_v42   ;;  %v396_v52 = vmax.f32 %v332_v44, 0.0  ;;  %v334_v53 = vadd.f32 %v886_v1, %v266_v45  ;;  %v268_v54 = vmul.f32 %v875_v0, %v200_v40  ;;  %v269_v55 = vmul.f32 %v875_v0, %v201_v41  ;;  %v214_v40 = vld [vmem:[%s881_s20 + $0x140] sm:$0xff]  ;;  %v215_v45 = vld [vmem:[%s881_s20 + $0x148] sm:$0xff] }
  0x25   : > { %801 = vst [vmem:[%s918_s26 + $0x48] sm:$0xff] %v681_v47   ;;  %v686_v57 = vpack.c.bf16 %v395_v48, %v394_v43  ;;  %v397_v58 = vmax.f32 %v333_v49, 0.0  ;;  %v335_v59 = vadd.f32 %v886_v1, %v267_v50  ;;  %v270_v60 = vmul.f32 %v875_v0, %v202_v46  ;;  %v216_v50 = vld [vmem:[%s881_s20 + $0x150] sm:$0xff] }
  0x26   : > { %v398_v62 = vmax.f32 %v334_v53, 0.0  ;;  %v336_v63 = vadd.f32 %v886_v1, %v268_v54  ;;  %v337_v2 = vadd.f32 %v886_v1, %v269_v55  ;;  %v271_v3 = vmul.f32 %v875_v0, %v203_v51  ;;  %v217_v51 = vld [vmem:[%s881_s20 + $0x158] sm:$0xff] }
  0x27   : > { %802 = vst [vmem:[%s918_s26 + $0x50] sm:$0xff] %v686_v57   ;;  %v691_v5 = vpack.c.bf16 %v397_v58, %v396_v52  ;;  %v399_v6 = vmax.f32 %v335_v59, 0.0  ;;  %v338_v7 = vadd.f32 %v886_v1, %v270_v60  ;;  %v272_v8 = vmul.f32 %v875_v0, %v204_v56  ;;  %v218_v56 = vld [vmem:[%s881_s20 + $0x160] sm:$0xff] }
  0x28   : > { %v400_v10 = vmax.f32 %v336_v63, 0.0  ;;  %v401_v11 = vmax.f32 %v337_v2, 0.0  ;;  %v339_v12 = vadd.f32 %v886_v1, %v271_v3  ;;  %v273_v13 = vmul.f32 %v875_v0, %v205_v61  ;;  %v219_v61 = vld [vmem:[%s881_s20 + $0x168] sm:$0xff] }
  0x29   : > { %803 = vst [vmem:[%s918_s26 + $0x58] sm:$0xff] %v691_v5   ;;  %v696_v16 = vpack.c.bf16 %v399_v6, %v398_v62  ;;  %v402_v17 = vmax.f32 %v338_v7, 0.0  ;;  %v340_v18 = vadd.f32 %v886_v1, %v272_v8  ;;  %v274_v19 = vmul.f32 %v875_v0, %v206_v4  ;;  %v220_v4 = vld [vmem:[%s881_s20 + $0x170] sm:$0xff] }
  0x2a   : > { %v701_v21 = vpack.c.bf16 %v401_v11, %v400_v10  ;;  %v403_v22 = vmax.f32 %v339_v12, 0.0  ;;  %v341_v23 = vadd.f32 %v886_v1, %v273_v13  ;;  %v275_v24 = vmul.f32 %v875_v0, %v207_v9  ;;  %v221_v9 = vld [vmem:[%s881_s20 + $0x178] sm:$0xff] }
  0x2b   : > { %804 = vst [vmem:[%s918_s26 + $0x60] sm:$0xff] %v696_v16   ;;  %v404_v26 = vmax.f32 %v340_v18, 0.0  ;;  %v342_v27 = vadd.f32 %v886_v1, %v274_v19  ;;  %v276_v28 = vmul.f32 %v875_v0, %v208_v14  ;;  %v277_v29 = vmul.f32 %v875_v0, %v209_v15  ;;  %v222_v14 = vld [vmem:[%s881_s20 + $0x180] sm:$0xff]  ;;  %v223_v19 = vld [vmem:[%s881_s20 + $0x188] sm:$0xff] }
  0x2c   : > { %805 = vst [vmem:[%s918_s26 + $0x68] sm:$0xff] %v701_v21   ;;  %v706_v31 = vpack.c.bf16 %v403_v22, %v402_v17  ;;  %v405_v32 = vmax.f32 %v341_v23, 0.0  ;;  %v343_v33 = vadd.f32 %v886_v1, %v275_v24  ;;  %v278_v34 = vmul.f32 %v875_v0, %v210_v20  ;;  %v224_v24 = vld [vmem:[%s881_s20 + $0x190] sm:$0xff] }
  0x2d   : > { %v406_v36 = vmax.f32 %v342_v27, 0.0  ;;  %v344_v37 = vadd.f32 %v886_v1, %v276_v28  ;;  %v345_v38 = vadd.f32 %v886_v1, %v277_v29  ;;  %v279_v39 = vmul.f32 %v875_v0, %v211_v25  ;;  %v225_v25 = vld [vmem:[%s881_s20 + $0x198] sm:$0xff] }
  0x2e   : > { %806 = vst [vmem:[%s918_s26 + $0x70] sm:$0xff] %v706_v31   ;;  %v711_v41 = vpack.c.bf16 %v405_v32, %v404_v26  ;;  %v407_v42 = vmax.f32 %v343_v33, 0.0  ;;  %v346_v43 = vadd.f32 %v886_v1, %v278_v34  ;;  %v280_v44 = vmul.f32 %v875_v0, %v212_v30  ;;  %v226_v30 = vld [vmem:[%s881_s20 + $0x1a0] sm:$0xff] }
  0x2f   : > { %v408_v46 = vmax.f32 %v344_v37, 0.0  ;;  %v409_v47 = vmax.f32 %v345_v38, 0.0  ;;  %v347_v48 = vadd.f32 %v886_v1, %v279_v39  ;;  %v281_v49 = vmul.f32 %v875_v0, %v213_v35  ;;  %v227_v35 = vld [vmem:[%s881_s20 + $0x1a8] sm:$0xff] }
  0x30   : > { %807 = vst [vmem:[%s918_s26 + $0x78] sm:$0xff] %v711_v41   ;;  %v716_v52 = vpack.c.bf16 %v407_v42, %v406_v36  ;;  %v410_v53 = vmax.f32 %v346_v43, 0.0  ;;  %v348_v54 = vadd.f32 %v886_v1, %v280_v44  ;;  %v282_v55 = vmul.f32 %v875_v0, %v214_v40  ;;  %v228_v40 = vld [vmem:[%s881_s20 + $0x1b0] sm:$0xff] }
  0x31   : > { %v721_v57 = vpack.c.bf16 %v409_v47, %v408_v46  ;;  %v411_v58 = vmax.f32 %v347_v48, 0.0  ;;  %v349_v59 = vadd.f32 %v886_v1, %v281_v49  ;;  %v283_v60 = vmul.f32 %v875_v0, %v215_v45  ;;  %v229_v45 = vld [vmem:[%s881_s20 + $0x1b8] sm:$0xff] }
  0x32   : > { %808 = vst [vmem:[%s918_s26 + $0x80] sm:$0xff] %v716_v52   ;;  %v412_v62 = vmax.f32 %v348_v54, 0.0  ;;  %v350_v63 = vadd.f32 %v886_v1, %v282_v55  ;;  %v284_v2 = vmul.f32 %v875_v0, %v216_v50  ;;  %v285_v3 = vmul.f32 %v875_v0, %v217_v51  ;;  %v230_v50 = vld [vmem:[%s881_s20 + $0x1c0] sm:$0xff]  ;;  %v231_v55 = vld [vmem:[%s881_s20 + $0x1c8] sm:$0xff] }
  0x33   : > { %809 = vst [vmem:[%s918_s26 + $0x88] sm:$0xff] %v721_v57   ;;  %v726_v5 = vpack.c.bf16 %v411_v58, %v410_v53  ;;  %v413_v6 = vmax.f32 %v349_v59, 0.0  ;;  %v351_v7 = vadd.f32 %v886_v1, %v283_v60  ;;  %v286_v8 = vmul.f32 %v875_v0, %v218_v56  ;;  %v232_v60 = vld [vmem:[%s881_s20 + $0x1d0] sm:$0xff] }
  0x34   : > { %v414_v10 = vmax.f32 %v350_v63, 0.0  ;;  %v352_v11 = vadd.f32 %v886_v1, %v284_v2  ;;  %v353_v12 = vadd.f32 %v886_v1, %v285_v3  ;;  %v287_v13 = vmul.f32 %v875_v0, %v219_v61  ;;  %v233_v61 = vld [vmem:[%s881_s20 + $0x1d8] sm:$0xff] }
  0x35   : > { %810 = vst [vmem:[%s918_s26 + $0x90] sm:$0xff] %v726_v5   ;;  %v731_v15 = vpack.c.bf16 %v413_v6, %v412_v62  ;;  %v415_v16 = vmax.f32 %v351_v7, 0.0  ;;  %v354_v17 = vadd.f32 %v886_v1, %v286_v8  ;;  %v288_v18 = vmul.f32 %v875_v0, %v220_v4  ;;  %v234_v4 = vld [vmem:[%s881_s20 + $0x1e0] sm:$0xff] }
  0x36   : > { %v416_v20 = vmax.f32 %v352_v11, 0.0  ;;  %v417_v21 = vmax.f32 %v353_v12, 0.0  ;;  %v355_v22 = vadd.f32 %v886_v1, %v287_v13  ;;  %v289_v23 = vmul.f32 %v875_v0, %v221_v9  ;;  %v235_v9 = vld [vmem:[%s881_s20 + $0x1e8] sm:$0xff] }
  0x37   : > { %811 = vst [vmem:[%s918_s26 + $0x98] sm:$0xff] %v731_v15   ;;  %v736_v26 = vpack.c.bf16 %v415_v16, %v414_v10  ;;  %v418_v27 = vmax.f32 %v354_v17, 0.0  ;;  %v356_v28 = vadd.f32 %v886_v1, %v288_v18  ;;  %v290_v29 = vmul.f32 %v875_v0, %v222_v14  ;;  %v236_v14 = vld [vmem:[%s881_s20 + $0x1f0] sm:$0xff] }
  0x38   : > { %v741_v31 = vpack.c.bf16 %v417_v21, %v416_v20  ;;  %v419_v32 = vmax.f32 %v355_v22, 0.0  ;;  %v357_v33 = vadd.f32 %v886_v1, %v289_v23  ;;  %v291_v34 = vmul.f32 %v875_v0, %v223_v19  ;;  %v237_v19 = vld [vmem:[%s881_s20 + $0x1f8] sm:$0xff] }
  0x39   : > { %812 = vst [vmem:[%s918_s26 + $0xa0] sm:$0xff] %v736_v26   ;;  %v420_v36 = vmax.f32 %v356_v28, 0.0  ;;  %v358_v37 = vadd.f32 %v886_v1, %v290_v29  ;;  %v292_v38 = vmul.f32 %v875_v0, %v224_v24  ;;  %v293_v39 = vmul.f32 %v875_v0, %v225_v25 }
  0x3a   : > { %813 = vst [vmem:[%s918_s26 + $0xa8] sm:$0xff] %v741_v31   ;;  %v746_v41 = vpack.c.bf16 %v419_v32, %v418_v27  ;;  %v421_v42 = vmax.f32 %v357_v33, 0.0  ;;  %v359_v43 = vadd.f32 %v886_v1, %v291_v34  ;;  %v294_v44 = vmul.f32 %v875_v0, %v226_v30 }
  0x3b   : > { %v422_v46 = vmax.f32 %v358_v37, 0.0  ;;  %v360_v47 = vadd.f32 %v886_v1, %v292_v38  ;;  %v361_v48 = vadd.f32 %v886_v1, %v293_v39  ;;  %v295_v49 = vmul.f32 %v875_v0, %v227_v35 }
  0x3c   : > { %814 = vst [vmem:[%s918_s26 + $0xb0] sm:$0xff] %v746_v41   ;;  %v751_v51 = vpack.c.bf16 %v421_v42, %v420_v36  ;;  %v423_v52 = vmax.f32 %v359_v43, 0.0  ;;  %v362_v53 = vadd.f32 %v886_v1, %v294_v44  ;;  %v296_v54 = vmul.f32 %v875_v0, %v228_v40 }
  0x3d   : > { %v424_v56 = vmax.f32 %v360_v47, 0.0  ;;  %v425_v57 = vmax.f32 %v361_v48, 0.0  ;;  %v363_v58 = vadd.f32 %v886_v1, %v295_v49  ;;  %v297_v59 = vmul.f32 %v875_v0, %v229_v45 }
  0x3e   : > { %815 = vst [vmem:[%s918_s26 + $0xb8] sm:$0xff] %v751_v51   ;;  %v756_v62 = vpack.c.bf16 %v423_v52, %v422_v46  ;;  %v426_v63 = vmax.f32 %v362_v53, 0.0  ;;  %v364_v2 = vadd.f32 %v886_v1, %v296_v54  ;;  %v298_v3 = vmul.f32 %v875_v0, %v230_v50 }
  0x3f   : > { %v761_v5 = vpack.c.bf16 %v425_v57, %v424_v56  ;;  %v427_v6 = vmax.f32 %v363_v58, 0.0  ;;  %v365_v7 = vadd.f32 %v886_v1, %v297_v59  ;;  %v299_v8 = vmul.f32 %v875_v0, %v231_v55 }
  0x40   : > { %816 = vst [vmem:[%s918_s26 + $0xc0] sm:$0xff] %v756_v62   ;;  %v428_v10 = vmax.f32 %v364_v2, 0.0  ;;  %v366_v11 = vadd.f32 %v886_v1, %v298_v3  ;;  %v300_v12 = vmul.f32 %v875_v0, %v232_v60  ;;  %v301_v13 = vmul.f32 %v875_v0, %v233_v61 }
  0x41   : > { %817 = vst [vmem:[%s918_s26 + $0xc8] sm:$0xff] %v761_v5   ;;  %v766_v15 = vpack.c.bf16 %v427_v6, %v426_v63  ;;  %v429_v16 = vmax.f32 %v365_v7, 0.0  ;;  %v367_v17 = vadd.f32 %v886_v1, %v299_v8  ;;  %v302_v18 = vmul.f32 %v875_v0, %v234_v4 }
  0x42   : > { %v430_v20 = vmax.f32 %v366_v11, 0.0  ;;  %v368_v21 = vadd.f32 %v886_v1, %v300_v12  ;;  %v369_v22 = vadd.f32 %v886_v1, %v301_v13  ;;  %v303_v23 = vmul.f32 %v875_v0, %v235_v9 }
  0x43   : > { %818 = vst [vmem:[%s918_s26 + $0xd0] sm:$0xff] %v766_v15   ;;  %v771_v24 = vpack.c.bf16 %v429_v16, %v428_v10  ;;  %v431_v25 = vmax.f32 %v367_v17, 0.0  ;;  %v370_v26 = vadd.f32 %v886_v1, %v302_v18  ;;  %v304_v27 = vmul.f32 %v875_v0, %v236_v14 }
  0x44   : > { %v432_v28 = vmax.f32 %v368_v21, 0.0  ;;  %v433_v29 = vmax.f32 %v369_v22, 0.0  ;;  %v371_v30 = vadd.f32 %v886_v1, %v303_v23  ;;  %v305_v31 = vmul.f32 %v875_v0, %v237_v19 }
  0x45   : > { %819 = vst [vmem:[%s918_s26 + $0xd8] sm:$0xff] %v771_v24   ;;  %v776_v32 = vpack.c.bf16 %v431_v25, %v430_v20  ;;  %v434_v33 = vmax.f32 %v370_v26, 0.0  ;;  %v372_v34 = vadd.f32 %v886_v1, %v304_v27 }
  0x46   : > { %v781_v35 = vpack.c.bf16 %v433_v29, %v432_v28  ;;  %v435_v36 = vmax.f32 %v371_v30, 0.0  ;;  %v373_v37 = vadd.f32 %v886_v1, %v305_v31 }
  0x47   : > { %820 = vst [vmem:[%s918_s26 + $0xe0] sm:$0xff] %v776_v32   ;;  %v436_v38 = vmax.f32 %v372_v34, 0.0 }
  0x48   : > { %821 = vst [vmem:[%s918_s26 + $0xe8] sm:$0xff] %v781_v35   ;;  %v786_v39 = vpack.c.bf16 %v435_v36, %v434_v33  ;;  %v437_v40 = vmax.f32 %v373_v37, 0.0 }
  0x4a   : > { %822 = vst [vmem:[%s918_s26 + $0xf0] sm:$0xff] %v786_v39   ;;  %v791_v41 = vpack.c.bf16 %v437_v40, %v436_v38 }
  0x4c   : > { %823 = vst [vmem:[%s918_s26 + $0xf8] sm:$0xff] %v791_v41  }
  0x4d PF: > { %s13_s12 = sadd.s32 1, %s840_s12  }
  0x4e   : > { %p10_p4 = scmp.ge.s32.totalorder %s13_s12, 4  }
  0x50   :  { %12 = sbr.rel (!%p10_p4) target bundleno = 1 (0x1), region = 62 }

// kernel: preact_basic_forward.8
= control target key start
LH: loop header
LB: loop body
LE: loop exit
PB: predicated region body
PF: predicated region fallthrough
CT: control target
= control target key end

     0   :  { %s385_s12 = smov 0   ;;  %s415_s0 = inlined_call_operand.vmem [shape: bf16[128,128], index: 0, kind: input, shape index: {}]   ;;  %s416_s1 = inlined_call_operand.vmem [shape: f32[1,128], index: 1, kind: input, shape index: {}]   ;;  %s417_s2 = inlined_call_operand.vmem [shape: f32[1,128], index: 2, kind: input, shape index: {}]   ;;  %s418_s3 = inlined_call_operand.vmem [shape: bf16[128,128], index: 3, kind: output, shape index: {}]  }
   0x1 LB: > { %s294_s13 = sadd.s32 4294967295, %s363_s12   ;;  %p298_p0 = scmp.ge.s32.totalorder %s363_s12, 1  ;;  %s363_s12 = sphi %s385_s12, %s13_s12  }
   0x2   : > { %p138_p1 = scmp.lt.s32.totalorder %s363_s12, 3 }
   0x4   : > { %p139_p2 = pnand %p298_p0, %p138_p1 }
   0x5   : > { %s299_s14 = sshll.u32 (!%p139_p2), %s294_s13, 3 }
   0x6   : > { %142 = sbr.rel (%p139_p2) target bundleno = 29 (0x1d), region = 32  ;;  %p163_p3 = scmp.lt.s32.totalorder (!%p139_p2), %s299_s14, 15 }
   0xb   : > { %s420_s14 = smov (!%p163_p3, %s299_s14), 15  ;;  %v355_v0 = vld [vmem:[%s416_s1] ss:$0 sm:$0xff] }
   0xc   : > { %s300_s15 = sshll.u32 %s420_s14, 2  ;;  %v356_v6 = vld [vmem:[%s417_s2] ss:$0 sm:$0xff] }
   0xd   : > { %s166_s18 = scalar_lea.vmem %s415_s0, %s300_s15  ;;  %s172_s25 = scalar_lea.vmem %s418_s3, %s300_s15 }
   0xe   : > { %v306_v1 = vld [vmem:[%s166_s18] sm:$0xff]   ;;  %v341_v2 = vld [vmem:[%s166_s18 + $0x8] sm:$0xff]   ;;  %v342_v3 = vld [vmem:[%s166_s18 + $0x10] sm:$0xff]  }
   0xf   : > { %v307_v4 = vunpack.c.l.bf16 %v306_v1  ;;  %v308_v5 = vunpack.c.h.bf16 %v306_v1  ;;  %v311_v7 = vunpack.c.l.bf16 %v341_v2  ;;  %v312_v8 = vunpack.c.h.bf16 %v341_v2  ;;  %v343_v9 = vld [vmem:[%s166_s18 + $0x18] sm:$0xff]  }
  0x10   : > { %v315_v10 = vunpack.c.l.bf16 %v342_v3  ;;  %v316_v11 = vunpack.c.h.bf16 %v342_v3  ;;  %v319_v12 = vunpack.c.l.bf16 %v343_v9  ;;  %v320_v13 = vunpack.c.h.bf16 %v343_v9 }
  0x11   : > { %v194_v14 = vmul.f32 %v355_v0, %v307_v4  ;;  %v195_v15 = vmul.f32 %v355_v0, %v308_v5  ;;  %v196_v16 = vmul.f32 %v355_v0, %v311_v7  ;;  %v197_v17 = vmul.f32 %v355_v0, %v312_v8 }
  0x12   : > { %v198_v18 = vmul.f32 %v355_v0, %v315_v10  ;;  %v199_v19 = vmul.f32 %v355_v0, %v316_v11  ;;  %v200_v20 = vmul.f32 %v355_v0, %v319_v12  ;;  %v201_v21 = vmul.f32 %v355_v0, %v320_v13 }
  0x13   : > { %v206_v22 = vadd.f32 %v356_v6, %v194_v14  ;;  %v207_v23 = vadd.f32 %v356_v6, %v195_v15  ;;  %v208_v24 = vadd.f32 %v356_v6, %v196_v16  ;;  %v209_v25 = vadd.f32 %v356_v6, %v197_v17 }
  0x14   : > { %v210_v26 = vadd.f32 %v356_v6, %v198_v18  ;;  %v211_v27 = vadd.f32 %v356_v6, %v199_v19  ;;  %v212_v28 = vadd.f32 %v356_v6, %v200_v20  ;;  %v213_v29 = vadd.f32 %v356_v6, %v201_v21 }
  0x15   : > { %v214_v30 = vmax.f32 %v206_v22, 0.0  ;;  %v215_v31 = vmax.f32 %v207_v23, 0.0  ;;  %v216_v32 = vmax.f32 %v208_v24, 0.0  ;;  %v217_v33 = vmax.f32 %v209_v25, 0.0 }
  0x16   : > { %v218_v34 = vmax.f32 %v210_v26, 0.0  ;;  %v219_v35 = vmax.f32 %v211_v27, 0.0  ;;  %v220_v36 = vmax.f32 %v212_v28, 0.0  ;;  %v221_v37 = vmax.f32 %v213_v29, 0.0 }
  0x17   : > { %v324_v38 = vpack.c.bf16 %v215_v31, %v214_v30  ;;  %v329_v39 = vpack.c.bf16 %v217_v33, %v216_v32 }
  0x18   : > { %v334_v40 = vpack.c.bf16 %v219_v35, %v218_v34  ;;  %v339_v41 = vpack.c.bf16 %v221_v37, %v220_v36 }
  0x19   : > { %325 = vst [vmem:[%s172_s25] sm:$0xff] %v324_v38  }
  0x1a   : > { %344 = vst [vmem:[%s172_s25 + $0x8] sm:$0xff] %v329_v39  }
  0x1b   : > { %345 = vst [vmem:[%s172_s25 + $0x10] sm:$0xff] %v334_v40  }
  0x1c   : > { %346 = vst [vmem:[%s172_s25 + $0x18] sm:$0xff] %v339_v41  }
  0x1d PF: > { %s13_s12 = sadd.s32 1, %s363_s12  }
  0x1e   : > { %p10_p4 = scmp.ge.s32.totalorder %s13_s12, 4  }
  0x20   :  { %12 = sbr.rel (!%p10_p4) target bundleno = 1 (0x1), region = 62 }

// kernel: preact_basic_forward.7
= control target key start
LH: loop header
LB: loop body
LE: loop exit
PB: predicated region body
PF: predicated region fallthrough
CT: control target
= control target key end

     0   :  { %s1874_s18 = smov 0   ;;  %s1876_s19 = smov 0   ;;  %s2148_s0 = inlined_call_operand.vmem [shape: bf16[128,3584], index: 0, kind: input, shape index: {}]   ;;  %s2149_s1 = inlined_call_operand.vmem [shape: bf16[3584,128], index: 1, kind: input, shape index: {}]   ;;  %s2150_s2 = inlined_call_operand.vmem [shape: f32[1,128], index: 2, kind: input, shape index: {}]   ;;  %s2151_s3 = inlined_call_operand.vmem [shape: bf16[128,128], index: 3, kind: output, shape index: {0}]   ;;  %s2152_s4 = inlined_call_operand.vmem [shape: f32[1,128], index: 4, kind: output, shape index: {1}]   ;;  %s2153_s5 = inlined_call_operand.vmem [shape: f32[1,128], index: 5, kind: output, shape index: {2}]  }
   0x1   :  { %s1878_s20 = smov 0   ;;  %s1880_s21 = smov 0  }
   0x2   :  { %s1882_s22 = smov 0  }
   0x3 LB: > { %s28_s23 = sadd.s32 1, %s1836_s21  ;;  %p51_p1 = scmp.ne.s32.totalorder %s1828_s19, %s1824_s18  ;;  %s1840_s22 = sphi %s1882_s22, %s16_s22   ;;  %s1836_s21 = sphi %s1880_s21, %s2157_s21   ;;  %s1832_s20 = sphi %s1878_s20, %s2156_s20   ;;  %s1828_s19 = sphi %s1876_s19, %s2155_s19   ;;  %s1824_s18 = sphi %s1874_s18, %s2154_s18  }
   0x4   : > { %p29_p0 = scmp.ge.s32.totalorder %s28_s23, 7  ;;  %p52_p2 = scmp.eq.s32.totalorder %s1840_s22, 0 }
   0x5   : > { %s44_s25 = sadd.s32 1, %s1828_s19  ;;  %p1373_p5 = scmp.ge.s32.totalorder %s1840_s22, 7 }
   0x6   : > { %s2159_s23 = smov (%p29_p0, %s28_s23), 0  ;;  %p53_p3 = por %p52_p2, %p51_p1 }
   0x7   : > { %s40_s24 = ssub.s32 %s1836_s21, %s2159_s23  ;;  %207 = sbr.rel (%p1373_p5) target bundleno = 48 (0x30), region = 20 }
   0x8   : > { %p42_p4 = scmp.eq.s32.totalorder %s40_s24, 0 }
   0xa   : > { %s1909_s26 = scalar_select %p42_p4, %s1828_s19, %s44_s25  }
   0xc   : > { %210 = sbr.rel (!%p53_p3) target bundleno = 48 (0x30), region = 24  ;;  %s212_s27 = sand.u32 (%p53_p3), 1, %s1828_s19  }
   0xd   : > { %s1645_s28 = sshll.u32 (%p53_p3), %s1836_s21, 4  ;;  %s1374_s29 = sshll.u32 (%p53_p3), %s212_s27, 8 }
   0xe   : > { %s1917_s7 = scalar_lea.vmem (%p53_p3), %s2148_s0, %s1645_s28  ;;  %s1922_s8 = scalar_lea.vmem (%p53_p3), [#allocation5], %s1374_s29 }
   0xf   : > { %v233_v0 = vld [vmem:[%s1917_s7] sm:$0xff] (%p53_p3)  ;;  %v235_v1 = vld [vmem:[%s1917_s7 + $0x8] sm:$0xff] (%p53_p3)  ;;  %v237_v2 = vld [vmem:[%s1917_s7 + $0x70] sm:$0xff] (%p53_p3) }
  0x10   : > { %234 = vst [vmem:[%s1922_s8] sm:$0xff] (%p53_p3), %v233_v0  ;;  %v239_v3 = vld [vmem:[%s1917_s7 + $0x78] sm:$0xff] (%p53_p3)  ;;  %v241_v4 = vld [vmem:[%s1917_s7 + $0xe0] sm:$0xff] (%p53_p3)  ;;  %v243_v5 = vld [vmem:[%s1917_s7 + $0xe8] sm:$0xff] (%p53_p3) }
  0x11   : > { %236 = vst [vmem:[%s1922_s8 + $0x8] sm:$0xff] %v235_v1  ;;  %v245_v6 = vld [vmem:[%s1917_s7 + $0x150] sm:$0xff]  ;;  %v247_v7 = vld [vmem:[%s1917_s7 + $0x158] sm:$0xff]  ;;  %v249_v8 = vld [vmem:[%s1917_s7 + $0x1c0] sm:$0xff] }
  0x12   : > { %238 = vst [vmem:[%s1922_s8 + $0x10] sm:$0xff] %v237_v2  ;;  %v251_v9 = vld [vmem:[%s1917_s7 + $0x1c8] sm:$0xff]  ;;  %v253_v10 = vld [vmem:[%s1917_s7 + $0x230] sm:$0xff]  ;;  %v255_v11 = vld [vmem:[%s1917_s7 + $0x238] sm:$0xff] }
  0x13   : > { %240 = vst [vmem:[%s1922_s8 + $0x18] sm:$0xff] %v239_v3  ;;  %v257_v12 = vld [vmem:[%s1917_s7 + $0x2a0] sm:$0xff]  ;;  %v259_v13 = vld [vmem:[%s1917_s7 + $0x2a8] sm:$0xff]  ;;  %v261_v14 = vld [vmem:[%s1917_s7 + $0x310] sm:$0xff] }
  0x14   : > { %242 = vst [vmem:[%s1922_s8 + $0x20] sm:$0xff] %v241_v4  ;;  %v263_v15 = vld [vmem:[%s1917_s7 + $0x318] sm:$0xff]  ;;  %v265_v16 = vld [vmem:[%s1917_s7 + $0x380] sm:$0xff]  ;;  %v267_v17 = vld [vmem:[%s1917_s7 + $0x388] sm:$0xff] }
  0x15   : > { %244 = vst [vmem:[%s1922_s8 + $0x28] sm:$0xff] %v243_v5  ;;  %v269_v18 = vld [vmem:[%s1917_s7 + $0x3f0] sm:$0xff]  ;;  %v271_v19 = vld [vmem:[%s1917_s7 + $0x3f8] sm:$0xff]  ;;  %v273_v20 = vld [vmem:[%s1917_s7 + $0x460] sm:$0xff] }
  0x16   : > { %246 = vst [vmem:[%s1922_s8 + $0x30] sm:$0xff] %v245_v6  ;;  %v275_v21 = vld [vmem:[%s1917_s7 + $0x468] sm:$0xff]  ;;  %v277_v22 = vld [vmem:[%s1917_s7 + $0x4d0] sm:$0xff]  ;;  %v279_v23 = vld [vmem:[%s1917_s7 + $0x4d8] sm:$0xff] }
  0x17   : > { %248 = vst [vmem:[%s1922_s8 + $0x38] sm:$0xff] %v247_v7  ;;  %v281_v24 = vld [vmem:[%s1917_s7 + $0x540] sm:$0xff]  ;;  %v283_v25 = vld [vmem:[%s1917_s7 + $0x548] sm:$0xff]  ;;  %v285_v26 = vld [vmem:[%s1917_s7 + $0x5b0] sm:$0xff] }
  0x18   : > { %250 = vst [vmem:[%s1922_s8 + $0x40] sm:$0xff] %v249_v8  ;;  %v287_v27 = vld [vmem:[%s1917_s7 + $0x5b8] sm:$0xff]  ;;  %v289_v28 = vld [vmem:[%s1917_s7 + $0x620] sm:$0xff]  ;;  %v291_v29 = vld [vmem:[%s1917_s7 + $0x628] sm:$0xff] }
  0x19   : > { %252 = vst [vmem:[%s1922_s8 + $0x48] sm:$0xff] %v251_v9  ;;  %v293_v30 = vld [vmem:[%s1917_s7 + $0x690] sm:$0xff]  ;;  %v295_v31 = vld [vmem:[%s1917_s7 + $0x698] sm:$0xff] }
  0x1a   : > { %254 = vst [vmem:[%s1922_s8 + $0x50] sm:$0xff] %v253_v10 }
  0x1b   : > { %256 = vst [vmem:[%s1922_s8 + $0x58] sm:$0xff] %v255_v11 }
  0x1c   : > { %258 = vst [vmem:[%s1922_s8 + $0x60] sm:$0xff] %v257_v12 }
  0x1d   : > { %260 = vst [vmem:[%s1922_s8 + $0x68] sm:$0xff] %v259_v13 }
  0x1e   : > { %262 = vst [vmem:[%s1922_s8 + $0x70] sm:$0xff] %v261_v14 }
  0x1f   : > { %264 = vst [vmem:[%s1922_s8 + $0x78] sm:$0xff] %v263_v15 }
  0x20   : > { %266 = vst [vmem:[%s1922_s8 + $0x80] sm:$0xff] %v265_v16 }
  0x21   : > { %268 = vst [vmem:[%s1922_s8 + $0x88] sm:$0xff] %v267_v17 }
  0x22   : > { %270 = vst [vmem:[%s1922_s8 + $0x90] sm:$0xff] %v269_v18 }
  0x23   : > { %272 = vst [vmem:[%s1922_s8 + $0x98] sm:$0xff] %v271_v19 }
  0x24   : > { %274 = vst [vmem:[%s1922_s8 + $0xa0] sm:$0xff] %v273_v20 }
  0x25   : > { %276 = vst [vmem:[%s1922_s8 + $0xa8] sm:$0xff] %v275_v21 }
  0x26   : > { %278 = vst [vmem:[%s1922_s8 + $0xb0] sm:$0xff] %v277_v22 }
  0x27   : > { %280 = vst [vmem:[%s1922_s8 + $0xb8] sm:$0xff] %v279_v23 }
  0x28   : > { %282 = vst [vmem:[%s1922_s8 + $0xc0] sm:$0xff] %v281_v24 }
  0x29   : > { %284 = vst [vmem:[%s1922_s8 + $0xc8] sm:$0xff] %v283_v25 }
  0x2a   : > { %286 = vst [vmem:[%s1922_s8 + $0xd0] sm:$0xff] %v285_v26 }
  0x2b   : > { %288 = vst [vmem:[%s1922_s8 + $0xd8] sm:$0xff] %v287_v27 }
  0x2c   : > { %290 = vst [vmem:[%s1922_s8 + $0xe0] sm:$0xff] %v289_v28 }
  0x2d   : > { %292 = vst [vmem:[%s1922_s8 + $0xe8] sm:$0xff] %v291_v29 }
  0x2e   : > { %294 = vst [vmem:[%s1922_s8 + $0xf0] sm:$0xff] %v293_v30 }
  0x2f   : > { %296 = vst [vmem:[%s1922_s8 + $0xf8] sm:$0xff] %v295_v31 }
  0x30 PF: > { %p1377_p6 = scmp.ge.s32.totalorder %s1840_s22, 1  ;;  %p313_p7 = scmp.lt.s32.totalorder %s1840_s22, 8 }
  0x32   : > { %p314_p8 = pnand %p1377_p6, %p313_p7 }
  0x33   : > { %s320_s9 = sand.u32 (!%p314_p8), 1, %s1824_s18   ;;  %s1379_s10 = sshll.u32 (!%p314_p8), %s1832_s20, 6 }
  0x34   : > { %317 = sbr.rel (%p314_p8) target bundleno = 433 (0x1b1), region = 51  ;;  %s1378_s11 = sshll.u32 (!%p314_p8), %s320_s9, 8 }
  0x35   : > { %p364_p9 = scmp.lt.s32.totalorder (!%p314_p8), %s1379_s10, 447  ;;  %p384_p10 = scmp.eq.s32.totalorder (!%p314_p8), %s1832_s20, 0 }
  0x36   : > { %s1995_s16 = scalar_lea.vmem (!%p314_p8), [#allocation5], %s1378_s11  ;;  %p1381_p11 = scmp.ne.s32.totalorder (!%p314_p8), %s1832_s20, 0 }
  0x39   : > { %s2161_s10 = smov (!%p364_p9, %s1379_s10), 447  ;;  %387 = sbr.rel (%p1381_p11) target bundleno = 79 (0x4f), region = 59 }
  0x3a   : > { %s1380_s12 = sshll.u32 %s2161_s10, 2 }
  0x3b   : > { %s1993_s15 = scalar_lea.vmem %s2149_s1, %s1380_s12 }
  0x3e   : > { %v1842_v32 = vmov 0.0  }
  0x3f   : > { %388 = vst [vmem:[#allocation2 + $0x30] sm:$0xff] %v1842_v32 }
  0x40   : > { %389 = vst [vmem:[#allocation2] sm:$0xff] %v1842_v32 }
  0x41   : > { %390 = vst [vmem:[#allocation2 + $0x58] sm:$0xff] %v1842_v32 }
  0x42   : > { %391 = vst [vmem:[#allocation2 + $0x18] sm:$0xff] %v1842_v32 }
  0x43   : > { %392 = vst [vmem:[#allocation2 + $0x50] sm:$0xff] %v1842_v32 }
  0x44   : > { %393 = vst [vmem:[#allocation2 + $0x68] sm:$0xff] %v1842_v32 }
  0x45   : > { %394 = vst [vmem:[#allocation2 + $0x8] sm:$0xff] %v1842_v32 }
  0x46   : > { %395 = vst [vmem:[#allocation2 + $0x48] sm:$0xff] %v1842_v32 }
  0x47   : > { %396 = vst [vmem:[#allocation2 + $0x40] sm:$0xff] %v1842_v32 }
  0x48   : > { %397 = vst [vmem:[#allocation2 + $0x20] sm:$0xff] %v1842_v32 }
  0x49   : > { %398 = vst [vmem:[#allocation2 + $0x10] sm:$0xff] %v1842_v32 }
  0x4a   : > { %399 = vst [vmem:[#allocation2 + $0x38] sm:$0xff] %v1842_v32 }
  0x4b   : > { %400 = vst [vmem:[#allocation2 + $0x60] sm:$0xff] %v1842_v32 }
  0x4c   : > { %401 = vst [vmem:[#allocation2 + $0x70] sm:$0xff] %v1842_v32 }
  0x4d   : > { %402 = vst [vmem:[#allocation2 + $0x78] sm:$0xff] %v1842_v32 }
  0x4e   : > { %403 = vst [vmem:[#allocation2 + $0x28] sm:$0xff] %v1842_v32 }
  0x4f PF: > { %408 = sbr.rel (!%p384_p10) target bundleno = 84 (0x54), region = 63  ;;  %v1843_v33 = vmov (%p384_p10), 0.0  }
  0x50   : > { %409 = vst [vmem:[#allocation3] sm:$0x1] (%p384_p10), %v1843_v33 }
  0x51   : > { %410 = vst [vmem:[#allocation4] sm:$0x1] (%p384_p10), %v1843_v33 }
  0x54 PF: > { %v1686_v34 = vld [vmem:[%s1993_s15 + $0x38] sm:$0xff]  ;;  %v1685_v38 = vld [vmem:[%s1993_s15 + $0x30] sm:$0xff]  ;;  %v1684_v42 = vld [vmem:[%s1993_s15 + $0x28] sm:$0xff]  ;;  %p1103_p12 = scmp.eq.s32.totalorder %s1832_s20, 6  ;;  %p1639_p13 = scmp.ne.s32.totalorder %s1832_s20, 6 }
  0x55   : > { %v1694_v35 = vld [vmem:[%s1993_s15 + $0x78] sm:$0xff]  ;;  %875 = vmatpush.bf16.msra.mxu0 %v1686_v34  ;;  %v1693_v39 = vld [vmem:[%s1993_s15 + $0x70] sm:$0xff]  ;;  %v1692_v43 = vld [vmem:[%s1993_s15 + $0x68] sm:$0xff] }
  0x56   : > { %v1702_v36 = vld [vmem:[%s1993_s15 + $0xb8] sm:$0xff]  ;;  %924 = vmatpush.bf16.msra.mxu1 %v1694_v35  ;;  %v1701_v40 = vld [vmem:[%s1993_s15 + $0xb0] sm:$0xff]  ;;  %v1700_v44 = vld [vmem:[%s1993_s15 + $0xa8] sm:$0xff] }
  0x57   : > { %v1710_v37 = vld [vmem:[%s1993_s15 + $0xf8] sm:$0xff]  ;;  %973 = vmatpush.bf16.msra.mxu2 %v1702_v36  ;;  %v1709_v41 = vld [vmem:[%s1993_s15 + $0xf0] sm:$0xff]  ;;  %v1708_v45 = vld [vmem:[%s1993_s15 + $0xe8] sm:$0xff] }
  0x58   : > { %1022 = vmatpush.bf16.msra.mxu3 %v1710_v37  ;;  %v1683_v46 = vld [vmem:[%s1993_s15 + $0x20] sm:$0xff]  ;;  %v1682_v50 = vld [vmem:[%s1993_s15 + $0x18] sm:$0xff]  ;;  %v1681_v54 = vld [vmem:[%s1993_s15 + $0x10] sm:$0xff] }
  0x59   : > { %876 = vmatpush.bf16.msra.mxu0 %v1685_v38  ;;  %v1691_v47 = vld [vmem:[%s1993_s15 + $0x60] sm:$0xff]  ;;  %v1690_v51 = vld [vmem:[%s1993_s15 + $0x58] sm:$0xff]  ;;  %v1689_v55 = vld [vmem:[%s1993_s15 + $0x50] sm:$0xff] }
  0x5a   : > { %925 = vmatpush.bf16.msra.mxu1 %v1693_v39  ;;  %v1699_v48 = vld [vmem:[%s1993_s15 + $0xa0] sm:$0xff]  ;;  %v1698_v52 = vld [vmem:[%s1993_s15 + $0x98] sm:$0xff]  ;;  %v1697_v56 = vld [vmem:[%s1993_s15 + $0x90] sm:$0xff] }
  0x5b   : > { %974 = vmatpush.bf16.msra.mxu2 %v1701_v40  ;;  %v1707_v49 = vld [vmem:[%s1993_s15 + $0xe0] sm:$0xff]  ;;  %v1706_v53 = vld [vmem:[%s1993_s15 + $0xd8] sm:$0xff]  ;;  %v1705_v57 = vld [vmem:[%s1993_s15 + $0xd0] sm:$0xff] }
  0x5c   : > { %1023 = vmatpush.bf16.msra.mxu3 %v1709_v41  ;;  %v1680_v58 = vld [vmem:[%s1993_s15 + $0x8] sm:$0xff]  ;;  %v1679_v62 = vld [vmem:[%s1993_s15] sm:$0xff]  ;;  %v1649_v3 = vld [vmem:[%s1995_s16 + $0xc] sm:$0xf0] }
  0x5d   : > { %877 = vmatpush.bf16.msra.mxu0 %v1684_v42  ;;  %v1688_v59 = vld [vmem:[%s1993_s15 + $0x48] sm:$0xff]  ;;  %v1687_v63 = vld [vmem:[%s1993_s15 + $0x40] sm:$0xff]  ;;  %v1387_v5 = vld [vmem:[%s1995_s16 + $0x10] sm:$0xf0] }
  0x5e   : > { %926 = vmatpush.bf16.msra.mxu1 %v1692_v43  ;;  %v1696_v60 = vld [vmem:[%s1993_s15 + $0x88] sm:$0xff]  ;;  %v1695_v0 = vld [vmem:[%s1993_s15 + $0x80] sm:$0xff]  ;;  %v1650_v7 = vld [vmem:[%s1995_s16 + $0x14] sm:$0xf0] }
  0x5f   : > { %975 = vmatpush.bf16.msra.mxu2 %v1700_v44  ;;  %v1704_v61 = vld [vmem:[%s1993_s15 + $0xc8] sm:$0xff]  ;;  %v1703_v1 = vld [vmem:[%s1993_s15 + $0xc0] sm:$0xff]  ;;  %v1653_v15 = vld [vmem:[%s1995_s16 + $0x2c] sm:$0xf0] }
  0x60   : > { %1024 = vmatpush.bf16.msra.mxu3 %v1708_v45  ;;  %v1385_v2 = vld [vmem:[%s1995_s16] sm:$0xf]  ;;  %v1647_v4 = vld [vmem:[%s1995_s16 + $0x4] sm:$0xf]  ;;  %v1393_v6 = vld [vmem:[%s1995_s16 + $0x8] sm:$0xf] }
  0x61   : > { %878 = vmatpush.bf16.msra.mxu0 %v1683_v46  ;;  %v1648_v8 = vld [vmem:[%s1995_s16 + $0xc] sm:$0xf]  ;;  %v1395_v9 = vld [vmem:[%s1995_s16 + $0x18] sm:$0xf0]  ;;  %v1386_v10 = vor.u32 %v1649_v3, %v1385_v2  ;;  %v1390_v11 = vor.u32 %v1647_v4, %v1387_v5  ;;  %v1394_v12 = vor.u32 %v1650_v7, %v1393_v6  ;;  %v1401_v14 = vld [vmem:[%s1995_s16 + $0x20] sm:$0xf] }
  0x62   : > { %927 = vmatpush.bf16.msra.mxu1 %v1691_v47  ;;  %v1398_v13 = vor.u32 %v1648_v8, %v1395_v9  ;;  %v1651_v16 = vld [vmem:[%s1995_s16 + $0x24] sm:$0xf]  ;;  %v1403_v17 = vld [vmem:[%s1995_s16 + $0x30] sm:$0xf0]  ;;  %v1409_v18 = vld [vmem:[%s1995_s16 + $0x28] sm:$0xf]  ;;  %v1402_v22 = vor.u32 %v1653_v15, %v1401_v14 }
  0x63   : > { %976 = vmatpush.bf16.msra.mxu2 %v1699_v48  ;;  %v1654_v19 = vld [vmem:[%s1995_s16 + $0x34] sm:$0xf0]  ;;  %v1652_v20 = vld [vmem:[%s1995_s16 + $0x2c] sm:$0xf]  ;;  %v1411_v21 = vld [vmem:[%s1995_s16 + $0x38] sm:$0xf0]  ;;  %v1406_v23 = vor.u32 %v1651_v16, %v1403_v17 }
  0x64   : > { %1025 = vmatpush.bf16.msra.mxu3 %v1707_v49  ;;  %v1410_v24 = vor.u32 %v1654_v19, %v1409_v18  ;;  %v1414_v25 = vor.u32 %v1652_v20, %v1411_v21  ;;  %v1417_v26 = vld [vmem:[%s1995_s16 + $0x40] sm:$0xf]  ;;  %v1657_v27 = vld [vmem:[%s1995_s16 + $0x4c] sm:$0xf0]  ;;  %v1655_v28 = vld [vmem:[%s1995_s16 + $0x44] sm:$0xf] }
  0x65   : > { %879 = vmatpush.bf16.msra.mxu0 %v1682_v50  ;;  %v1419_v29 = vld [vmem:[%s1995_s16 + $0x50] sm:$0xf0]  ;;  %v1425_v30 = vld [vmem:[%s1995_s16 + $0x48] sm:$0xf]  ;;  %v1658_v31 = vld [vmem:[%s1995_s16 + $0x54] sm:$0xf0]  ;;  %v1418_v34 = vor.u32 %v1657_v27, %v1417_v26 }
  0x66   : > { %928 = vmatpush.bf16.msra.mxu1 %v1690_v51  ;;  %v1656_v32 = vld [vmem:[%s1995_s16 + $0x4c] sm:$0xf]  ;;  %v1427_v33 = vld [vmem:[%s1995_s16 + $0x58] sm:$0xf0]  ;;  %v1422_v35 = vor.u32 %v1655_v28, %v1419_v29  ;;  %v1426_v36 = vor.u32 %v1658_v31, %v1425_v30  ;;  %v1433_v38 = vld [vmem:[%s1995_s16 + $0x60] sm:$0xf] }
  0x67   : > { %977 = vmatpush.bf16.msra.mxu2 %v1698_v52  ;;  %v1430_v37 = vor.u32 %v1656_v32, %v1427_v33  ;;  %v1661_v39 = vld [vmem:[%s1995_s16 + $0x6c] sm:$0xf0]  ;;  %v1659_v40 = vld [vmem:[%s1995_s16 + $0x64] sm:$0xf]  ;;  %v1435_v41 = vld [vmem:[%s1995_s16 + $0x70] sm:$0xf0] }
  0x68   : > { %1026 = vmatpush.bf16.msra.mxu3 %v1706_v53  ;;  %v1441_v42 = vld [vmem:[%s1995_s16 + $0x68] sm:$0xf]  ;;  %v1662_v43 = vld [vmem:[%s1995_s16 + $0x74] sm:$0xf0]  ;;  %v1660_v44 = vld [vmem:[%s1995_s16 + $0x6c] sm:$0xf]  ;;  %v1434_v46 = vor.u32 %v1661_v39, %v1433_v38  ;;  %v1438_v47 = vor.u32 %v1659_v40, %v1435_v41 }
  0x69   : > { %880 = vmatpush.bf16.msra.mxu0 %v1681_v54  ;;  %v1443_v45 = vld [vmem:[%s1995_s16 + $0x78] sm:$0xf0]  ;;  %v1442_v48 = vor.u32 %v1662_v43, %v1441_v42  ;;  %v1449_v50 = vld [vmem:[%s1995_s16 + $0x80] sm:$0xf]  ;;  %v1665_v51 = vld [vmem:[%s1995_s16 + $0x8c] sm:$0xf0] }
  0x6a   : > { %929 = vmatpush.bf16.msra.mxu1 %v1689_v55  ;;  %v1446_v49 = vor.u32 %v1660_v44, %v1443_v45  ;;  %v1663_v52 = vld [vmem:[%s1995_s16 + $0x84] sm:$0xf]  ;;  %v1451_v53 = vld [vmem:[%s1995_s16 + $0x90] sm:$0xf0]  ;;  %v1457_v54 = vld [vmem:[%s1995_s16 + $0x88] sm:$0xf] }
  0x6b   : > { %978 = vmatpush.bf16.msra.mxu2 %v1697_v56  ;;  %v1666_v55 = vld [vmem:[%s1995_s16 + $0x94] sm:$0xf0]  ;;  %v1664_v56 = vld [vmem:[%s1995_s16 + $0x8c] sm:$0xf]  ;;  %v1473_v2 = vld [vmem:[%s1995_s16 + $0xa8] sm:$0xf] }
  0x6c   : > { %1027 = vmatpush.bf16.msra.mxu3 %v1705_v57  ;;  %v1459_v57 = vld [vmem:[%s1995_s16 + $0x98] sm:$0xf0]  ;;  %v1670_v3 = vld [vmem:[%s1995_s16 + $0xb4] sm:$0xf0]  ;;  %v1668_v4 = vld [vmem:[%s1995_s16 + $0xac] sm:$0xf] }
  0x6d   : > { %881 = vmatpush.bf16.msra.mxu0 %v1680_v58  ;;  %v1450_v58 = vor.u32 %v1665_v51, %v1449_v50  ;;  %v1475_v5 = vld [vmem:[%s1995_s16 + $0xb8] sm:$0xf0]  ;;  %v1474_v8 = vor.u32 %v1670_v3, %v1473_v2  ;;  %v1489_v14 = vld [vmem:[%s1995_s16 + $0xc8] sm:$0xf]  ;;  %v1674_v15 = vld [vmem:[%s1995_s16 + $0xd4] sm:$0xf0] }
  0x6e   : > { %930 = vmatpush.bf16.msra.mxu1 %v1688_v59  ;;  %v1454_v59 = vor.u32 %v1663_v52, %v1451_v53  ;;  %v1478_v9 = vor.u32 %v1668_v4, %v1475_v5  ;;  %v1672_v16 = vld [vmem:[%s1995_s16 + $0xcc] sm:$0xf]  ;;  %v1491_v17 = vld [vmem:[%s1995_s16 + $0xd8] sm:$0xf0]  ;;  %v1490_v20 = vor.u32 %v1674_v15, %v1489_v14  ;;  %v1505_v26 = vld [vmem:[%s1995_s16 + $0xe8] sm:$0xf] }
  0x6f   : > { %979 = vmatpush.bf16.msra.mxu2 %v1696_v60  ;;  %v1458_v60 = vor.u32 %v1666_v55, %v1457_v54  ;;  %v1494_v21 = vor.u32 %v1672_v16, %v1491_v17  ;;  %v1678_v27 = vld [vmem:[%s1995_s16 + $0xf4] sm:$0xf0]  ;;  %v1676_v28 = vld [vmem:[%s1995_s16 + $0xec] sm:$0xf]  ;;  %v1507_v29 = vld [vmem:[%s1995_s16 + $0xf8] sm:$0xf0] }
  0x70   : > { %1028 = vmatpush.bf16.msra.mxu3 %v1704_v61  ;;  %v1462_v61 = vor.u32 %v1664_v56, %v1459_v57  ;;  %v1506_v32 = vor.u32 %v1678_v27, %v1505_v26  ;;  %v1510_v33 = vor.u32 %v1676_v28, %v1507_v29  ;;  %v411_v42 = vld [vmem:[#allocation2 + $0x30] sm:$0xff]  ;;  %v412_v51 = vld [vmem:[#allocation2] sm:$0xff]  ;;  %v414_v5 = vld [vmem:[#allocation2 + $0x18] sm:$0xff] }
  0x71   : > { %882 = vmatpush.bf16.msra.mxu0 %v1679_v62  ;;  %v1465_v62 = vld [vmem:[%s1995_s16 + $0xa0] sm:$0xf]  ;;  %v415_v14 = vld [vmem:[#allocation2 + $0x50] sm:$0xff] }
  0x72   : > { %931 = vmatpush.bf16.msra.mxu1 %v1687_v63  ;;  %v1669_v63 = vld [vmem:[%s1995_s16 + $0xac] sm:$0xf0] }
  0x73   : > { %980 = vmatpush.bf16.msra.mxu2 %v1695_v0  ;;  %v1667_v0 = vld [vmem:[%s1995_s16 + $0xa4] sm:$0xf]  ;;  %v1466_v6 = vor.u32 %v1669_v63, %v1465_v62 }
  0x74   : > { %1029 = vmatpush.bf16.msra.mxu3 %v1703_v1  ;;  %883 = vmatmul.bf16.vlgmr.msra.gmra.mxu0 %v1386_v10  ;;  %v1467_v1 = vld [vmem:[%s1995_s16 + $0xb0] sm:$0xf0]  ;;  %v1481_v10 = vld [vmem:[%s1995_s16 + $0xc0] sm:$0xf] }
  0x75   : > { %932 = vmatmul.bf16.vlgmr.msra.gmra.mxu1 %v1390_v11  ;;  %v1470_v7 = vor.u32 %v1667_v0, %v1467_v1  ;;  %v1673_v11 = vld [vmem:[%s1995_s16 + $0xcc] sm:$0xf0] }
  0x76   : > { %981 = vmatmul.bf16.vlgmr.msra.gmra.mxu2 %v1394_v12  ;;  %v1671_v12 = vld [vmem:[%s1995_s16 + $0xc4] sm:$0xf]  ;;  %v1482_v18 = vor.u32 %v1673_v11, %v1481_v10 }
  0x77   : > { %1030 = vmatmul.bf16.vlgmr.msra.gmra.mxu3 %v1398_v13  ;;  %v1483_v13 = vld [vmem:[%s1995_s16 + $0xd0] sm:$0xf0] }
  0x78   : > { %v1486_v19 = vor.u32 %v1671_v12, %v1483_v13 }
  0x84   : > { %888 = vmatmul.bf16.gmra.mxu0 %v1402_v22  ;;  %v1497_v22 = vld [vmem:[%s1995_s16 + $0xe0] sm:$0xf] }
  0x85   : > { %937 = vmatmul.bf16.gmra.mxu1 %v1406_v23  ;;  %v1677_v23 = vld [vmem:[%s1995_s16 + $0xec] sm:$0xf0] }
  0x86   : > { %986 = vmatmul.bf16.gmra.mxu2 %v1410_v24  ;;  %v1675_v24 = vld [vmem:[%s1995_s16 + $0xe4] sm:$0xf]  ;;  %v1498_v30 = vor.u32 %v1677_v23, %v1497_v22 }
  0x87   : > { %1035 = vmatmul.bf16.gmra.mxu3 %v1414_v25  ;;  %v1499_v25 = vld [vmem:[%s1995_s16 + $0xf0] sm:$0xf0]  ;;  %v416_v23 = vld [vmem:[#allocation2 + $0x68] sm:$0xff] }
  0x88   : > { %v1502_v31 = vor.u32 %v1675_v24, %v1499_v25 }
  0x94   : > { %893 = vmatmul.bf16.gmra.mxu0 %v1418_v34 }
  0x95   : > { %942 = vmatmul.bf16.gmra.mxu1 %v1422_v35 }
  0x96   : > { %991 = vmatmul.bf16.gmra.mxu2 %v1426_v36 }
  0x97   : > { %1040 = vmatmul.bf16.gmra.mxu3 %v1430_v37 }
  0xa4   : > { %898 = vmatmul.bf16.gmra.mxu0 %v1434_v46 }
  0xa5   : > { %947 = vmatmul.bf16.gmra.mxu1 %v1438_v47 }
  0xa6   : > { %996 = vmatmul.bf16.gmra.mxu2 %v1442_v48 }
  0xa7   : > { %1045 = vmatmul.bf16.gmra.mxu3 %v1446_v49 }
  0xb4   : > { %903 = vmatmul.bf16.gmra.mxu0 %v1450_v58 }
  0xb5   : > { %952 = vmatmul.bf16.gmra.mxu1 %v1454_v59 }
  0xb6   : > { %1001 = vmatmul.bf16.gmra.mxu2 %v1458_v60  ;;  %v413_v60 = vld [vmem:[#allocation2 + $0x58] sm:$0xff] }
  0xb7   : > { %1050 = vmatmul.bf16.gmra.mxu3 %v1462_v61 }
  0xc4   : > { %908 = vmatmul.bf16.gmra.mxu0 %v1466_v6 }
  0xc5   : > { %957 = vmatmul.bf16.gmra.mxu1 %v1470_v7 }
  0xc6   : > { %1006 = vmatmul.bf16.gmra.mxu2 %v1474_v8 }
  0xc7   : > { %1055 = vmatmul.bf16.gmra.mxu3 %v1478_v9 }
  0xd4   : > { %913 = vmatmul.bf16.gmra.mxu0 %v1482_v18 }
  0xd5   : > { %962 = vmatmul.bf16.gmra.mxu1 %v1486_v19 }
  0xd6   : > { %1011 = vmatmul.bf16.gmra.mxu2 %v1490_v20 }
  0xd7   : > { %1060 = vmatmul.bf16.gmra.mxu3 %v1494_v21 }
  0xe4   : > { %918 = vmatmul.bf16.gmra.mxu0 %v1498_v30 }
  0xe5   : > { %967 = vmatmul.bf16.gmra.mxu1 %v1502_v31 }
  0xe6   : > { %1016 = vmatmul.bf16.gmra.mxu2 %v1506_v32  ;;  %v417_v32 = vld [vmem:[#allocation2 + $0x8] sm:$0xff] }
  0xe7   : > { %1065 = vmatmul.bf16.gmra.mxu3 %v1510_v33 }
  0xf1   : > { %v884_v34 = vpop.f32.mrf.mxu0 }
  0xf2   : > { %v933_v35 = vpop.f32.mrf.mxu1 }
  0xf3   : > { %v934_v36 = vadd.f32 %v933_v35, %v884_v34 }
  0xf9   : > { %v982_v37 = vpop.f32.mrf.mxu2  ;;  %v886_v40 = vpop.f32.mrf.mxu0 }
  0xfa   : > { %v1031_v38 = vpop.f32.mrf.mxu3  ;;  %v983_v39 = vadd.f32 %v982_v37, %v934_v36  ;;  %v935_v41 = vpop.f32.mrf.mxu1 }
  0xfb   : > { %v936_v45 = vadd.f32 %v935_v41, %v886_v40  ;;  %v418_v41 = vld [vmem:[#allocation2 + $0x48] sm:$0xff] }
  0xfc   : > { %v1032_v43 = vadd.f32 %v1031_v38, %v983_v39 }
  0xfe   : > { %v1071_v44 = vadd.f32 %v1032_v43, %v411_v42 }
 0x100   : > { %1087 = vst [vmem:[#allocation2 + $0x30] sm:$0xff] %v1071_v44 }
 0x101   : > { %v984_v46 = vpop.f32.mrf.mxu2  ;;  %v889_v49 = vpop.f32.mrf.mxu0 }
 0x102   : > { %v1033_v47 = vpop.f32.mrf.mxu3  ;;  %v985_v48 = vadd.f32 %v984_v46, %v936_v45  ;;  %v938_v50 = vpop.f32.mrf.mxu1 }
 0x103   : > { %v939_v54 = vadd.f32 %v938_v50, %v889_v49  ;;  %v419_v50 = vld [vmem:[#allocation2 + $0x40] sm:$0xff] }
 0x104   : > { %v1034_v52 = vadd.f32 %v1033_v47, %v985_v48 }
 0x106   : > { %v1072_v53 = vadd.f32 %v1034_v52, %v412_v51 }
 0x108   : > { %1088 = vst [vmem:[#allocation2] sm:$0xff] %v1072_v53 }
 0x109   : > { %v987_v55 = vpop.f32.mrf.mxu2  ;;  %v891_v58 = vpop.f32.mrf.mxu0 }
 0x10a   : > { %v1036_v56 = vpop.f32.mrf.mxu3  ;;  %v988_v57 = vadd.f32 %v987_v55, %v939_v54  ;;  %v940_v59 = vpop.f32.mrf.mxu1 }
 0x10b   : > { %v941_v63 = vadd.f32 %v940_v59, %v891_v58  ;;  %v420_v59 = vld [vmem:[#allocation2 + $0x20] sm:$0xff] }
 0x10c   : > { %v1037_v61 = vadd.f32 %v1036_v56, %v988_v57 }
 0x10e   : > { %v1073_v62 = vadd.f32 %v1037_v61, %v413_v60 }
 0x110   : > { %1089 = vst [vmem:[#allocation2 + $0x58] sm:$0xff] %v1073_v62 }
 0x111   : > { %v989_v0 = vpop.f32.mrf.mxu2  ;;  %v894_v3 = vpop.f32.mrf.mxu0 }
 0x112   : > { %v1038_v1 = vpop.f32.mrf.mxu3  ;;  %v990_v2 = vadd.f32 %v989_v0, %v941_v63  ;;  %v943_v4 = vpop.f32.mrf.mxu1 }
 0x113   : > { %v944_v8 = vadd.f32 %v943_v4, %v894_v3  ;;  %v421_v4 = vld [vmem:[#allocation2 + $0x10] sm:$0xff] }
 0x114   : > { %v1039_v6 = vadd.f32 %v1038_v1, %v990_v2 }
 0x116   : > { %v1074_v7 = vadd.f32 %v1039_v6, %v414_v5 }
 0x118   : > { %1090 = vst [vmem:[#allocation2 + $0x18] sm:$0xff] %v1074_v7 }
 0x119   : > { %v992_v9 = vpop.f32.mrf.mxu2  ;;  %v896_v12 = vpop.f32.mrf.mxu0 }
 0x11a   : > { %v1041_v10 = vpop.f32.mrf.mxu3  ;;  %v993_v11 = vadd.f32 %v992_v9, %v944_v8  ;;  %v945_v13 = vpop.f32.mrf.mxu1 }
 0x11b   : > { %v946_v17 = vadd.f32 %v945_v13, %v896_v12  ;;  %v422_v13 = vld [vmem:[#allocation2 + $0x38] sm:$0xff] }
 0x11c   : > { %v1042_v15 = vadd.f32 %v1041_v10, %v993_v11 }
 0x11e   : > { %v1075_v16 = vadd.f32 %v1042_v15, %v415_v14 }
 0x120   : > { %1091 = vst [vmem:[#allocation2 + $0x50] sm:$0xff] %v1075_v16 }
 0x121   : > { %v994_v18 = vpop.f32.mrf.mxu2  ;;  %v899_v21 = vpop.f32.mrf.mxu0 }
 0x122   : > { %v1043_v19 = vpop.f32.mrf.mxu3  ;;  %v995_v20 = vadd.f32 %v994_v18, %v946_v17  ;;  %v948_v22 = vpop.f32.mrf.mxu1 }
 0x123   : > { %v949_v26 = vadd.f32 %v948_v22, %v899_v21  ;;  %v423_v22 = vld [vmem:[#allocation2 + $0x60] sm:$0xff] }
 0x124   : > { %v1044_v24 = vadd.f32 %v1043_v19, %v995_v20 }
 0x126   : > { %v1076_v25 = vadd.f32 %v1044_v24, %v416_v23 }
 0x128   : > { %1092 = vst [vmem:[#allocation2 + $0x68] sm:$0xff] %v1076_v25 }
 0x129   : > { %v997_v27 = vpop.f32.mrf.mxu2  ;;  %v901_v30 = vpop.f32.mrf.mxu0 }
 0x12a   : > { %v1046_v28 = vpop.f32.mrf.mxu3  ;;  %v998_v29 = vadd.f32 %v997_v27, %v949_v26  ;;  %v950_v31 = vpop.f32.mrf.mxu1 }
 0x12b   : > { %v951_v35 = vadd.f32 %v950_v31, %v901_v30 }
 0x12c   : > { %v1047_v33 = vadd.f32 %v1046_v28, %v998_v29  ;;  %v424_v29 = vld [vmem:[#allocation2 + $0x70] sm:$0xff] }
 0x12e   : > { %v1077_v34 = vadd.f32 %v1047_v33, %v417_v32 }
 0x130   : > { %1093 = vst [vmem:[#allocation2 + $0x8] sm:$0xff] %v1077_v34 }
 0x131   : > { %v999_v36 = vpop.f32.mrf.mxu2  ;;  %v904_v39 = vpop.f32.mrf.mxu0 }
 0x132   : > { %v1048_v37 = vpop.f32.mrf.mxu3  ;;  %v1000_v38 = vadd.f32 %v999_v36, %v951_v35  ;;  %v953_v40 = vpop.f32.mrf.mxu1 }
 0x133   : > { %v954_v44 = vadd.f32 %v953_v40, %v904_v39 }
 0x134   : > { %v1049_v42 = vadd.f32 %v1048_v37, %v1000_v38  ;;  %v425_v38 = vld [vmem:[#allocation2 + $0x78] sm:$0xff] }
 0x136   : > { %v1078_v43 = vadd.f32 %v1049_v42, %v418_v41 }
 0x138   : > { %1094 = vst [vmem:[#allocation2 + $0x48] sm:$0xff] %v1078_v43 }
 0x139   : > { %v1002_v45 = vpop.f32.mrf.mxu2  ;;  %v906_v48 = vpop.f32.mrf.mxu0 }
 0x13a   : > { %v1051_v46 = vpop.f32.mrf.mxu3  ;;  %v1003_v47 = vadd.f32 %v1002_v45, %v954_v44  ;;  %v955_v49 = vpop.f32.mrf.mxu1 }
 0x13b   : > { %v956_v53 = vadd.f32 %v955_v49, %v906_v48 }
 0x13c   : > { %v1052_v51 = vadd.f32 %v1051_v46, %v1003_v47  ;;  %v426_v46 = vld [vmem:[#allocation2 + $0x28] sm:$0xff] }
 0x13e   : > { %v1079_v52 = vadd.f32 %v1052_v51, %v419_v50 }
 0x140   : > { %1095 = vst [vmem:[#allocation2 + $0x40] sm:$0xff] %v1079_v52 }
 0x141   : > { %v1004_v54 = vpop.f32.mrf.mxu2  ;;  %v909_v57 = vpop.f32.mrf.mxu0 }
 0x142   : > { %v1053_v55 = vpop.f32.mrf.mxu3  ;;  %v1005_v56 = vadd.f32 %v1004_v54, %v956_v53  ;;  %v958_v58 = vpop.f32.mrf.mxu1 }
 0x143   : > { %v959_v62 = vadd.f32 %v958_v58, %v909_v57 }
 0x144   : > { %v1054_v60 = vadd.f32 %v1053_v55, %v1005_v56 }
 0x146   : > { %v1080_v61 = vadd.f32 %v1054_v60, %v420_v59 }
 0x148   : > { %1096 = vst [vmem:[#allocation2 + $0x20] sm:$0xff] %v1080_v61 }
 0x149   : > { %v1007_v63 = vpop.f32.mrf.mxu2  ;;  %v911_v2 = vpop.f32.mrf.mxu0 }
 0x14a   : > { %v1056_v0 = vpop.f32.mrf.mxu3  ;;  %v1008_v1 = vadd.f32 %v1007_v63, %v959_v62  ;;  %v960_v3 = vpop.f32.mrf.mxu1 }
 0x14b   : > { %v961_v7 = vadd.f32 %v960_v3, %v911_v2 }
 0x14c   : > { %v1057_v5 = vadd.f32 %v1056_v0, %v1008_v1 }
 0x14e   : > { %v1081_v6 = vadd.f32 %v1057_v5, %v421_v4 }
 0x150   : > { %1097 = vst [vmem:[#allocation2 + $0x10] sm:$0xff] %v1081_v6 }
 0x151   : > { %v1009_v8 = vpop.f32.mrf.mxu2  ;;  %v914_v11 = vpop.f32.mrf.mxu0 }
 0x152   : > { %v1058_v9 = vpop.f32.mrf.mxu3  ;;  %v1010_v10 = vadd.f32 %v1009_v8, %v961_v7  ;;  %v963_v12 = vpop.f32.mrf.mxu1 }
 0x153   : > { %v964_v16 = vadd.f32 %v963_v12, %v914_v11 }
 0x154   : > { %v1059_v14 = vadd.f32 %v1058_v9, %v1010_v10 }
 0x156   : > { %v1082_v15 = vadd.f32 %v1059_v14, %v422_v13 }
 0x158   : > { %1098 = vst [vmem:[#allocation2 + $0x38] sm:$0xff] %v1082_v15 }
 0x159   : > { %v1012_v17 = vpop.f32.mrf.mxu2  ;;  %v916_v20 = vpop.f32.mrf.mxu0 }
 0x15a   : > { %v1061_v18 = vpop.f32.mrf.mxu3  ;;  %v1013_v19 = vadd.f32 %v1012_v17, %v964_v16  ;;  %v965_v21 = vpop.f32.mrf.mxu1 }
 0x15b   : > { %v966_v25 = vadd.f32 %v965_v21, %v916_v20 }
 0x15c   : > { %v1062_v23 = vadd.f32 %v1061_v18, %v1013_v19 }
 0x15e   : > { %v1083_v24 = vadd.f32 %v1062_v23, %v423_v22 }
 0x160   : > { %1099 = vst [vmem:[#allocation2 + $0x60] sm:$0xff] %v1083_v24 }
 0x161   : > { %v1014_v26 = vpop.f32.mrf.mxu2  ;;  %v919_v30 = vpop.f32.mrf.mxu0 }
 0x162   : > { %v1063_v27 = vpop.f32.mrf.mxu3  ;;  %v1015_v28 = vadd.f32 %v1014_v26, %v966_v25  ;;  %v968_v31 = vpop.f32.mrf.mxu1 }
 0x163   : > { %v969_v34 = vadd.f32 %v968_v31, %v919_v30 }
 0x164   : > { %v1064_v32 = vadd.f32 %v1063_v27, %v1015_v28 }
 0x166   : > { %v1084_v33 = vadd.f32 %v1064_v32, %v424_v29 }
 0x168   : > { %1100 = vst [vmem:[#allocation2 + $0x70] sm:$0xff] %v1084_v33 }
 0x169   : > { %v1017_v35 = vpop.f32.mrf.mxu2  ;;  %v921_v40 = vpop.f32.mrf.mxu0 }
 0x16a   : > { %v1066_v36 = vpop.f32.mrf.mxu3  ;;  %v1018_v37 = vadd.f32 %v1017_v35, %v969_v34  ;;  %v970_v41 = vpop.f32.mrf.mxu1 }
 0x16b   : > { %v971_v43 = vadd.f32 %v970_v41, %v921_v40 }
 0x16c   : > { %v1067_v39 = vadd.f32 %v1066_v36, %v1018_v37 }
 0x16e   : > { %v1085_v42 = vadd.f32 %v1067_v39, %v425_v38 }
 0x170   : > { %1101 = vst [vmem:[#allocation2 + $0x78] sm:$0xff] %v1085_v42 }
 0x171   : > { %v1019_v44 = vpop.f32.mrf.mxu2 }
 0x172   : > { %v1020_v45 = vadd.f32 %v1019_v44, %v971_v43  ;;  %v1068_v47 = vpop.f32.mrf.mxu3 }
 0x174   : > { %v1069_v48 = vadd.f32 %v1068_v47, %v1020_v45  ;;  %1106 = sbr.rel (%p1639_p13) target bundleno = 425 (0x1a9), region = 67 }
 0x176   : > { %v1086_v49 = vadd.f32 %v1069_v48, %v426_v46 }
 0x178   : > { %1102 = vst [vmem:[#allocation2 + $0x28] sm:$0xff] %v1086_v49 }
 0x179   : > { %v1107_v50 = vld [vmem:[#allocation2 + $0x30] sm:$0xff]  ;;  %v1108_v51 = vld [vmem:[#allocation2] sm:$0xff]  ;;  %v1109_v52 = vld [vmem:[#allocation2 + $0x58] sm:$0xff] }
 0x17a   : > { %v1110_v53 = vld [vmem:[#allocation2 + $0x18] sm:$0xff]  ;;  %v1124_v54 = vadd.f32 %v1108_v51, %v1107_v50  ;;  %v1148_v55 = vmul.f32 %v1107_v50, %v1107_v50  ;;  %v1149_v56 = vmul.f32 %v1108_v51, %v1108_v51  ;;  %v1150_v57 = vmul.f32 %v1109_v52, %v1109_v52  ;;  %v1111_v58 = vld [vmem:[#allocation2 + $0x50] sm:$0xff]  ;;  %v1112_v62 = vld [vmem:[#allocation2 + $0x68] sm:$0xff] }
 0x17b   : > { %v1151_v60 = vmul.f32 %v1110_v53, %v1110_v53  ;;  %v1152_v0 = vmul.f32 %v1111_v58, %v1111_v58  ;;  %v1113_v2 = vld [vmem:[#allocation2 + $0x8] sm:$0xff]  ;;  %v1115_v5 = vld [vmem:[#allocation2 + $0x40] sm:$0xff]  ;;  %v1117_v7 = vld [vmem:[#allocation2 + $0x10] sm:$0xff]  ;;  %v1153_v8 = vmul.f32 %v1112_v62, %v1112_v62 }
 0x17c   : > { %v1125_v59 = vadd.f32 %v1124_v54, %v1109_v52  ;;  %v1164_v61 = vadd.f32 %v1149_v56, %v1148_v55  ;;  %v1114_v3 = vld [vmem:[#allocation2 + $0x48] sm:$0xff]  ;;  %v1116_v6 = vld [vmem:[#allocation2 + $0x20] sm:$0xff]  ;;  %v1154_v11 = vmul.f32 %v1113_v2, %v1113_v2  ;;  %v1156_v16 = vmul.f32 %v1115_v5, %v1115_v5  ;;  %v1118_v35 = vld [vmem:[#allocation2 + $0x38] sm:$0xff] }
 0x17d   : > { %v1155_v12 = vmul.f32 %v1114_v3, %v1114_v3  ;;  %v1801_v14 = vld [vmem:[%s2150_s2] ss:$0 sm:$0xff]  ;;  %v1157_v17 = vmul.f32 %v1116_v6, %v1116_v6  ;;  %v1158_v18 = vmul.f32 %v1117_v7, %v1117_v7  ;;  %v1120_v37 = vld [vmem:[#allocation2 + $0x70] sm:$0xff]  ;;  %v1121_v42 = vld [vmem:[#allocation2 + $0x78] sm:$0xff]  ;;  %v1159_v55 = vmul.f32 %v1118_v35, %v1118_v35 }
 0x17e   : > { %v1126_v63 = vadd.f32 %v1125_v59, %v1110_v53  ;;  %v1165_v1 = vadd.f32 %v1164_v61, %v1150_v57  ;;  %v1191_v20 = vadd.f32 %v1801_v14, %v1107_v50  ;;  %v1192_v21 = vadd.f32 %v1801_v14, %v1108_v51  ;;  %v1119_v36 = vld [vmem:[#allocation2 + $0x60] sm:$0xff] }
 0x17f   : > { %v1193_v22 = vadd.f32 %v1801_v14, %v1109_v52  ;;  %v1194_v24 = vadd.f32 %v1801_v14, %v1110_v53  ;;  %v1195_v25 = vadd.f32 %v1801_v14, %v1111_v58  ;;  %v1196_v26 = vadd.f32 %v1801_v14, %v1112_v62  ;;  %v1122_v43 = vld [vmem:[#allocation2 + $0x28] sm:$0xff] }
 0x180   : > { %v1127_v4 = vadd.f32 %v1126_v63, %v1111_v58  ;;  %v1166_v9 = vadd.f32 %v1165_v1, %v1151_v60  ;;  %v1715_v28 = vpack.c.bf16 %v1192_v21, %v1191_v20  ;;  %v1197_v29 = vadd.f32 %v1801_v14, %v1113_v2 }
 0x181   : > { %v1198_v30 = vadd.f32 %v1801_v14, %v1114_v3  ;;  %v1720_v32 = vpack.c.bf16 %v1194_v24, %v1193_v22  ;;  %v1725_v33 = vpack.c.bf16 %v1196_v26, %v1195_v25  ;;  %v1199_v34 = vadd.f32 %v1801_v14, %v1115_v5  ;;  %v1147_v22 = vld [vmem:[#allocation4] sm:$0x1] }
 0x182   : > { %v1128_v10 = vadd.f32 %v1127_v4, %v1112_v62  ;;  %v1167_v13 = vadd.f32 %v1166_v9, %v1152_v0  ;;  %1716 = vst [vmem:[%s2151_s3] sm:$0xff] %v1715_v28   ;;  %v1200_v40 = vadd.f32 %v1801_v14, %v1116_v6  ;;  %v1201_v41 = vadd.f32 %v1801_v14, %v1117_v7 }
 0x183   : > { %v1730_v39 = vpack.c.bf16 %v1198_v30, %v1197_v29  ;;  %1752 = vst [vmem:[%s2151_s3 + $0x8] sm:$0xff] %v1720_v32   ;;  %v1202_v45 = vadd.f32 %v1801_v14, %v1118_v35  ;;  %v1203_v46 = vadd.f32 %v1801_v14, %v1119_v36  ;;  %v1204_v47 = vadd.f32 %v1801_v14, %v1120_v37 }
 0x184   : > { %v1129_v15 = vadd.f32 %v1128_v10, %v1113_v2  ;;  %v1168_v19 = vadd.f32 %v1167_v13, %v1153_v8  ;;  %1753 = vst [vmem:[%s2151_s3 + $0x10] sm:$0xff] %v1725_v33   ;;  %v1735_v49 = vpack.c.bf16 %v1200_v40, %v1199_v34  ;;  %v1205_v50 = vadd.f32 %v1801_v14, %v1121_v42 }
 0x185   : > { %v1206_v51 = vadd.f32 %v1801_v14, %v1122_v43  ;;  %1754 = vst [vmem:[%s2151_s3 + $0x18] sm:$0xff] %v1730_v39   ;;  %v1740_v53 = vpack.c.bf16 %v1202_v45, %v1201_v41  ;;  %v1745_v54 = vpack.c.bf16 %v1204_v47, %v1203_v46  ;;  %v1160_v59 = vmul.f32 %v1119_v36, %v1119_v36 }
 0x186   : > { %v1130_v23 = vadd.f32 %v1129_v15, %v1114_v3  ;;  %v1169_v27 = vadd.f32 %v1168_v19, %v1154_v11  ;;  %1755 = vst [vmem:[%s2151_s3 + $0x20] sm:$0xff] %v1735_v49   ;;  %v1161_v62 = vmul.f32 %v1120_v37, %v1120_v37  ;;  %v1162_v1 = vmul.f32 %v1121_v42, %v1121_v42 }
 0x187   : > { %v1750_v57 = vpack.c.bf16 %v1206_v51, %v1205_v50  ;;  %1756 = vst [vmem:[%s2151_s3 + $0x28] sm:$0xff] %v1740_v53   ;;  %v1163_v4 = vmul.f32 %v1122_v43, %v1122_v43 }
 0x188   : > { %v1131_v31 = vadd.f32 %v1130_v23, %v1115_v5  ;;  %v1170_v38 = vadd.f32 %v1169_v27, %v1155_v12  ;;  %1757 = vst [vmem:[%s2151_s3 + $0x30] sm:$0xff] %v1745_v54  }
 0x189   : > { %1758 = vst [vmem:[%s2151_s3 + $0x38] sm:$0xff] %v1750_v57  }
 0x18a   : > { %v1132_v44 = vadd.f32 %v1131_v31, %v1116_v6  ;;  %v1171_v48 = vadd.f32 %v1170_v38, %v1156_v16 }
 0x18c   : > { %v1133_v52 = vadd.f32 %v1132_v44, %v1117_v7  ;;  %v1172_v56 = vadd.f32 %v1171_v48, %v1157_v17  ;;  %v1123_v17 = vld [vmem:[#allocation3] sm:$0x1] }
 0x18e   : > { %v1134_v58 = vadd.f32 %v1133_v52, %v1118_v35  ;;  %v1173_v60 = vadd.f32 %v1172_v56, %v1158_v18 }
 0x190   : > { %v1135_v61 = vadd.f32 %v1134_v58, %v1119_v36  ;;  %v1174_v63 = vadd.f32 %v1173_v60, %v1159_v55 }
 0x192   : > { %v1136_v0 = vadd.f32 %v1135_v61, %v1120_v37  ;;  %v1175_v2 = vadd.f32 %v1174_v63, %v1160_v59 }
 0x194   : > { %v1137_v3 = vadd.f32 %v1136_v0, %v1121_v42  ;;  %v1176_v5 = vadd.f32 %v1175_v2, %v1161_v62 }
 0x196   : > { %v1138_v6 = vadd.f32 %v1137_v3, %v1122_v43  ;;  %v1177_v7 = vadd.f32 %v1176_v5, %v1162_v1 }
 0x198   : > { %v1139_v8 = vrot.slane %v1138_v6, 4  ;;  %v1178_v9 = vadd.f32 %v1177_v7, %v1163_v4 }
 0x19a   : > { %v1140_v10 = vadd.f32 %v1139_v8, %v1138_v6  ;;  %v1179_v11 = vrot.slane %v1178_v9, 4 }
 0x19c   : > { %v1141_v12 = vrot.slane %v1140_v10, 2  ;;  %v1180_v13 = vadd.f32 %v1179_v11, %v1178_v9 }
 0x19e   : > { %v1142_v14 = vadd.f32 %v1141_v12, %v1140_v10  ;;  %v1181_v15 = vrot.slane %v1180_v13, 2 }
 0x1a0   : > { %v1143_v16 = vrot.slane %v1142_v14, 1  ;;  %v1182_v18 = vadd.f32 %v1181_v15, %v1180_v13 }
 0x1a2   : > { %v1144_v19 = vadd.f32 %v1143_v16, %v1142_v14  ;;  %v1183_v20 = vrot.slane %v1182_v18, 1 }
 0x1a4   : > { %v1145_v21 = vadd.f32 %v1144_v19, %v1123_v17  ;;  %v1184_v23 = vadd.f32 %v1183_v20, %v1182_v18 }
 0x1a6   : > { %1146 = vst [vmem:[#allocation3] sm:$0x1] %v1145_v21  ;;  %v1185_v24 = vadd.f32 %v1184_v23, %v1147_v22 }
 0x1a8   : > { %1186 = vst [vmem:[#allocation4] sm:$0x1] %v1185_v24 }
 0x1a9 PF: > { %1242 = sbr.rel (!%p1103_p12) target bundleno = 433 (0x1b1), region = 71 }
 0x1ad   : > { %v1243_v25 = vld [vmem:[#allocation3] sm:$0x1] (%p1103_p12) }
 0x1ae   : > { %1244 = vst [vmem:[%s2152_s4] sm:$0x1] %v1243_v25 }
 0x1af   : > { %v1245_v26 = vld [vmem:[#allocation4] sm:$0x1] }
 0x1b0   : > { %1246 = vst [vmem:[%s2153_s5] sm:$0x1] %v1245_v26 }
 0x1b1 PF: > { %s16_s22 = sadd.s32 1, %s1840_s22   ;;  %s2154_s18 = smov %s1828_s19 }
 0x1b2   : > { %p13_p0 = scmp.ge.s32.totalorder %s16_s22, 9   ;;  %s2155_s19 = smov %s1909_s26 }
 0x1b3   : > { %s2156_s20 = smov %s1836_s21  ;;  %s2157_s21 = smov %s2159_s23 }
 0x1b4   :  { %15 = sbr.rel (!%p13_p0) target bundleno = 3 (0x3), region = 128 }

// kernel: preact_basic_forward.9
= control target key start
LH: loop header
LB: loop body
LE: loop exit
PB: predicated region body
PF: predicated region fallthrough
CT: control target
= control target key end

     0   :  { %s2172_s0 = inlined_call_operand.vmem [shape: bf16[128,3584], index: 0, kind: input, shape index: {}]   ;;  %s2173_s1 = inlined_call_operand.vmem [shape: bf16[3584,128], index: 1, kind: input, shape index: {}]   ;;  %s2174_s2 = inlined_call_operand.vmem [shape: f32[1,128], index: 2, kind: input, shape index: {}]   ;;  %s2175_s3 = inlined_call_operand.vmem [shape: bf16[128,128], index: 3, kind: input, shape index: {}]   ;;  %s2176_s4 = inlined_call_operand.vmem [shape: bf16[128,128], index: 4, kind: input, shape index: {}]   ;;  %s2177_s5 = inlined_call_operand.vmem [shape: f32[1,128], index: 5, kind: input, shape index: {}]   ;;  %s2178_s6 = inlined_call_operand.hbm [shape: f32[128,128], index: 6, kind: output, shape index: {}]  }
   0x1   :  { %2184 = sst [smem:[#allocation11_spill]] %s2172_s0 }
   0x2   :  { %11 = vsyncpa [#allocation5], 0 }
   0x3   :  { %13 = vsyncpa [#allocation5 + $0x1], 0  ;;  %s1874_s21 = smov 0   ;;  %s1876_s22 = smov 0  }
   0x4   :  { %s1878_s23 = smov 0   ;;  %s1880_s24 = smov 0  }
   0x5   :  { %s1882_s25 = smov 0   ;;  %s1884_s26 = smov 0  }
   0x6   :  { %s1886_s27 = smov 0   ;;  %s1888_s28 = smov 0  }
   0x7   :  { %s1890_s29 = smov 0   ;;  %s1892_s30 = smov 0  }
   0x8 LB: > { %2185 = sst [smem:[#allocation7_spill]] %s1826_s28  ;;  %s1280_s7 = sadd.s32 4294967295, %s1834_s30   ;;  %s1834_s30 = sphi %s1892_s30, %s19_s30   ;;  %s1830_s29 = sphi %s1890_s29, %s2197_s29   ;;  %s1826_s28 = sphi %s1888_s28, %s2196_s28   ;;  %s1822_s27 = sphi %s1886_s27, %s2195_s27   ;;  %s1818_s26 = sphi %s1884_s26, %s2194_s26   ;;  %s1814_s25 = sphi %s1882_s25, %s2202_s25   ;;  %s1810_s24 = sphi %s1880_s24, %s2201_s24   ;;  %s1806_s23 = sphi %s1878_s23, %s2200_s23   ;;  %s1802_s22 = sphi %s1876_s22, %s2199_s22   ;;  %s1798_s21 = sphi %s1874_s21, %s2198_s21  }
   0x9   : > { %2186 = sst [smem:[#allocation8_spill]] %s1830_s29  ;;  %s1281_s8 = sadd.s32 4294967294, %s1834_s30  }
   0xa   : > { %s31_s9 = sadd.s32 1, %s1826_s28  ;;  %s38_s10 = sadd.s32 1, %s1830_s29 }
   0xb   : > { %p32_p0 = scmp.ge.s32.totalorder %s31_s9, 7  ;;  %s47_s11 = sadd.s32 1, %s1814_s25 }
   0xc   : > { %p54_p1 = scmp.ne.s32.totalorder %s1814_s25, %s1810_s24  ;;  %p55_p2 = scmp.eq.s32.totalorder %s1834_s30, 0 }
   0xd   : > { %s2204_s9 = smov (%p32_p0, %s31_s9), 0  ;;  %s2206_s10 = smov (!%p32_p0, %s38_s10), %s1830_s29 }
   0xe   : > { %2187 = sst [smem:[#allocation9_spill]] %s2204_s9  ;;  %s43_s12 = ssub.s32 %s1826_s28, %s2204_s9 }
   0xf   : > { %p1937_p3 = por %p55_p2, %p54_p1  ;;  %p40_p4 = scmp.ge.s32.totalorder %s2206_s10, 2 }
  0x10   : > { %s207_s14 = sadd.s32 1, %s1806_s23  ;;  %p217_p5 = scmp.ne.s32.totalorder %s1806_s23, %s1802_s22 }
  0x11   : > { %p218_p6 = scmp.eq.s32.totalorder %s1280_s7, 13  ;;  %s2208_s10 = smov (%p40_p4, %s2206_s10), 0 }
  0x12   : > { %2189 = sst [smem:[#allocation10_spill]] %s2208_s10  ;;  %p223_p8 = scmp.ne.s32.totalorder %s1802_s22, %s1798_s21 }
  0x13   : > { %p1946_p7 = por %p218_p6, %p217_p5  ;;  %s42_s16 = ssub.s32 %s1830_s29, %s2208_s10 }
  0x14   : > { %p224_p9 = scmp.eq.s32.totalorder %s1281_s8, 13  ;;  %s44_s17 = sor.u32 %s43_s12, %s42_s16 }
  0x15   : > { %p205_p10 = scmp.eq.s32.totalorder %s42_s16, 0  ;;  %p45_p11 = scmp.eq.s32.totalorder %s44_s17, 0 }
  0x16   : > { %p1954_p12 = por %p224_p9, %p223_p8  ;;  %p1286_p13 = scmp.ge.s32.totalorder %s1834_s30, 14 }
  0x17   : > { %s1959_s19 = scalar_select %p205_p10, %s1806_s23, %s207_s14  }
  0x18   : > { %s1962_s20 = scalar_select %p45_p11, %s1814_s25, %s47_s11  }
  0x19   : > { %259 = sbr.rel (%p1286_p13) target bundleno = 56 (0x38), region = 28 }
  0x1e   : > { %262 = sbr.rel (!%p1937_p3) target bundleno = 56 (0x38), region = 32  ;;  %s264_s7 = sand.u32 (%p1937_p3), 1, %s1814_s25  }
  0x1f   : > { %s1289_s8 = sshll.u32 (%p1937_p3), %s1826_s28, 2  ;;  %s1287_s12 = sshll.u32 (%p1937_p3), %s264_s7, 7 }
  0x20   : > { %s1631_s16 = smul.u32 (%p1937_p3), 224, %s1830_s29  ;;  %s2192_s0 = sld [smem:[#allocation11_spill]] (%p1937_p3) }
  0x21   : > { %s266_s13 = scalar_lea.vmem (%p1937_p3), [#allocation3], %s1287_s12 }
  0x22   : > { %s270_s17 = sadd.s32 (%p1937_p3), %s1631_s16, %s1289_s8 }
  0x23   : > { %s1291_s10 = sshll.u32 %s270_s17, 2 }
  0x26   : > { %s1973_s11 = scalar_lea.vmem %s2192_s0, %s1291_s10 }
  0x27   : > { %v285_v0 = vld [vmem:[%s1973_s11] sm:$0xff]  ;;  %v287_v1 = vld [vmem:[%s1973_s11 + $0x8] sm:$0xff]  ;;  %v289_v2 = vld [vmem:[%s1973_s11 + $0x70] sm:$0xff] }
  0x28   : > { %286 = vst [vmem:[%s266_s13] sm:$0xff] %v285_v0  ;;  %v291_v3 = vld [vmem:[%s1973_s11 + $0x78] sm:$0xff]  ;;  %v293_v4 = vld [vmem:[%s1973_s11 + $0xe0] sm:$0xff]  ;;  %v295_v5 = vld [vmem:[%s1973_s11 + $0xe8] sm:$0xff] }
  0x29   : > { %288 = vst [vmem:[%s266_s13 + $0x8] sm:$0xff] %v287_v1  ;;  %v297_v6 = vld [vmem:[%s1973_s11 + $0x150] sm:$0xff]  ;;  %v299_v7 = vld [vmem:[%s1973_s11 + $0x158] sm:$0xff]  ;;  %v301_v8 = vld [vmem:[%s1973_s11 + $0x1c0] sm:$0xff] }
  0x2a   : > { %290 = vst [vmem:[%s266_s13 + $0x10] sm:$0xff] %v289_v2  ;;  %v303_v9 = vld [vmem:[%s1973_s11 + $0x1c8] sm:$0xff]  ;;  %v305_v10 = vld [vmem:[%s1973_s11 + $0x230] sm:$0xff]  ;;  %v307_v11 = vld [vmem:[%s1973_s11 + $0x238] sm:$0xff] }
  0x2b   : > { %292 = vst [vmem:[%s266_s13 + $0x18] sm:$0xff] %v291_v3  ;;  %v309_v12 = vld [vmem:[%s1973_s11 + $0x2a0] sm:$0xff]  ;;  %v311_v13 = vld [vmem:[%s1973_s11 + $0x2a8] sm:$0xff]  ;;  %v313_v14 = vld [vmem:[%s1973_s11 + $0x310] sm:$0xff] }
  0x2c   : > { %294 = vst [vmem:[%s266_s13 + $0x20] sm:$0xff] %v293_v4  ;;  %v315_v15 = vld [vmem:[%s1973_s11 + $0x318] sm:$0xff] }
  0x2d   : > { %296 = vst [vmem:[%s266_s13 + $0x28] sm:$0xff] %v295_v5 }
  0x2e   : > { %298 = vst [vmem:[%s266_s13 + $0x30] sm:$0xff] %v297_v6 }
  0x2f   : > { %300 = vst [vmem:[%s266_s13 + $0x38] sm:$0xff] %v299_v7 }
  0x30   : > { %302 = vst [vmem:[%s266_s13 + $0x40] sm:$0xff] %v301_v8 }
  0x31   : > { %304 = vst [vmem:[%s266_s13 + $0x48] sm:$0xff] %v303_v9 }
  0x32   : > { %306 = vst [vmem:[%s266_s13 + $0x50] sm:$0xff] %v305_v10 }
  0x33   : > { %308 = vst [vmem:[%s266_s13 + $0x58] sm:$0xff] %v307_v11 }
  0x34   : > { %310 = vst [vmem:[%s266_s13 + $0x60] sm:$0xff] %v309_v12 }
  0x35   : > { %312 = vst [vmem:[%s266_s13 + $0x68] sm:$0xff] %v311_v13 }
  0x36   : > { %314 = vst [vmem:[%s266_s13 + $0x70] sm:$0xff] %v313_v14 }
  0x37   : > { %316 = vst [vmem:[%s266_s13 + $0x78] sm:$0xff] %v315_v15 }
  0x38 PF: > { %p1292_p0 = scmp.ge.s32.totalorder %s1834_s30, 1  ;;  %p342_p1 = scmp.lt.s32.totalorder %s1834_s30, 15 }
  0x3a   : > { %p343_p2 = pnand %p1292_p0, %p342_p1 }
  0x3b   : > { %s349_s9 = sand.u32 (!%p343_p2), 1, %s1810_s24   ;;  %s2183_s10 = sand.u32 (!%p343_p2), 1, %s1802_s22  }
  0x3c   : > { %346 = sbr.rel (%p343_p2) target bundleno = 506 (0x1fa), region = 63  ;;  %s1293_s7 = sshll.u32 (!%p343_p2), %s349_s9, 7 }
  0x3d   : > { %s1294_s8 = sshll.u32 (!%p343_p2), %s2183_s10, 6  ;;  %s1295_s12 = sshll.u32 (!%p343_p2), %s1818_s26, 6 }
  0x3e   : > { %s1297_s16 = sshll.u32 (!%p343_p2), %s1822_s27, 3  ;;  %p404_p3 = scmp.lt.s32.totalorder (!%p343_p2), %s1295_s12, 447 }
  0x3f   : > { %p416_p4 = scmp.lt.s32.totalorder (!%p343_p2), %s1297_s16, 15  ;;  %s2009_s9 = scalar_lea.vmem (!%p343_p2), [#allocation3], %s1293_s7 }
  0x40   : > { %s2011_s10 = scalar_lea.vmem (!%p343_p2), [#allocation4], %s1294_s8  ;;  %p1299_p5 = scmp.ne.s32.totalorder (!%p343_p2), %s1818_s26, 0 }
  0x41   : > { %s2210_s12 = smov (!%p404_p3, %s1295_s12), 447  ;;  %s2212_s16 = smov (!%p416_p4, %s1297_s16), 15 }
  0x42   : > { %s1296_s17 = sshll.u32 %s2210_s12, 2  ;;  %s1298_s0 = sshll.u32 %s2212_s16, 2 }
  0x43   : > { %s2002_s13 = scalar_lea.vmem %s2173_s1, %s1296_s17  ;;  %s2007_s24 = scalar_lea.vmem %s2175_s3, %s1298_s0 }
  0x44   : > { %432 = sbr.rel (%p1299_p5) target bundleno = 82 (0x52), region = 71 }
  0x49   : > { %v1836_v16 = vmov 0.0  }
  0x4a   : > { %433 = vst [vmem:[#allocation2 + $0x30] sm:$0xff] %v1836_v16 }
  0x4b   : > { %434 = vst [vmem:[#allocation2] sm:$0xff] %v1836_v16 }
  0x4c   : > { %435 = vst [vmem:[#allocation2 + $0x18] sm:$0xff] %v1836_v16 }
  0x4d   : > { %436 = vst [vmem:[#allocation2 + $0x10] sm:$0xff] %v1836_v16 }
  0x4e   : > { %437 = vst [vmem:[#allocation2 + $0x8] sm:$0xff] %v1836_v16 }
  0x4f   : > { %438 = vst [vmem:[#allocation2 + $0x20] sm:$0xff] %v1836_v16 }
  0x50   : > { %439 = vst [vmem:[#allocation2 + $0x28] sm:$0xff] %v1836_v16 }
  0x51   : > { %440 = vst [vmem:[#allocation2 + $0x38] sm:$0xff] %v1836_v16 }
  0x52 PF: > { %v1569_v17 = vld [vmem:[%s2002_s13 + $0x38] sm:$0xff]  ;;  %v1568_v21 = vld [vmem:[%s2002_s13 + $0x30] sm:$0xff]  ;;  %v1567_v25 = vld [vmem:[%s2002_s13 + $0x28] sm:$0xff]  ;;  %p1492_p6 = scmp.ne.s32.totalorder %s1818_s26, 6 }
  0x53   : > { %v1577_v18 = vld [vmem:[%s2002_s13 + $0x78] sm:$0xff]  ;;  %801 = vmatpush.bf16.msra.mxu0 %v1569_v17  ;;  %v1576_v22 = vld [vmem:[%s2002_s13 + $0x70] sm:$0xff]  ;;  %v1575_v26 = vld [vmem:[%s2002_s13 + $0x68] sm:$0xff] }
  0x54   : > { %v1585_v19 = vld [vmem:[%s2002_s13 + $0xb8] sm:$0xff]  ;;  %830 = vmatpush.bf16.msra.mxu1 %v1577_v18  ;;  %v1584_v23 = vld [vmem:[%s2002_s13 + $0xb0] sm:$0xff]  ;;  %v1583_v27 = vld [vmem:[%s2002_s13 + $0xa8] sm:$0xff] }
  0x55   : > { %v1593_v20 = vld [vmem:[%s2002_s13 + $0xf8] sm:$0xff]  ;;  %859 = vmatpush.bf16.msra.mxu2 %v1585_v19  ;;  %v1592_v24 = vld [vmem:[%s2002_s13 + $0xf0] sm:$0xff]  ;;  %v1591_v28 = vld [vmem:[%s2002_s13 + $0xe8] sm:$0xff] }
  0x56   : > { %888 = vmatpush.bf16.msra.mxu3 %v1593_v20  ;;  %v1566_v29 = vld [vmem:[%s2002_s13 + $0x20] sm:$0xff]  ;;  %v1565_v33 = vld [vmem:[%s2002_s13 + $0x18] sm:$0xff]  ;;  %v1564_v37 = vld [vmem:[%s2002_s13 + $0x10] sm:$0xff] }
  0x57   : > { %802 = vmatpush.bf16.msra.mxu0 %v1568_v21  ;;  %v1574_v30 = vld [vmem:[%s2002_s13 + $0x60] sm:$0xff]  ;;  %v1573_v34 = vld [vmem:[%s2002_s13 + $0x58] sm:$0xff]  ;;  %v1572_v38 = vld [vmem:[%s2002_s13 + $0x50] sm:$0xff] }
  0x58   : > { %831 = vmatpush.bf16.msra.mxu1 %v1576_v22  ;;  %v1582_v31 = vld [vmem:[%s2002_s13 + $0xa0] sm:$0xff]  ;;  %v1581_v35 = vld [vmem:[%s2002_s13 + $0x98] sm:$0xff]  ;;  %v1580_v39 = vld [vmem:[%s2002_s13 + $0x90] sm:$0xff] }
  0x59   : > { %860 = vmatpush.bf16.msra.mxu2 %v1584_v23  ;;  %v1590_v32 = vld [vmem:[%s2002_s13 + $0xe0] sm:$0xff]  ;;  %v1589_v36 = vld [vmem:[%s2002_s13 + $0xd8] sm:$0xff]  ;;  %v1588_v40 = vld [vmem:[%s2002_s13 + $0xd0] sm:$0xff] }
  0x5a   : > { %889 = vmatpush.bf16.msra.mxu3 %v1592_v24  ;;  %v1563_v41 = vld [vmem:[%s2002_s13 + $0x8] sm:$0xff]  ;;  %v1562_v45 = vld [vmem:[%s2002_s13] sm:$0xff]  ;;  %v1548_v50 = vld [vmem:[%s2009_s9 + $0xc] sm:$0xf0] }
  0x5b   : > { %803 = vmatpush.bf16.msra.mxu0 %v1567_v25  ;;  %v1571_v42 = vld [vmem:[%s2002_s13 + $0x48] sm:$0xff]  ;;  %v1570_v46 = vld [vmem:[%s2002_s13 + $0x40] sm:$0xff]  ;;  %v1304_v52 = vld [vmem:[%s2009_s9 + $0x10] sm:$0xf0] }
  0x5c   : > { %832 = vmatpush.bf16.msra.mxu1 %v1575_v26  ;;  %v1579_v43 = vld [vmem:[%s2002_s13 + $0x88] sm:$0xff]  ;;  %v1578_v47 = vld [vmem:[%s2002_s13 + $0x80] sm:$0xff]  ;;  %v1549_v54 = vld [vmem:[%s2009_s9 + $0x14] sm:$0xf0] }
  0x5d   : > { %861 = vmatpush.bf16.msra.mxu2 %v1583_v27  ;;  %v1587_v44 = vld [vmem:[%s2002_s13 + $0xc8] sm:$0xff]  ;;  %v1586_v48 = vld [vmem:[%s2002_s13 + $0xc0] sm:$0xff]  ;;  %v1312_v56 = vld [vmem:[%s2009_s9 + $0x18] sm:$0xf0] }
  0x5e   : > { %890 = vmatpush.bf16.msra.mxu3 %v1591_v28  ;;  %v1302_v49 = vld [vmem:[%s2009_s9] sm:$0xf]  ;;  %v1546_v51 = vld [vmem:[%s2009_s9 + $0x4] sm:$0xf]  ;;  %v1310_v53 = vld [vmem:[%s2009_s9 + $0x8] sm:$0xf] }
  0x5f   : > { %804 = vmatpush.bf16.msra.mxu0 %v1566_v29  ;;  %v1547_v55 = vld [vmem:[%s2009_s9 + $0xc] sm:$0xf]  ;;  %v1303_v57 = vor.u32 %v1548_v50, %v1302_v49  ;;  %v1307_v58 = vor.u32 %v1546_v51, %v1304_v52  ;;  %v1311_v59 = vor.u32 %v1549_v54, %v1310_v53  ;;  %v1318_v61 = vld [vmem:[%s2009_s9 + $0x20] sm:$0xf]  ;;  %v1552_v62 = vld [vmem:[%s2009_s9 + $0x2c] sm:$0xf0] }
  0x60   : > { %833 = vmatpush.bf16.msra.mxu1 %v1574_v30  ;;  %v1315_v60 = vor.u32 %v1547_v55, %v1312_v56  ;;  %v1550_v63 = vld [vmem:[%s2009_s9 + $0x24] sm:$0xf]  ;;  %v1320_v0 = vld [vmem:[%s2009_s9 + $0x30] sm:$0xf0]  ;;  %v1326_v1 = vld [vmem:[%s2009_s9 + $0x28] sm:$0xf]  ;;  %v1319_v5 = vor.u32 %v1552_v62, %v1318_v61 }
  0x61   : > { %862 = vmatpush.bf16.msra.mxu2 %v1582_v31  ;;  %v1553_v2 = vld [vmem:[%s2009_s9 + $0x34] sm:$0xf0]  ;;  %v1551_v3 = vld [vmem:[%s2009_s9 + $0x2c] sm:$0xf]  ;;  %v1328_v4 = vld [vmem:[%s2009_s9 + $0x38] sm:$0xf0]  ;;  %v1323_v6 = vor.u32 %v1550_v63, %v1320_v0 }
  0x62   : > { %891 = vmatpush.bf16.msra.mxu3 %v1590_v32  ;;  %v1327_v7 = vor.u32 %v1553_v2, %v1326_v1  ;;  %v1331_v8 = vor.u32 %v1551_v3, %v1328_v4  ;;  %v1334_v9 = vld [vmem:[%s2009_s9 + $0x40] sm:$0xf]  ;;  %v1556_v10 = vld [vmem:[%s2009_s9 + $0x4c] sm:$0xf0]  ;;  %v1554_v11 = vld [vmem:[%s2009_s9 + $0x44] sm:$0xf] }
  0x63   : > { %805 = vmatpush.bf16.msra.mxu0 %v1565_v33  ;;  %v1336_v12 = vld [vmem:[%s2009_s9 + $0x50] sm:$0xf0]  ;;  %v1342_v13 = vld [vmem:[%s2009_s9 + $0x48] sm:$0xf]  ;;  %v1557_v14 = vld [vmem:[%s2009_s9 + $0x54] sm:$0xf0]  ;;  %v1335_v17 = vor.u32 %v1556_v10, %v1334_v9 }
  0x64   : > { %834 = vmatpush.bf16.msra.mxu1 %v1573_v34  ;;  %v1555_v15 = vld [vmem:[%s2009_s9 + $0x4c] sm:$0xf]  ;;  %v1344_v16 = vld [vmem:[%s2009_s9 + $0x58] sm:$0xf0]  ;;  %v1339_v18 = vor.u32 %v1554_v11, %v1336_v12  ;;  %v1343_v19 = vor.u32 %v1557_v14, %v1342_v13  ;;  %v1350_v21 = vld [vmem:[%s2009_s9 + $0x60] sm:$0xf] }
  0x65   : > { %863 = vmatpush.bf16.msra.mxu2 %v1581_v35  ;;  %v1347_v20 = vor.u32 %v1555_v15, %v1344_v16  ;;  %v1560_v22 = vld [vmem:[%s2009_s9 + $0x6c] sm:$0xf0]  ;;  %v1558_v23 = vld [vmem:[%s2009_s9 + $0x64] sm:$0xf]  ;;  %v1352_v24 = vld [vmem:[%s2009_s9 + $0x70] sm:$0xf0] }
  0x66   : > { %892 = vmatpush.bf16.msra.mxu3 %v1589_v36  ;;  %v1358_v25 = vld [vmem:[%s2009_s9 + $0x68] sm:$0xf]  ;;  %v1561_v26 = vld [vmem:[%s2009_s9 + $0x74] sm:$0xf0]  ;;  %v1559_v27 = vld [vmem:[%s2009_s9 + $0x6c] sm:$0xf]  ;;  %v1351_v29 = vor.u32 %v1560_v22, %v1350_v21  ;;  %v1355_v30 = vor.u32 %v1558_v23, %v1352_v24 }
  0x67   : > { %806 = vmatpush.bf16.msra.mxu0 %v1564_v37  ;;  %v1360_v28 = vld [vmem:[%s2009_s9 + $0x78] sm:$0xf0]  ;;  %v1359_v31 = vor.u32 %v1561_v26, %v1358_v25  ;;  %v442_v50 = vld [vmem:[#allocation2] sm:$0xff]  ;;  %v444_v4 = vld [vmem:[#allocation2 + $0x10] sm:$0xff] }
  0x68   : > { %835 = vmatpush.bf16.msra.mxu1 %v1572_v38  ;;  %v1363_v32 = vor.u32 %v1559_v27, %v1360_v28  ;;  %v445_v13 = vld [vmem:[#allocation2 + $0x8] sm:$0xff] }
  0x69   : > { %864 = vmatpush.bf16.msra.mxu2 %v1580_v39 }
  0x6a   : > { %893 = vmatpush.bf16.msra.mxu3 %v1588_v40 }
  0x6b   : > { %807 = vmatpush.bf16.msra.mxu0 %v1563_v41  ;;  %v441_v41 = vld [vmem:[#allocation2 + $0x30] sm:$0xff] }
  0x6c   : > { %836 = vmatpush.bf16.msra.mxu1 %v1571_v42 }
  0x6d   : > { %865 = vmatpush.bf16.msra.mxu2 %v1579_v43 }
  0x6e   : > { %894 = vmatpush.bf16.msra.mxu3 %v1587_v44 }
  0x6f   : > { %808 = vmatpush.bf16.msra.mxu0 %v1562_v45 }
  0x70   : > { %837 = vmatpush.bf16.msra.mxu1 %v1570_v46 }
  0x71   : > { %866 = vmatpush.bf16.msra.mxu2 %v1578_v47 }
  0x72   : > { %895 = vmatpush.bf16.msra.mxu3 %v1586_v48  ;;  %809 = vmatmul.bf16.vlgmr.msra.gmra.mxu0 %v1303_v57 }
  0x73   : > { %838 = vmatmul.bf16.vlgmr.msra.gmra.mxu1 %v1307_v58 }
  0x74   : > { %867 = vmatmul.bf16.vlgmr.msra.gmra.mxu2 %v1311_v59  ;;  %v443_v59 = vld [vmem:[#allocation2 + $0x18] sm:$0xff] }
  0x75   : > { %896 = vmatmul.bf16.vlgmr.msra.gmra.mxu3 %v1315_v60 }
  0x82   : > { %814 = vmatmul.bf16.gmra.mxu0 %v1319_v5 }
  0x83   : > { %843 = vmatmul.bf16.gmra.mxu1 %v1323_v6 }
  0x84   : > { %872 = vmatmul.bf16.gmra.mxu2 %v1327_v7 }
  0x85   : > { %901 = vmatmul.bf16.gmra.mxu3 %v1331_v8 }
  0x92   : > { %819 = vmatmul.bf16.gmra.mxu0 %v1335_v17 }
  0x93   : > { %848 = vmatmul.bf16.gmra.mxu1 %v1339_v18 }
  0x94   : > { %877 = vmatmul.bf16.gmra.mxu2 %v1343_v19 }
  0x95   : > { %906 = vmatmul.bf16.gmra.mxu3 %v1347_v20  ;;  %v446_v20 = vld [vmem:[#allocation2 + $0x20] sm:$0xff] }
  0xa2   : > { %824 = vmatmul.bf16.gmra.mxu0 %v1351_v29  ;;  %v447_v29 = vld [vmem:[#allocation2 + $0x28] sm:$0xff] }
  0xa3   : > { %853 = vmatmul.bf16.gmra.mxu1 %v1355_v30 }
  0xa4   : > { %882 = vmatmul.bf16.gmra.mxu2 %v1359_v31 }
  0xa5   : > { %911 = vmatmul.bf16.gmra.mxu3 %v1363_v32 }
  0xef   : > { %v810_v33 = vpop.f32.mrf.mxu0 }
  0xf0   : > { %v839_v34 = vpop.f32.mrf.mxu1 }
  0xf1   : > { %v840_v35 = vadd.f32 %v839_v34, %v810_v33 }
  0xf7   : > { %v868_v36 = vpop.f32.mrf.mxu2  ;;  %v812_v39 = vpop.f32.mrf.mxu0 }
  0xf8   : > { %v897_v37 = vpop.f32.mrf.mxu3  ;;  %v869_v38 = vadd.f32 %v868_v36, %v840_v35  ;;  %v841_v40 = vpop.f32.mrf.mxu1 }
  0xf9   : > { %v842_v44 = vadd.f32 %v841_v40, %v812_v39 }
  0xfa   : > { %v898_v42 = vadd.f32 %v897_v37, %v869_v38  ;;  %v448_v37 = vld [vmem:[#allocation2 + $0x38] sm:$0xff] }
  0xfc   : > { %v917_v43 = vadd.f32 %v898_v42, %v441_v41 }
  0xfe   : > { %925 = vst [vmem:[#allocation2 + $0x30] sm:$0xff] %v917_v43 }
  0xff   : > { %v870_v45 = vpop.f32.mrf.mxu2  ;;  %v815_v48 = vpop.f32.mrf.mxu0 }
 0x100   : > { %v899_v46 = vpop.f32.mrf.mxu3  ;;  %v871_v47 = vadd.f32 %v870_v45, %v842_v44  ;;  %v844_v49 = vpop.f32.mrf.mxu1 }
 0x101   : > { %v845_v53 = vadd.f32 %v844_v49, %v815_v48 }
 0x102   : > { %v900_v51 = vadd.f32 %v899_v46, %v871_v47 }
 0x104   : > { %v918_v52 = vadd.f32 %v900_v51, %v442_v50 }
 0x106   : > { %926 = vst [vmem:[#allocation2] sm:$0xff] %v918_v52 }
 0x107   : > { %v873_v54 = vpop.f32.mrf.mxu2  ;;  %v817_v57 = vpop.f32.mrf.mxu0 }
 0x108   : > { %v902_v55 = vpop.f32.mrf.mxu3  ;;  %v874_v56 = vadd.f32 %v873_v54, %v845_v53  ;;  %v846_v58 = vpop.f32.mrf.mxu1 }
 0x109   : > { %v847_v62 = vadd.f32 %v846_v58, %v817_v57 }
 0x10a   : > { %v903_v60 = vadd.f32 %v902_v55, %v874_v56 }
 0x10c   : > { %v919_v61 = vadd.f32 %v903_v60, %v443_v59 }
 0x10e   : > { %927 = vst [vmem:[#allocation2 + $0x18] sm:$0xff] %v919_v61 }
 0x10f   : > { %v875_v63 = vpop.f32.mrf.mxu2  ;;  %v820_v2 = vpop.f32.mrf.mxu0 }
 0x110   : > { %v904_v0 = vpop.f32.mrf.mxu3  ;;  %v876_v1 = vadd.f32 %v875_v63, %v847_v62  ;;  %v849_v3 = vpop.f32.mrf.mxu1 }
 0x111   : > { %v850_v7 = vadd.f32 %v849_v3, %v820_v2 }
 0x112   : > { %v905_v5 = vadd.f32 %v904_v0, %v876_v1 }
 0x114   : > { %v920_v6 = vadd.f32 %v905_v5, %v444_v4 }
 0x116   : > { %928 = vst [vmem:[#allocation2 + $0x10] sm:$0xff] %v920_v6 }
 0x117   : > { %v878_v8 = vpop.f32.mrf.mxu2  ;;  %v822_v11 = vpop.f32.mrf.mxu0 }
 0x118   : > { %v907_v9 = vpop.f32.mrf.mxu3  ;;  %v879_v10 = vadd.f32 %v878_v8, %v850_v7  ;;  %v851_v12 = vpop.f32.mrf.mxu1 }
 0x119   : > { %v852_v16 = vadd.f32 %v851_v12, %v822_v11 }
 0x11a   : > { %v908_v14 = vadd.f32 %v907_v9, %v879_v10 }
 0x11c   : > { %v921_v15 = vadd.f32 %v908_v14, %v445_v13 }
 0x11e   : > { %929 = vst [vmem:[#allocation2 + $0x8] sm:$0xff] %v921_v15 }
 0x11f   : > { %v880_v17 = vpop.f32.mrf.mxu2  ;;  %v825_v21 = vpop.f32.mrf.mxu0 }
 0x120   : > { %v909_v18 = vpop.f32.mrf.mxu3  ;;  %v881_v19 = vadd.f32 %v880_v17, %v852_v16  ;;  %v854_v22 = vpop.f32.mrf.mxu1 }
 0x121   : > { %v855_v25 = vadd.f32 %v854_v22, %v825_v21 }
 0x122   : > { %v910_v23 = vadd.f32 %v909_v18, %v881_v19 }
 0x124   : > { %v922_v24 = vadd.f32 %v910_v23, %v446_v20 }
 0x126   : > { %930 = vst [vmem:[#allocation2 + $0x20] sm:$0xff] %v922_v24 }
 0x127   : > { %v883_v26 = vpop.f32.mrf.mxu2  ;;  %v827_v31 = vpop.f32.mrf.mxu0 }
 0x128   : > { %v912_v27 = vpop.f32.mrf.mxu3  ;;  %v884_v28 = vadd.f32 %v883_v26, %v855_v25  ;;  %v856_v32 = vpop.f32.mrf.mxu1 }
 0x129   : > { %v857_v34 = vadd.f32 %v856_v32, %v827_v31 }
 0x12a   : > { %v913_v30 = vadd.f32 %v912_v27, %v884_v28 }
 0x12c   : > { %v923_v33 = vadd.f32 %v913_v30, %v447_v29 }
 0x12e   : > { %931 = vst [vmem:[#allocation2 + $0x28] sm:$0xff] %v923_v33 }
 0x12f   : > { %v885_v35 = vpop.f32.mrf.mxu2 }
 0x130   : > { %v886_v36 = vadd.f32 %v885_v35, %v857_v34  ;;  %v914_v38 = vpop.f32.mrf.mxu3 }
 0x132   : > { %v915_v39 = vadd.f32 %v914_v38, %v886_v36  ;;  %936 = sbr.rel (%p1492_p6) target bundleno = 490 (0x1ea), region = 75 }
 0x134   : > { %v924_v40 = vadd.f32 %v915_v39, %v448_v37 }
 0x136   : > { %932 = vst [vmem:[#allocation2 + $0x38] sm:$0xff] %v924_v40 }
 0x137   : > { %v1605_v41 = vld [vmem:[%s2176_s4 + $0x38] sm:$0xff]  ;;  %v1604_v42 = vld [vmem:[%s2176_s4 + $0x30] sm:$0xff]  ;;  %v1603_v43 = vld [vmem:[%s2176_s4 + $0x28] sm:$0xff] }
 0x138   : > { %1033 = vmatpush.bf16.msra.mxu0 %v1605_v41  ;;  %1607 = vmatpush.bf16.msra.mxu1 %v1605_v41  ;;  %v1602_v44 = vld [vmem:[%s2176_s4 + $0x20] sm:$0xff]  ;;  %v1601_v45 = vld [vmem:[%s2176_s4 + $0x18] sm:$0xff]  ;;  %v1600_v46 = vld [vmem:[%s2176_s4 + $0x10] sm:$0xff] }
 0x139   : > { %1608 = vmatpush.bf16.msra.mxu2 %v1605_v41  ;;  %1609 = vmatpush.bf16.msra.mxu3 %v1605_v41  ;;  %v1599_v47 = vld [vmem:[%s2176_s4 + $0x8] sm:$0xff]  ;;  %v1598_v48 = vld [vmem:[%s2176_s4] sm:$0xff]  ;;  %v1596_v51 = vld [vmem:[%s2007_s24 + $0x10] sm:$0xff] }
 0x13a   : > { %v1594_v49 = vld [vmem:[%s2007_s24] sm:$0xff]  ;;  %v1595_v50 = vld [vmem:[%s2007_s24 + $0x8] sm:$0xff]  ;;  %v1597_v52 = vld [vmem:[%s2007_s24 + $0x18] sm:$0xff] }
 0x13b   : > { %v1722_v53 = vld [vmem:[%s2174_s2] ss:$0 sm:$0xff]  ;;  %v1062_v54 = vld [vmem:[#allocation2 + $0x30] sm:$0xff]  ;;  %v1064_v55 = vld [vmem:[#allocation2 + $0x18] sm:$0xff] }
 0x13c   : > { %1034 = vmatpush.bf16.msra.mxu0 %v1604_v42  ;;  %1610 = vmatpush.bf16.msra.mxu1 %v1604_v42  ;;  %v1074_v56 = vadd.f32 %v1722_v53, %v1062_v54  ;;  %v1076_v57 = vadd.f32 %v1722_v53, %v1064_v55  ;;  %v1723_v58 = vld [vmem:[%s2177_s5] ss:$0 sm:$0xff]  ;;  %v1066_v63 = vld [vmem:[#allocation2 + $0x8] sm:$0xff]  ;;  %v1065_v2 = vld [vmem:[#allocation2 + $0x10] sm:$0xff] }
 0x13d   : > { %1611 = vmatpush.bf16.msra.mxu2 %v1604_v42  ;;  %1612 = vmatpush.bf16.msra.mxu3 %v1604_v42  ;;  %v1068_v0 = vld [vmem:[#allocation2 + $0x28] sm:$0xff]  ;;  %v1063_v1 = vld [vmem:[#allocation2] sm:$0xff]  ;;  %v1078_v5 = vadd.f32 %v1722_v53, %v1066_v63  ;;  %v1077_v8 = vadd.f32 %v1722_v53, %v1065_v2  ;;  %v1069_v18 = vld [vmem:[#allocation2 + $0x38] sm:$0xff] }
 0x13e   : > { %v1080_v6 = vadd.f32 %v1722_v53, %v1068_v0  ;;  %v1075_v7 = vadd.f32 %v1722_v53, %v1063_v1  ;;  %v1067_v17 = vld [vmem:[#allocation2 + $0x20] sm:$0xff]  ;;  %v1081_v24 = vadd.f32 %v1722_v53, %v1069_v18 }
 0x13f   : > { %v1079_v23 = vadd.f32 %v1722_v53, %v1067_v17 }
 0x140   : > { %1035 = vmatpush.bf16.msra.mxu0 %v1603_v43  ;;  %1613 = vmatpush.bf16.msra.mxu1 %v1603_v43 }
 0x141   : > { %1614 = vmatpush.bf16.msra.mxu2 %v1603_v43  ;;  %1615 = vmatpush.bf16.msra.mxu3 %v1603_v43 }
 0x144   : > { %1036 = vmatpush.bf16.msra.mxu0 %v1602_v44  ;;  %1616 = vmatpush.bf16.msra.mxu1 %v1602_v44 }
 0x145   : > { %1617 = vmatpush.bf16.msra.mxu2 %v1602_v44  ;;  %1618 = vmatpush.bf16.msra.mxu3 %v1602_v44 }
 0x148   : > { %1037 = vmatpush.bf16.msra.mxu0 %v1601_v45  ;;  %1619 = vmatpush.bf16.msra.mxu1 %v1601_v45 }
 0x149   : > { %1620 = vmatpush.bf16.msra.mxu2 %v1601_v45  ;;  %1621 = vmatpush.bf16.msra.mxu3 %v1601_v45 }
 0x14c   : > { %1038 = vmatpush.bf16.msra.mxu0 %v1600_v46  ;;  %1622 = vmatpush.bf16.msra.mxu1 %v1600_v46 }
 0x14d   : > { %1623 = vmatpush.bf16.msra.mxu2 %v1600_v46  ;;  %1624 = vmatpush.bf16.msra.mxu3 %v1600_v46 }
 0x150   : > { %1039 = vmatpush.bf16.msra.mxu0 %v1599_v47  ;;  %1625 = vmatpush.bf16.msra.mxu1 %v1599_v47 }
 0x151   : > { %1626 = vmatpush.bf16.msra.mxu2 %v1599_v47  ;;  %1627 = vmatpush.bf16.msra.mxu3 %v1599_v47 }
 0x154   : > { %1040 = vmatpush.bf16.msra.mxu0 %v1598_v48  ;;  %1628 = vmatpush.bf16.msra.mxu1 %v1598_v48 }
 0x155   : > { %1629 = vmatpush.bf16.msra.mxu2 %v1598_v48  ;;  %1630 = vmatpush.bf16.msra.mxu3 %v1598_v48 }
 0x157   : > { %1041 = vmatmul.bf16.vlgmr.msra.gmra.mxu0 %v1594_v49  ;;  %1046 = vmatmul.bf16.vlgmr.msra.gmra.mxu1 %v1595_v50 }
 0x158   : > { %1051 = vmatmul.bf16.vlgmr.msra.gmra.mxu2 %v1596_v51  ;;  %1056 = vmatmul.bf16.vlgmr.msra.gmra.mxu3 %v1597_v52 }
 0x1d4   : > { %v1042_v59 = vpop.f32.mrf.mxu0  ;;  %v1047_v60 = vpop.f32.mrf.mxu1 }
 0x1d5   : > { %v1082_v61 = vadd.f32 %v1074_v56, %v1042_v59  ;;  %v1084_v62 = vadd.f32 %v1076_v57, %v1047_v60 }
 0x1d7   : > { %v1094_v3 = vadd.f32 %v1723_v58, %v1082_v61  ;;  %v1096_v4 = vadd.f32 %v1723_v58, %v1084_v62 }
 0x1d9   : > { %1102 = vst [vmem:[%s2011_s10] sm:$0xff] %v1094_v3 }
 0x1da   : > { %1104 = vst [vmem:[%s2011_s10 + $0x10] sm:$0xff] %v1096_v4 }
 0x1db   : > { %v1052_v9 = vpop.f32.mrf.mxu2  ;;  %v1057_v10 = vpop.f32.mrf.mxu3 }
 0x1dc   : > { %v1086_v11 = vadd.f32 %v1078_v5, %v1052_v9  ;;  %v1088_v12 = vadd.f32 %v1080_v6, %v1057_v10  ;;  %v1044_v13 = vpop.f32.mrf.mxu0  ;;  %v1049_v14 = vpop.f32.mrf.mxu1 }
 0x1dd   : > { %v1083_v15 = vadd.f32 %v1075_v7, %v1044_v13  ;;  %v1085_v16 = vadd.f32 %v1077_v8, %v1049_v14 }
 0x1de   : > { %v1098_v19 = vadd.f32 %v1723_v58, %v1086_v11  ;;  %v1100_v20 = vadd.f32 %v1723_v58, %v1088_v12 }
 0x1df   : > { %v1095_v21 = vadd.f32 %v1723_v58, %v1083_v15  ;;  %v1097_v22 = vadd.f32 %v1723_v58, %v1085_v16 }
 0x1e0   : > { %1106 = vst [vmem:[%s2011_s10 + $0x20] sm:$0xff] %v1098_v19 }
 0x1e1   : > { %1108 = vst [vmem:[%s2011_s10 + $0x30] sm:$0xff] %v1100_v20 }
 0x1e2   : > { %1103 = vst [vmem:[%s2011_s10 + $0x8] sm:$0xff] %v1095_v21 }
 0x1e3   : > { %1105 = vst [vmem:[%s2011_s10 + $0x18] sm:$0xff] %v1097_v22  ;;  %v1054_v25 = vpop.f32.mrf.mxu2  ;;  %v1059_v26 = vpop.f32.mrf.mxu3 }
 0x1e4   : > { %v1087_v27 = vadd.f32 %v1079_v23, %v1054_v25  ;;  %v1089_v28 = vadd.f32 %v1081_v24, %v1059_v26 }
 0x1e6   : > { %v1099_v29 = vadd.f32 %v1723_v58, %v1087_v27  ;;  %v1101_v30 = vadd.f32 %v1723_v58, %v1089_v28 }
 0x1e8   : > { %1107 = vst [vmem:[%s2011_s10 + $0x28] sm:$0xff] %v1099_v29 }
 0x1e9   : > { %1109 = vst [vmem:[%s2011_s10 + $0x38] sm:$0xff] %v1101_v30 }
 0x1ea PF: > { %s1606_s24 = sshll.u32 %s1822_s27, 6  ;;  %s1124_s11 = sshll.u32 %s2011_s10, 4  ;;  %s1125_s11 = int_to_ptr.vmem [resolvable:$true] %s1124_s11 }
 0x1eb   : > { %s1123_s14 = scalar_lea.hbm %s2178_s6, %s1606_s24  ;;  %s2193_s9 = sand.u32 1, %s1802_s22  }
 0x1ec   : > { %s1126_s13 = sshll.u32 %s1123_s14, 4  ;;  %s1111_s0 = scalar_lea.sflag [#allocation5], %s2193_s9  ;;  %s1127_s13 = int_to_ptr.hbm [resolvable:$true] %s1126_s13 }
 0x1ed   : > { %s1738_s28 = sshra.s32 %s1127_s13, 4  ;;  %s1744_s27 = scalar_lea.hbm %s2178_s6, 128  ;;  %s1739_s28 = int_to_ptr.hbm [resolvable:$true] %s1738_s28 }
 0x1ee   : > { %s1740_s29 = scalar_lea.hbm %s1739_s28, 64  ;;  %p1745_p11 = scmp.lt.s32.totalorder %s1739_s28, %s2178_s6 }
 0x1ef   : > { %p1741_p8 = scmp.ne.s32.totalorder %s1739_s28, %s1740_s29  ;;  %p1746_p13 = scmp.lt.s32.totalorder %s1744_s27, %s1740_s29 }
 0x1f1   : > { %p1742_p9 = pnand %p1741_p8, %p1946_p7  ;;  %p1747_p0 = por %p1746_p13, %p1745_p11 }
 0x1f3   : > { %p1743_p10 = pneg %p1742_p9 }
 0x1f5   : > { %p1748_p1 = pnand %p1747_p0, %p1743_p10 }
 0x1f7   : > { %1751 = shalt.err (!%p1748_p1)
}
 0x1f8   : > { %s1837_s10 = smov 128   ;;  %s1838_s24 = smov 8  }
 0x1f9   : > { %1632 = dma.vmem_to_hbm [thread:$0]  (%p1946_p7), %s1125_s11, 1024, %s1127_s13, %s1111_s0, %s1837_s10, %s1837_s10, %s1838_s24  }
 0x1fa PF: > { %p1638_p2 = scmp.ge.s32.totalorder %s1834_s30, 2  ;;  %s1141_s16 = sand.u32 1, %s1798_s21  }
 0x1fb   : > { %s1142_s17 = scalar_lea.sflag [#allocation5], %s1141_s16 }
 0x1fc   : > { %p1635_p3 = pnand %p1638_p2, %p1954_p12 }
 0x1fe   : > { %p1636_p4 = pneg %p1635_p3 }
 0x200   : > { %1793 = dma.done.wait (%p1636_p4), %s1142_s17, 1024  }
 0x201   : > { %1795 = vsyncadd (%p1636_p4), %s1142_s17, 4294966272  ;;  %s19_s30 = sadd.s32 1, %s1834_s30   ;;  %s2194_s26 = sld [smem:[#allocation7_spill]] }
 0x202   : > { %p16_p5 = scmp.ge.s32.totalorder %s19_s30, 16   ;;  %s2195_s27 = sld [smem:[#allocation8_spill]] }
 0x203   : > { %s2196_s28 = sld [smem:[#allocation9_spill]]  ;;  %s2198_s21 = smov %s1802_s22 }
 0x204   : > { %s2197_s29 = sld [smem:[#allocation10_spill]]  ;;  %s2199_s22 = smov %s1806_s23 }
 0x205   : > { %s2200_s23 = smov %s1959_s19  ;;  %s2201_s24 = smov %s1814_s25 }
 0x206   : > { %s2202_s25 = smov %s1962_s20  ;;  %18 = sbr.rel (!%p16_p5) target bundleno = 8 (0x8), region = 130 }
 0x20b   :  { %1148 = vsyncpa [#allocation5], 1 }
 0x20c   :  { %1150 = vsyncpa [#allocation5 + $0x1], 1 }

</bundles_post_ra>
